<compile_context>
chip_gen: v6e
topology: v6e:2x2x1
jax: 0.10.0
libtpu: 0.0.40
codegen_flags: <defaults>
</compile_context>

<pallas_src>
import functools

import numpy as np
import jax
import jax.numpy as jnp
from jax import lax
from jax.experimental import pallas as pl
from jax.experimental.pallas import tpu as pltpu

KS = 7          # spatial-attention conv kernel size
PAD = KS // 2
NTAPS = KS * KS
CH = 128        # inner channel chunk (one bf16 sublane-packed slab group per load)


def _attr_kernel(feat_ref, convw_ref, convb_ref, linw_ref, linb_ref, mask_ref,
                 scores_ref, attn_ref, pm_ref, cmax_ref, *, H, W, A, NB):
    """Grid is (batch_block, c_block); the c axis is a reduction ("arbitrary").

    feat_ref   : (NB, C_BLK, HW)  bf16  feature C-block of NB batch elements
    convw_ref  : (2*A, NTAPS)     f32   conv weights; rows [0:A]=avg channel, [A:2A]=max
    convb_ref  : (A, 1)           f32   conv bias
    linw_ref   : (A_pad, C_BLK)   bf16  [lin_w ; ones/C ; zero pad] columns of this C-block
    linb_ref   : (A, 1)           f32   linear bias
    mask_ref   : (NTAPS, HW)      f32   host-precomputed zero-padding validity masks
    scores_ref : (NB, A, 1)       f32   output attribute scores
    attn_ref   : (NB, A, HW)      f32   output attention maps (flattened spatial)
    pm_ref     : (NB, A_pad, HW)  f32   scratch: proj rows + channel-mean row accumulator
    cmax_ref   : (NB, 1, HW)      f32   scratch: channel-max accumulator
    """
    HW = H * W
    c = pl.program_id(1)
    nC = pl.num_programs(1)
    C_BLK = feat_ref.shape[1]
    nchunks = C_BLK // CH
    A_pad = linw_ref.shape[0]

    @pl.when(c == 0)
    def _():
        pm_ref[...] = jnp.zeros_like(pm_ref)
        cmax_ref[...] = jnp.full_like(cmax_ref, -jnp.inf)

    # ---- fused single-sweep: partial matmul (proj + mean row) AND running max ----
    for n in range(NB):
        pm = jnp.zeros((A_pad, HW), jnp.float32)
        mx = jnp.full((CH, HW), -jnp.inf, dtype=feat_ref.dtype)   # bf16 elementwise max
        # fully-unrolled static chunk loop: each chunk is loaded from VMEM exactly once
        # and feeds both the MXU (dot) and the VPU (max).
        for ci in range(nchunks):
            base = ci * CH
            blk = feat_ref[n, base:base + CH, :]                  # (CH, HW) bf16
            pm = pm + jnp.dot(linw_ref[:, base:base + CH], blk,
                              preferred_element_type=jnp.float32)
            mx = jnp.maximum(mx, blk)
        pm_ref[n] = pm_ref[n] + pm
        # one cross-sublane reduce per C-block (was one per 128-channel chunk in v2)
        local_max = jnp.max(mx.astype(jnp.float32), axis=0, keepdims=True)
        cmax_ref[n, 0:1, :] = jnp.maximum(cmax_ref[n, 0:1, :], local_max)

    # ---- epilogue on the last C step: conv + sigmoid + attended pool + linear ----
    @pl.when(c == nC - 1)
    def _():
        for n in range(NB):
            proj = pm_ref[n, 0:A, :]                              # (A, HW) f32
            cmean = pm_ref[n, A:A + 1, :]                         # (1, HW)
            cmax = cmax_ref[n, 0:1, :]                            # (1, HW)

            # 7x7 "same" conv over [mean; max], all attention heads at once:
            # one pltpu.roll per tap + host mask + (A,1)x(1,HW) broadcast-FMA.
            x2 = jnp.concatenate([cmean, cmax], axis=0)           # (2, HW)
            acc = jnp.zeros((A, HW), jnp.float32)
            t = 0
            for dh in range(-PAD, PAD + 1):
                for dw in range(-PAD, PAD + 1):
                    shift = (-(dh * W + dw)) % HW
                    shifted = x2 if shift == 0 else pltpu.roll(x2, shift, axis=1)
                    if dh == 0 and dw == 0:
                        masked = shifted                          # center tap: all-ones mask
                    else:
                        masked = shifted * mask_ref[t:t + 1, :]   # zero the wrapped taps
                    w_avg = convw_ref[0:A, t:t + 1]               # (A, 1)
                    w_max = convw_ref[A:2 * A, t:t + 1]           # (A, 1)
                    acc = acc + w_avg * masked[0:1, :] + w_max * masked[1:2, :]
                    t += 1

            attn = jax.nn.sigmoid(acc + convb_ref[...])           # (A, HW)
            attn_ref[n] = attn.astype(attn_ref.dtype)

            # attended global-avg-pool + linear head, fused:
            # score[a] = (1/HW) * sum_p attn[a,p] * (lin_w[a,:] . f[:,p]) + lin_b[a]
            pooled = jnp.sum(proj * attn, axis=1, keepdims=True) * (1.0 / HW)  # (A, 1)
            scores_ref[n] = (pooled + linb_ref[...]).astype(scores_ref.dtype)


def _build_masks(H, W):
    """Validity masks for the 49 conv taps (data-independent -> computed on host once)."""
    hh, ww = np.meshgrid(np.arange(H), np.arange(W), indexing="ij")
    masks = np.zeros((NTAPS, H * W), np.float32)
    t = 0
    for dh in range(-PAD, PAD + 1):
        for dw in range(-PAD, PAD + 1):
            valid = ((hh + dh >= 0) & (hh + dh < H) &
                     (ww + dw >= 0) & (ww + dw < W))
            masks[t] = valid.reshape(-1).astype(np.float32)
            t += 1
    return jnp.asarray(masks)


def attribute_score_predictor(features, conv_w, conv_b, lin_w, lin_b, *, nb=1):
    """features: (B, C, H, W) NCHW.
    conv_w: (A, 2, 7, 7), conv_b: (A,), lin_w: (A, C), lin_b: (A,), nb: batch elems/step.
    Returns (scores (B, A), [attention_map_i (B, 1, H, W) for i in range(A)])."""
    B, C, H, W = features.shape
    A = lin_w.shape[0]
    HW = H * W
    assert HW % 128 == 0, "flattened spatial dim must be a multiple of 128"
    assert C % CH == 0, "channel dim must be a multiple of 128"
    NB = nb
    assert B % NB == 0, "batch must be divisible by the batch block"

    # Split C into 2-4 grid blocks of >= ~512 KiB bf16 so each TensorCore gets several
    # pipelined steps even when B is tiny (restores DMA/compute overlap on v7x).
    feat_bytes_per_elem = C * HW * 2
    NC = max(1, min(4, feat_bytes_per_elem // (512 * 1024)))
    while C % (NC * CH) != 0:
        NC -= 1
    C_BLK = C // NC

    # bf16 features / linear weights halve HBM traffic; accumulation stays f32 on the MXU.
    feat = features.reshape(B, C, HW).astype(jnp.bfloat16)

    # Conv weights packed as (2*A, 49): rows [0:A] = avg channel, [A:2A] = max channel,
    # taps in (dh, dw) row-major order (matches the in-kernel tap loop).
    conv_w_packed = jnp.transpose(conv_w, (1, 0, 2, 3)).reshape(2 * A, NTAPS)
    conv_w_packed = conv_w_packed.astype(jnp.float32)
    conv_b2 = conv_b.reshape(A, 1).astype(jnp.float32)
    lin_b2 = lin_b.reshape(A, 1).astype(jnp.float32)

    # Linear weights + a 1/C row (fuses the channel mean into the MXU matmul),
    # zero-padded to a multiple of 8 rows for clean sublane alignment.
    A_pad = ((A + 1 + 7) // 8) * 8
    lin_w_ext = jnp.zeros((A_pad, C), jnp.float32)
    lin_w_ext = lin_w_ext.at[:A].set(lin_w.astype(jnp.float32))
    lin_w_ext = lin_w_ext.at[A].set(1.0 / C)
    lin_w_ext = lin_w_ext.astype(jnp.bfloat16)

    masks = _build_masks(H, W)

    kernel = functools.partial(_attr_kernel, H=H, W=W, A=A, NB=NB)

    scores, attn = pl.pallas_call(
        kernel,
        out_shape=(
            jax.ShapeDtypeStruct((B, A, 1), jnp.float32),
            jax.ShapeDtypeStruct((B, A, HW), jnp.float32),
        ),
        grid_spec=pltpu.PrefetchScalarGridSpec(
            num_scalar_prefetch=0,
            grid=(B // NB, NC),
            in_specs=[
                pl.BlockSpec((NB, C_BLK, HW), lambda b, c: (b, c, 0)),   # features
                pl.BlockSpec((2 * A, NTAPS), lambda b, c: (0, 0)),       # conv weights
                pl.BlockSpec((A, 1), lambda b, c: (0, 0)),               # conv bias
                pl.BlockSpec((A_pad, C_BLK), lambda b, c: (0, c)),       # linear w + mean row
                pl.BlockSpec((A, 1), lambda b, c: (0, 0)),               # linear bias
                pl.BlockSpec((NTAPS, HW), lambda b, c: (0, 0)),          # conv boundary masks
            ],
            out_specs=[
                pl.BlockSpec((NB, A, 1), lambda b, c: (b, 0, 0)),
                pl.BlockSpec((NB, A, HW), lambda b, c: (b, 0, 0)),
            ],
            scratch_shapes=[
                pltpu.VMEM((NB, A_pad, HW), jnp.float32),   # proj + mean accumulator
                pltpu.VMEM((NB, 1, HW), jnp.float32),       # channel-max accumulator
            ],
        ),
        compiler_params=pltpu.CompilerParams(
            # batch blocks independent -> dual-TC sharding on v7x; C axis is a reduction.
            dimension_semantics=("parallel", "arbitrary"),
            # true working set is ~1.1 MiB/step (512 KiB bf16 feature block, double-buffered)
            vmem_limit_bytes=32 << 20,
        ),
    )(feat, conv_w_packed, conv_b2, lin_w_ext, lin_b2, masks)

    scores = scores[:, :, 0]                                        # (B, A)
    attention_maps = [attn[:, i, :].reshape(B, 1, H, W) for i in range(A)]
    return scores, attention_maps


def _reference(features, conv_w, conv_b, lin_w, lin_b):
    """Pure-JAX (f32) reference matching the PyTorch forward pass."""
    B, C, H, W = features.shape
    A = lin_w.shape[0]
    avg = jnp.mean(features, axis=1, keepdims=True)
    mx = jnp.max(features, axis=1, keepdims=True)
    x = jnp.concatenate([avg, mx], axis=1)                          # (B, 2, H, W)
    scores, maps = [], []
    for a in range(A):
        am = lax.conv_general_dilated(
            x, conv_w[a:a + 1], window_strides=(1, 1),
            padding=[(PAD, PAD), (PAD, PAD)],
            dimension_numbers=("NCHW", "OIHW", "NCHW")) + conv_b[a]
        am = jax.nn.sigmoid(am)                                     # (B, 1, H, W)
        attended = features * am
        pooled = jnp.mean(attended, axis=(2, 3))                    # (B, C)
        scores.append(pooled @ lin_w[a] + lin_b[a])                 # (B,)
        maps.append(am)
    return jnp.stack(scores, axis=1), maps


if __name__ == "__main__":
    B, C, H, W = 2, 2048, 16, 16        # Linear(2048, 1) => C must be 2048
    A = 4                               # num_attributes

    key = jax.random.PRNGKey(0)
    k_feat, k_cw, k_cb, k_lw, k_lb = jax.random.split(key, 5)

    features = jax.random.normal(k_feat, (B, C, H, W), dtype=jnp.float32)

    # Deterministic synthetic parameters (PyTorch-like uniform fan-in init).
    conv_fan = 2 * KS * KS
    conv_w = jax.random.uniform(k_cw, (A, 2, KS, KS), jnp.float32,
                                -1.0 / conv_fan ** 0.5, 1.0 / conv_fan ** 0.5)
    conv_b = jax.random.uniform(k_cb, (A,), jnp.float32,
                                -1.0 / conv_fan ** 0.5, 1.0 / conv_fan ** 0.5)
    lin_w = jax.random.uniform(k_lw, (A, C), jnp.float32,
                               -1.0 / C ** 0.5, 1.0 / C ** 0.5)
    lin_b = jax.random.uniform(k_lb, (A,), jnp.float32,
                               -1.0 / C ** 0.5, 1.0 / C ** 0.5)

    scores, attention_maps = attribute_score_predictor(
        features, conv_w, conv_b, lin_w, lin_b)
    scores = jax.block_until_ready(scores)
    attention_maps = [jax.block_until_ready(m) for m in attention_maps]

    # Correctness check against a plain-JAX f32 reference of the PyTorch forward.
    # NOTE: features are cast to bf16 inside the kernel; tolerance reflects that.
    ref_scores, ref_maps = _reference(features, conv_w, conv_b, lin_w, lin_b)
    assert scores.shape == (B, A)
    assert jnp.allclose(scores, ref_scores, rtol=2e-2, atol=2e-2), "score mismatch"
    for m, rm in zip(attention_maps, ref_maps):
        assert m.shape == (B, 1, H, W)
        assert jnp.allclose(m, rm, rtol=2e-2, atol=2e-2), "attention map mismatch"

    print("KERNEL_OK")
</pallas_src>

<mosaic_0001>
module attributes {stable_mosaic.version = 11 : i64} {
  func.func @_attr_kernel(%arg0: i32, %arg1: i32, %arg2: memref<1x1024x256xbf16, #tpu.memory_space<vmem>>, %arg3: memref<8x49xf32, #tpu.memory_space<vmem>>, %arg4: memref<4x1xf32, #tpu.memory_space<vmem>>, %arg5: memref<8x1024xbf16, #tpu.memory_space<vmem>>, %arg6: memref<4x1xf32, #tpu.memory_space<vmem>>, %arg7: memref<49x256xf32, #tpu.memory_space<vmem>>, %arg8: memref<1x4x1xf32, #tpu.memory_space<vmem>>, %arg9: memref<1x4x256xf32, #tpu.memory_space<vmem>>, %arg10: memref<1x8x256xf32, #tpu.memory_space<vmem>>, %arg11: memref<1x1x256xf32, #tpu.memory_space<vmem>>) attributes {dimension_semantics = [#tpu.dimension_semantics<parallel>, #tpu.dimension_semantics<arbitrary>], iteration_bounds = array<i64: 2, 2>, scalar_prefetch = 0 : i64, scratch_operands = 2 : i64, tpu.core_type = #tpu.core_type<tc>, window_params = [{transform_indices = @transform_0, window_bounds = array<i64: 1, 1024, 256>}, {pipeline_mode = #tpu.pipeline_mode<synchronous>, transform_indices = @transform_1, window_bounds = array<i64: 8, 49>}, {pipeline_mode = #tpu.pipeline_mode<synchronous>, transform_indices = @transform_2, window_bounds = array<i64: 4, 1>}, {transform_indices = @transform_3, window_bounds = array<i64: 8, 1024>}, {pipeline_mode = #tpu.pipeline_mode<synchronous>, transform_indices = @transform_4, window_bounds = array<i64: 4, 1>}, {pipeline_mode = #tpu.pipeline_mode<synchronous>, transform_indices = @transform_5, window_bounds = array<i64: 49, 256>}, {transform_indices = @transform_6, window_bounds = array<i64: 1, 4, 1>}, {transform_indices = @transform_7, window_bounds = array<i64: 1, 4, 256>}]} {
    %c0_i32 = arith.constant 0 : i32
    %0 = arith.cmpi eq, %arg1, %c0_i32 : i32
    %1 = arith.extui %0 : i1 to i32
    %c0_i32_0 = arith.constant 0 : i32
    %2 = arith.cmpi ne, %1, %c0_i32_0 : i32
    scf.if %2 {
      %cst_56 = arith.constant 0.000000e+00 : f32
      %71 = vector.broadcast %cst_56 : f32 to vector<1x8x256xf32>
      %c0_57 = arith.constant 0 : index
      %c0_58 = arith.constant 0 : index
      %c0_59 = arith.constant 0 : index
      %72 = vector.load %arg10[%c0_57, %c0_58, %c0_59] : memref<1x8x256xf32, #tpu.memory_space<vmem>>, vector<1x8x256xf32>
      tpu.vector_store %arg10[%c0_57, %c0_58, %c0_59], %71 {strides = array<i32>} : memref<1x8x256xf32, #tpu.memory_space<vmem>>, vector<1x8x256xf32>,
      %cst_60 = arith.constant 0xFF800000 : f32
      %73 = vector.broadcast %cst_60 : f32 to vector<1x1x256xf32>
      %c0_61 = arith.constant 0 : index
      %c0_62 = arith.constant 0 : index
      %c0_63 = arith.constant 0 : index
      %74 = vector.load %arg11[%c0_61, %c0_62, %c0_63] : memref<1x1x256xf32, #tpu.memory_space<vmem>>, vector<1x1x256xf32>
      tpu.vector_store %arg11[%c0_61, %c0_62, %c0_63], %73 {strides = array<i32>} : memref<1x1x256xf32, #tpu.memory_space<vmem>>, vector<1x1x256xf32>,
    } else {
    }
    %cst = arith.constant 0.000000e+00 : f32
    %3 = vector.broadcast %cst : f32 to vector<8x256xf32>
    %cst_1 = arith.constant 0xFF80 : bf16
    %4 = vector.broadcast %cst_1 : bf16 to vector<128x256xbf16>
    %c0 = arith.constant 0 : index
    %c0_2 = arith.constant 0 : index
    %c0_3 = arith.constant 0 : index
    %5 = vector.load %arg2[%c0, %c0_2, %c0_3] : memref<1x1024x256xbf16, #tpu.memory_space<vmem>>, vector<1x128x256xbf16>
    %6 = vector.shape_cast %5 : vector<1x128x256xbf16> to vector<128x256xbf16>
    %c0_4 = arith.constant 0 : index
    %c0_5 = arith.constant 0 : index
    %7 = vector.load %arg5[%c0_4, %c0_5] : memref<8x1024xbf16, #tpu.memory_space<vmem>>, vector<8x128xbf16>
    %cst_6 = arith.constant dense<0.000000e+00> : vector<8x256xf32>
    %8 = tpu.matmul %7, %6, %cst_6 {dimension_numbers = #tpu.dot_dimension_numbers<[1], [0], [0], [1], [0, 0, 1, 1], [], []>} : vector<8x128xbf16>, vector<128x256xbf16>, vector<8x256xf32> -> vector<8x256xf32>
    %9 = arith.addf %3, %8 : vector<8x256xf32>
    %10 = arith.maximumf %4, %6 : vector<128x256xbf16>
    %c0_7 = arith.constant 0 : index
    %c128 = arith.constant 128 : index
    %c0_8 = arith.constant 0 : index
    %11 = vector.load %arg2[%c0_7, %c128, %c0_8] : memref<1x1024x256xbf16, #tpu.memory_space<vmem>>, vector<1x128x256xbf16>
    %12 = vector.shape_cast %11 : vector<1x128x256xbf16> to vector<128x256xbf16>
    %c0_9 = arith.constant 0 : index
    %c128_10 = arith.constant 128 : index
    %13 = vector.load %arg5[%c0_9, %c128_10] : memref<8x1024xbf16, #tpu.memory_space<vmem>>, vector<8x128xbf16>
    %cst_11 = arith.constant dense<0.000000e+00> : vector<8x256xf32>
    %14 = tpu.matmul %13, %12, %cst_11 {dimension_numbers = #tpu.dot_dimension_numbers<[1], [0], [0], [1], [0, 0, 1, 1], [], []>} : vector<8x128xbf16>, vector<128x256xbf16>, vector<8x256xf32> -> vector<8x256xf32>
    %15 = arith.addf %9, %14 : vector<8x256xf32>
    %16 = arith.maximumf %10, %12 : vector<128x256xbf16>
    %c0_12 = arith.constant 0 : index
    %c256 = arith.constant 256 : index
    %c0_13 = arith.constant 0 : index
    %17 = vector.load %arg2[%c0_12, %c256, %c0_13] : memref<1x1024x256xbf16, #tpu.memory_space<vmem>>, vector<1x128x256xbf16>
    %18 = vector.shape_cast %17 : vector<1x128x256xbf16> to vector<128x256xbf16>
    %c0_14 = arith.constant 0 : index
    %c256_15 = arith.constant 256 : index
    %19 = vector.load %arg5[%c0_14, %c256_15] : memref<8x1024xbf16, #tpu.memory_space<vmem>>, vector<8x128xbf16>
    %cst_16 = arith.constant dense<0.000000e+00> : vector<8x256xf32>
    %20 = tpu.matmul %19, %18, %cst_16 {dimension_numbers = #tpu.dot_dimension_numbers<[1], [0], [0], [1], [0, 0, 1, 1], [], []>} : vector<8x128xbf16>, vector<128x256xbf16>, vector<8x256xf32> -> vector<8x256xf32>
    %21 = arith.addf %15, %20 : vector<8x256xf32>
    %22 = arith.maximumf %16, %18 : vector<128x256xbf16>
    %c0_17 = arith.constant 0 : index
    %c384 = arith.constant 384 : index
    %c0_18 = arith.constant 0 : index
    %23 = vector.load %arg2[%c0_17, %c384, %c0_18] : memref<1x1024x256xbf16, #tpu.memory_space<vmem>>, vector<1x128x256xbf16>
    %24 = vector.shape_cast %23 : vector<1x128x256xbf16> to vector<128x256xbf16>
    %c0_19 = arith.constant 0 : index
    %c384_20 = arith.constant 384 : index
    %25 = vector.load %arg5[%c0_19, %c384_20] : memref<8x1024xbf16, #tpu.memory_space<vmem>>, vector<8x128xbf16>
    %cst_21 = arith.constant dense<0.000000e+00> : vector<8x256xf32>
    %26 = tpu.matmul %25, %24, %cst_21 {dimension_numbers = #tpu.dot_dimension_numbers<[1], [0], [0], [1], [0, 0, 1, 1], [], []>} : vector<8x128xbf16>, vector<128x256xbf16>, vector<8x256xf32> -> vector<8x256xf32>
    %27 = arith.addf %21, %26 : vector<8x256xf32>
    %28 = arith.maximumf %22, %24 : vector<128x256xbf16>
    %c0_22 = arith.constant 0 : index
    %c512 = arith.constant 512 : index
    %c0_23 = arith.constant 0 : index
    %29 = vector.load %arg2[%c0_22, %c512, %c0_23] : memref<1x1024x256xbf16, #tpu.memory_space<vmem>>, vector<1x128x256xbf16>
    %30 = vector.shape_cast %29 : vector<1x128x256xbf16> to vector<128x256xbf16>
    %c0_24 = arith.constant 0 : index
    %c512_25 = arith.constant 512 : index
    %31 = vector.load %arg5[%c0_24, %c512_25] : memref<8x1024xbf16, #tpu.memory_space<vmem>>, vector<8x128xbf16>
    %cst_26 = arith.constant dense<0.000000e+00> : vector<8x256xf32>
    %32 = tpu.matmul %31, %30, %cst_26 {dimension_numbers = #tpu.dot_dimension_numbers<[1], [0], [0], [1], [0, 0, 1, 1], [], []>} : vector<8x128xbf16>, vector<128x256xbf16>, vector<8x256xf32> -> vector<8x256xf32>
    %33 = arith.addf %27, %32 : vector<8x256xf32>
    %34 = arith.maximumf %28, %30 : vector<128x256xbf16>
    %c0_27 = arith.constant 0 : index
    %c640 = arith.constant 640 : index
    %c0_28 = arith.constant 0 : index
    %35 = vector.load %arg2[%c0_27, %c640, %c0_28] : memref<1x1024x256xbf16, #tpu.memory_space<vmem>>, vector<1x128x256xbf16>
    %36 = vector.shape_cast %35 : vector<1x128x256xbf16> to vector<128x256xbf16>
    %c0_29 = arith.constant 0 : index
    %c640_30 = arith.constant 640 : index
    %37 = vector.load %arg5[%c0_29, %c640_30] : memref<8x1024xbf16, #tpu.memory_space<vmem>>, vector<8x128xbf16>
    %cst_31 = arith.constant dense<0.000000e+00> : vector<8x256xf32>
    %38 = tpu.matmul %37, %36, %cst_31 {dimension_numbers = #tpu.dot_dimension_numbers<[1], [0], [0], [1], [0, 0, 1, 1], [], []>} : vector<8x128xbf16>, vector<128x256xbf16>, vector<8x256xf32> -> vector<8x256xf32>
    %39 = arith.addf %33, %38 : vector<8x256xf32>
    %40 = arith.maximumf %34, %36 : vector<128x256xbf16>
    %c0_32 = arith.constant 0 : index
    %c768 = arith.constant 768 : index
    %c0_33 = arith.constant 0 : index
    %41 = vector.load %arg2[%c0_32, %c768, %c0_33] : memref<1x1024x256xbf16, #tpu.memory_space<vmem>>, vector<1x128x256xbf16>
    %42 = vector.shape_cast %41 : vector<1x128x256xbf16> to vector<128x256xbf16>
    %c0_34 = arith.constant 0 : index
    %c768_35 = arith.constant 768 : index
    %43 = vector.load %arg5[%c0_34, %c768_35] : memref<8x1024xbf16, #tpu.memory_space<vmem>>, vector<8x128xbf16>
    %cst_36 = arith.constant dense<0.000000e+00> : vector<8x256xf32>
    %44 = tpu.matmul %43, %42, %cst_36 {dimension_numbers = #tpu.dot_dimension_numbers<[1], [0], [0], [1], [0, 0, 1, 1], [], []>} : vector<8x128xbf16>, vector<128x256xbf16>, vector<8x256xf32> -> vector<8x256xf32>
    %45 = arith.addf %39, %44 : vector<8x256xf32>
    %46 = arith.maximumf %40, %42 : vector<128x256xbf16>
    %c0_37 = arith.constant 0 : index
    %c896 = arith.constant 896 : index
    %c0_38 = arith.constant 0 : index
    %47 = vector.load %arg2[%c0_37, %c896, %c0_38] : memref<1x1024x256xbf16, #tpu.memory_space<vmem>>, vector<1x128x256xbf16>
    %48 = vector.shape_cast %47 : vector<1x128x256xbf16> to vector<128x256xbf16>
    %c0_39 = arith.constant 0 : index
    %c896_40 = arith.constant 896 : index
    %49 = vector.load %arg5[%c0_39, %c896_40] : memref<8x1024xbf16, #tpu.memory_space<vmem>>, vector<8x128xbf16>
    %cst_41 = arith.constant dense<0.000000e+00> : vector<8x256xf32>
    %50 = tpu.matmul %49, %48, %cst_41 {dimension_numbers = #tpu.dot_dimension_numbers<[1], [0], [0], [1], [0, 0, 1, 1], [], []>} : vector<8x128xbf16>, vector<128x256xbf16>, vector<8x256xf32> -> vector<8x256xf32>
    %51 = arith.addf %45, %50 : vector<8x256xf32>
    %52 = arith.maximumf %46, %48 : vector<128x256xbf16>
    %c0_42 = arith.constant 0 : index
    %c0_43 = arith.constant 0 : index
    %c0_44 = arith.constant 0 : index
    %53 = vector.load %arg10[%c0_42, %c0_43, %c0_44] : memref<1x8x256xf32, #tpu.memory_space<vmem>>, vector<1x8x256xf32>
    %54 = vector.shape_cast %53 : vector<1x8x256xf32> to vector<8x256xf32>
    %55 = arith.addf %54, %51 : vector<8x256xf32>
    %c0_45 = arith.constant 0 : index
    %c0_46 = arith.constant 0 : index
    %c0_47 = arith.constant 0 : index
    %56 = vector.load %arg10[%c0_45, %c0_46, %c0_47] : memref<1x8x256xf32, #tpu.memory_space<vmem>>, vector<1x8x256xf32>
    %57 = vector.shape_cast %56 : vector<1x8x256xf32> to vector<8x256xf32>
    %58 = vector.shape_cast %55 : vector<8x256xf32> to vector<1x8x256xf32>
    tpu.vector_store %arg10[%c0_45, %c0_46, %c0_47], %58 {strides = array<i32>} : memref<1x8x256xf32, #tpu.memory_space<vmem>>, vector<1x8x256xf32>,
    %59 = arith.extf %52 : vector<128x256xbf16> to vector<128x256xf32>
    %cst_48 = arith.constant dense<0xFF800000> : vector<256xf32>
    %60 = vector.multi_reduction <maximumf>, %59, %cst_48 [0] : vector<128x256xf32> to vector<256xf32>
    %61 = vector.shape_cast %60 : vector<256xf32> to vector<1x256xf32>
    %c0_49 = arith.constant 0 : index
    %c0_50 = arith.constant 0 : index
    %c0_51 = arith.constant 0 : index
    %62 = vector.load %arg11[%c0_49, %c0_50, %c0_51] : memref<1x1x256xf32, #tpu.memory_space<vmem>>, vector<1x1x256xf32>
    %63 = vector.shape_cast %62 : vector<1x1x256xf32> to vector<1x256xf32>
    %64 = arith.maximumf %63, %61 : vector<1x256xf32>
    %c0_52 = arith.constant 0 : index
    %c0_53 = arith.constant 0 : index
    %c0_54 = arith.constant 0 : index
    %65 = vector.load %arg11[%c0_52, %c0_53, %c0_54] : memref<1x1x256xf32, #tpu.memory_space<vmem>>, vector<1x1x256xf32>
    %66 = vector.shape_cast %65 : vector<1x1x256xf32> to vector<1x256xf32>
    %67 = vector.shape_cast %64 : vector<1x256xf32> to vector<1x1x256xf32>
    tpu.vector_store %arg11[%c0_52, %c0_53, %c0_54], %67 {strides = array<i32>} : memref<1x1x256xf32, #tpu.memory_space<vmem>>, vector<1x1x256xf32>,
    %c1_i32 = arith.constant 1 : i32
    %68 = arith.cmpi eq, %arg1, %c1_i32 : i32
    %69 = arith.extui %68 : i1 to i32
    %c0_i32_55 = arith.constant 0 : i32
    %70 = arith.cmpi ne, %69, %c0_i32_55 : i32
    scf.if %70 {
      %c0_56 = arith.constant 0 : index
      %c0_57 = arith.constant 0 : index
      %c0_58 = arith.constant 0 : index
      %71 = vector.load %arg10[%c0_56, %c0_57, %c0_58] : memref<1x8x256xf32, #tpu.memory_space<vmem>>, vector<1x4x256xf32>
      %72 = vector.shape_cast %71 : vector<1x4x256xf32> to vector<4x256xf32>
      %c0_59 = arith.constant 0 : index
      %c4 = arith.constant 4 : index
      %c0_60 = arith.constant 0 : index
      %73 = vector.load %arg10[%c0_59, %c4, %c0_60] : memref<1x8x256xf32, #tpu.memory_space<vmem>>, vector<1x1x256xf32>
      %74 = vector.shape_cast %73 : vector<1x1x256xf32> to vector<1x256xf32>
      %c0_61 = arith.constant 0 : index
      %c0_62 = arith.constant 0 : index
      %c0_63 = arith.constant 0 : index
      %75 = vector.load %arg11[%c0_61, %c0_62, %c0_63] : memref<1x1x256xf32, #tpu.memory_space<vmem>>, vector<1x1x256xf32>
      %76 = vector.shape_cast %75 : vector<1x1x256xf32> to vector<1x256xf32>
      %77 = tpu.concatenate %74, %76 in 0 : vector<1x256xf32>, vector<1x256xf32> -> vector<2x256xf32>
      %cst_64 = arith.constant 0.000000e+00 : f32
      %78 = vector.broadcast %cst_64 : f32 to vector<4x256xf32>
      %c51_i32 = arith.constant 51 : i32
      %79 = tpu.dynamic_rotate %77 by %c51_i32 dim 1 : vector<2x256xf32>, i32 -> vector<2x256xf32>
      %c0_65 = arith.constant 0 : index
      %c0_66 = arith.constant 0 : index
      %80 = vector.load %arg7[%c0_65, %c0_66] : memref<49x256xf32, #tpu.memory_space<vmem>>, vector<1x256xf32>
      %81 = vector.broadcast %80 : vector<1x256xf32> to vector<2x256xf32>
      %82 = arith.mulf %79, %81 : vector<2x256xf32>
      %c0_67 = arith.constant 0 : index
      %c0_68 = arith.constant 0 : index
      %83 = vector.load %arg3[%c0_67, %c0_68] : memref<8x49xf32, #tpu.memory_space<vmem>>, vector<4x1xf32>
      %c4_69 = arith.constant 4 : index
      %c0_70 = arith.constant 0 : index
      %84 = vector.load %arg3[%c4_69, %c0_70] : memref<8x49xf32, #tpu.memory_space<vmem>>, vector<4x1xf32>
      %85 = vector.extract_strided_slice %82 {offsets = [0, 0], sizes = [1, 256], strides = [1, 1]} : vector<2x256xf32> to vector<1x256xf32>
      %86 = vector.broadcast %83 : vector<4x1xf32> to vector<4x256xf32>
      %87 = vector.broadcast %85 : vector<1x256xf32> to vector<4x256xf32>
      %88 = arith.mulf %86, %87 : vector<4x256xf32>
      %89 = arith.addf %78, %88 : vector<4x256xf32>
      %90 = vector.extract_strided_slice %82 {offsets = [1, 0], sizes = [1, 256], strides = [1, 1]} : vector<2x256xf32> to vector<1x256xf32>
      %91 = vector.broadcast %84 : vector<4x1xf32> to vector<4x256xf32>
      %92 = vector.broadcast %90 : vector<1x256xf32> to vector<4x256xf32>
      %93 = arith.mulf %91, %92 : vector<4x256xf32>
      %94 = arith.addf %89, %93 : vector<4x256xf32>
      %c50_i32 = arith.constant 50 : i32
      %95 = tpu.dynamic_rotate %77 by %c50_i32 dim 1 : vector<2x256xf32>, i32 -> vector<2x256xf32>
      %c1 = arith.constant 1 : index
      %c0_71 = arith.constant 0 : index
      %96 = vector.load %arg7[%c1, %c0_71] : memref<49x256xf32, #tpu.memory_space<vmem>>, vector<1x256xf32>
      %97 = vector.broadcast %96 : vector<1x256xf32> to vector<2x256xf32>
      %98 = arith.mulf %95, %97 : vector<2x256xf32>
      %c0_72 = arith.constant 0 : index
      %c1_73 = arith.constant 1 : index
      %99 = vector.load %arg3[%c0_72, %c1_73] : memref<8x49xf32, #tpu.memory_space<vmem>>, vector<4x1xf32>
      %c4_74 = arith.constant 4 : index
      %c1_75 = arith.constant 1 : index
      %100 = vector.load %arg3[%c4_74, %c1_75] : memref<8x49xf32, #tpu.memory_space<vmem>>, vector<4x1xf32>
      %101 = vector.extract_strided_slice %98 {offsets = [0, 0], sizes = [1, 256], strides = [1, 1]} : vector<2x256xf32> to vector<1x256xf32>
      %102 = vector.broadcast %99 : vector<4x1xf32> to vector<4x256xf32>
      %103 = vector.broadcast %101 : vector<1x256xf32> to vector<4x256xf32>
      %104 = arith.mulf %102, %103 : vector<4x256xf32>
      %105 = arith.addf %94, %104 : vector<4x256xf32>
      %106 = vector.extract_strided_slice %98 {offsets = [1, 0], sizes = [1, 256], strides = [1, 1]} : vector<2x256xf32> to vector<1x256xf32>
      %107 = vector.broadcast %100 : vector<4x1xf32> to vector<4x256xf32>
      %108 = vector.broadcast %106 : vector<1x256xf32> to vector<4x256xf32>
      %109 = arith.mulf %107, %108 : vector<4x256xf32>
      %110 = arith.addf %105, %109 : vector<4x256xf32>
      %c49_i32 = arith.constant 49 : i32
      %111 = tpu.dynamic_rotate %77 by %c49_i32 dim 1 : vector<2x256xf32>, i32 -> vector<2x256xf32>
      %c2 = arith.constant 2 : index
      %c0_76 = arith.constant 0 : index
      %112 = vector.load %arg7[%c2, %c0_76] : memref<49x256xf32, #tpu.memory_space<vmem>>, vector<1x256xf32>
      %113 = vector.broadcast %112 : vector<1x256xf32> to vector<2x256xf32>
      %114 = arith.mulf %111, %113 : vector<2x256xf32>
      %c0_77 = arith.constant 0 : index
      %c2_78 = arith.constant 2 : index
      %115 = vector.load %arg3[%c0_77, %c2_78] : memref<8x49xf32, #tpu.memory_space<vmem>>, vector<4x1xf32>
      %c4_79 = arith.constant 4 : index
      %c2_80 = arith.constant 2 : index
      %116 = vector.load %arg3[%c4_79, %c2_80] : memref<8x49xf32, #tpu.memory_space<vmem>>, vector<4x1xf32>
      %117 = vector.extract_strided_slice %114 {offsets = [0, 0], sizes = [1, 256], strides = [1, 1]} : vector<2x256xf32> to vector<1x256xf32>
      %118 = vector.broadcast %115 : vector<4x1xf32> to vector<4x256xf32>
      %119 = vector.broadcast %117 : vector<1x256xf32> to vector<4x256xf32>
      %120 = arith.mulf %118, %119 : vector<4x256xf32>
      %121 = arith.addf %110, %120 : vector<4x256xf32>
      %122 = vector.extract_strided_slice %114 {offsets = [1, 0], sizes = [1, 256], strides = [1, 1]} : vector<2x256xf32> to vector<1x256xf32>
      %123 = vector.broadcast %116 : vector<4x1xf32> to vector<4x256xf32>
      %124 = vector.broadcast %122 : vector<1x256xf32> to vector<4x256xf32>
      %125 = arith.mulf %123, %124 : vector<4x256xf32>
      %126 = arith.addf %121, %125 : vector<4x256xf32>
      %c48_i32 = arith.constant 48 : i32
      %127 = tpu.dynamic_rotate %77 by %c48_i32 dim 1 : vector<2x256xf32>, i32 -> vector<2x256xf32>
      %c3 = arith.constant 3 : index
      %c0_81 = arith.constant 0 : index
      %128 = vector.load %arg7[%c3, %c0_81] : memref<49x256xf32, #tpu.memory_space<vmem>>, vector<1x256xf32>
      %129 = vector.broadcast %128 : vector<1x256xf32> to vector<2x256xf32>
      %130 = arith.mulf %127, %129 : vector<2x256xf32>
      %c0_82 = arith.constant 0 : index
      %c3_83 = arith.constant 3 : index
      %131 = vector.load %arg3[%c0_82, %c3_83] : memref<8x49xf32, #tpu.memory_space<vmem>>, vector<4x1xf32>
      %c4_84 = arith.constant 4 : index
      %c3_85 = arith.constant 3 : index
      %132 = vector.load %arg3[%c4_84, %c3_85] : memref<8x49xf32, #tpu.memory_space<vmem>>, vector<4x1xf32>
      %133 = vector.extract_strided_slice %130 {offsets = [0, 0], sizes = [1, 256], strides = [1, 1]} : vector<2x256xf32> to vector<1x256xf32>
      %134 = vector.broadcast %131 : vector<4x1xf32> to vector<4x256xf32>
      %135 = vector.broadcast %133 : vector<1x256xf32> to vector<4x256xf32>
      %136 = arith.mulf %134, %135 : vector<4x256xf32>
      %137 = arith.addf %126, %136 : vector<4x256xf32>
      %138 = vector.extract_strided_slice %130 {offsets = [1, 0], sizes = [1, 256], strides = [1, 1]} : vector<2x256xf32> to vector<1x256xf32>
      %139 = vector.broadcast %132 : vector<4x1xf32> to vector<4x256xf32>
      %140 = vector.broadcast %138 : vector<1x256xf32> to vector<4x256xf32>
      %141 = arith.mulf %139, %140 : vector<4x256xf32>
      %142 = arith.addf %137, %141 : vector<4x256xf32>
      %c47_i32 = arith.constant 47 : i32
      %143 = tpu.dynamic_rotate %77 by %c47_i32 dim 1 : vector<2x256xf32>, i32 -> vector<2x256xf32>
      %c4_86 = arith.constant 4 : index
      %c0_87 = arith.constant 0 : index
      %144 = vector.load %arg7[%c4_86, %c0_87] : memref<49x256xf32, #tpu.memory_space<vmem>>, vector<1x256xf32>
      %145 = vector.broadcast %144 : vector<1x256xf32> to vector<2x256xf32>
      %146 = arith.mulf %143, %145 : vector<2x256xf32>
      %c0_88 = arith.constant 0 : index
      %c4_89 = arith.constant 4 : index
      %147 = vector.load %arg3[%c0_88, %c4_89] : memref<8x49xf32, #tpu.memory_space<vmem>>, vector<4x1xf32>
      %c4_90 = arith.constant 4 : index
      %c4_91 = arith.constant 4 : index
      %148 = vector.load %arg3[%c4_90, %c4_91] : memref<8x49xf32, #tpu.memory_space<vmem>>, vector<4x1xf32>
      %149 = vector.extract_strided_slice %146 {offsets = [0, 0], sizes = [1, 256], strides = [1, 1]} : vector<2x256xf32> to vector<1x256xf32>
      %150 = vector.broadcast %147 : vector<4x1xf32> to vector<4x256xf32>
      %151 = vector.broadcast %149 : vector<1x256xf32> to vector<4x256xf32>
      %152 = arith.mulf %150, %151 : vector<4x256xf32>
      %153 = arith.addf %142, %152 : vector<4x256xf32>
      %154 = vector.extract_strided_slice %146 {offsets = [1, 0], sizes = [1, 256], strides = [1, 1]} : vector<2x256xf32> to vector<1x256xf32>
      %155 = vector.broadcast %148 : vector<4x1xf32> to vector<4x256xf32>
      %156 = vector.broadcast %154 : vector<1x256xf32> to vector<4x256xf32>
      %157 = arith.mulf %155, %156 : vector<4x256xf32>
      %158 = arith.addf %153, %157 : vector<4x256xf32>
      %c46_i32 = arith.constant 46 : i32
      %159 = tpu.dynamic_rotate %77 by %c46_i32 dim 1 : vector<2x256xf32>, i32 -> vector<2x256xf32>
      %c5 = arith.constant 5 : index
      %c0_92 = arith.constant 0 : index
      %160 = vector.load %arg7[%c5, %c0_92] : memref<49x256xf32, #tpu.memory_space<vmem>>, vector<1x256xf32>
      %161 = vector.broadcast %160 : vector<1x256xf32> to vector<2x256xf32>
      %162 = arith.mulf %159, %161 : vector<2x256xf32>
      %c0_93 = arith.constant 0 : index
      %c5_94 = arith.constant 5 : index
      %163 = vector.load %arg3[%c0_93, %c5_94] : memref<8x49xf32, #tpu.memory_space<vmem>>, vector<4x1xf32>
      %c4_95 = arith.constant 4 : index
      %c5_96 = arith.constant 5 : index
      %164 = vector.load %arg3[%c4_95, %c5_96] : memref<8x49xf32, #tpu.memory_space<vmem>>, vector<4x1xf32>
      %165 = vector.extract_strided_slice %162 {offsets = [0, 0], sizes = [1, 256], strides = [1, 1]} : vector<2x256xf32> to vector<1x256xf32>
      %166 = vector.broadcast %163 : vector<4x1xf32> to vector<4x256xf32>
      %167 = vector.broadcast %165 : vector<1x256xf32> to vector<4x256xf32>
      %168 = arith.mulf %166, %167 : vector<4x256xf32>
      %169 = arith.addf %158, %168 : vector<4x256xf32>
      %170 = vector.extract_strided_slice %162 {offsets = [1, 0], sizes = [1, 256], strides = [1, 1]} : vector<2x256xf32> to vector<1x256xf32>
      %171 = vector.broadcast %164 : vector<4x1xf32> to vector<4x256xf32>
      %172 = vector.broadcast %170 : vector<1x256xf32> to vector<4x256xf32>
      %173 = arith.mulf %171, %172 : vector<4x256xf32>
      %174 = arith.addf %169, %173 : vector<4x256xf32>
      %c45_i32 = arith.constant 45 : i32
      %175 = tpu.dynamic_rotate %77 by %c45_i32 dim 1 : vector<2x256xf32>, i32 -> vector<2x256xf32>
      %c6 = arith.constant 6 : index
      %c0_97 = arith.constant 0 : index
      %176 = vector.load %arg7[%c6, %c0_97] : memref<49x256xf32, #tpu.memory_space<vmem>>, vector<1x256xf32>
      %177 = vector.broadcast %176 : vector<1x256xf32> to vector<2x256xf32>
      %178 = arith.mulf %175, %177 : vector<2x256xf32>
      %c0_98 = arith.constant 0 : index
      %c6_99 = arith.constant 6 : index
      %179 = vector.load %arg3[%c0_98, %c6_99] : memref<8x49xf32, #tpu.memory_space<vmem>>, vector<4x1xf32>
      %c4_100 = arith.constant 4 : index
      %c6_101 = arith.constant 6 : index
      %180 = vector.load %arg3[%c4_100, %c6_101] : memref<8x49xf32, #tpu.memory_space<vmem>>, vector<4x1xf32>
      %181 = vector.extract_strided_slice %178 {offsets = [0, 0], sizes = [1, 256], strides = [1, 1]} : vector<2x256xf32> to vector<1x256xf32>
      %182 = vector.broadcast %179 : vector<4x1xf32> to vector<4x256xf32>
      %183 = vector.broadcast %181 : vector<1x256xf32> to vector<4x256xf32>
      %184 = arith.mulf %182, %183 : vector<4x256xf32>
      %185 = arith.addf %174, %184 : vector<4x256xf32>
      %186 = vector.extract_strided_slice %178 {offsets = [1, 0], sizes = [1, 256], strides = [1, 1]} : vector<2x256xf32> to vector<1x256xf32>
      %187 = vector.broadcast %180 : vector<4x1xf32> to vector<4x256xf32>
      %188 = vector.broadcast %186 : vector<1x256xf32> to vector<4x256xf32>
      %189 = arith.mulf %187, %188 : vector<4x256xf32>
      %190 = arith.addf %185, %189 : vector<4x256xf32>
      %c35_i32 = arith.constant 35 : i32
      %191 = tpu.dynamic_rotate %77 by %c35_i32 dim 1 : vector<2x256xf32>, i32 -> vector<2x256xf32>
      %c7 = arith.constant 7 : index
      %c0_102 = arith.constant 0 : index
      %192 = vector.load %arg7[%c7, %c0_102] : memref<49x256xf32, #tpu.memory_space<vmem>>, vector<1x256xf32>
      %193 = vector.broadcast %192 : vector<1x256xf32> to vector<2x256xf32>
      %194 = arith.mulf %191, %193 : vector<2x256xf32>
      %c0_103 = arith.constant 0 : index
      %c7_104 = arith.constant 7 : index
      %195 = vector.load %arg3[%c0_103, %c7_104] : memref<8x49xf32, #tpu.memory_space<vmem>>, vector<4x1xf32>
      %c4_105 = arith.constant 4 : index
      %c7_106 = arith.constant 7 : index
      %196 = vector.load %arg3[%c4_105, %c7_106] : memref<8x49xf32, #tpu.memory_space<vmem>>, vector<4x1xf32>
      %197 = vector.extract_strided_slice %194 {offsets = [0, 0], sizes = [1, 256], strides = [1, 1]} : vector<2x256xf32> to vector<1x256xf32>
      %198 = vector.broadcast %195 : vector<4x1xf32> to vector<4x256xf32>
      %199 = vector.broadcast %197 : vector<1x256xf32> to vector<4x256xf32>
      %200 = arith.mulf %198, %199 : vector<4x256xf32>
      %201 = arith.addf %190, %200 : vector<4x256xf32>
      %202 = vector.extract_strided_slice %194 {offsets = [1, 0], sizes = [1, 256], strides = [1, 1]} : vector<2x256xf32> to vector<1x256xf32>
      %203 = vector.broadcast %196 : vector<4x1xf32> to vector<4x256xf32>
      %204 = vector.broadcast %202 : vector<1x256xf32> to vector<4x256xf32>
      %205 = arith.mulf %203, %204 : vector<4x256xf32>
      %206 = arith.addf %201, %205 : vector<4x256xf32>
      %c34_i32 = arith.constant 34 : i32
      %207 = tpu.dynamic_rotate %77 by %c34_i32 dim 1 : vector<2x256xf32>, i32 -> vector<2x256xf32>
      %c8 = arith.constant 8 : index
      %c0_107 = arith.constant 0 : index
      %208 = vector.load %arg7[%c8, %c0_107] : memref<49x256xf32, #tpu.memory_space<vmem>>, vector<1x256xf32>
      %209 = vector.broadcast %208 : vector<1x256xf32> to vector<2x256xf32>
      %210 = arith.mulf %207, %209 : vector<2x256xf32>
      %c0_108 = arith.constant 0 : index
      %c8_109 = arith.constant 8 : index
      %211 = vector.load %arg3[%c0_108, %c8_109] : memref<8x49xf32, #tpu.memory_space<vmem>>, vector<4x1xf32>
      %c4_110 = arith.constant 4 : index
      %c8_111 = arith.constant 8 : index
      %212 = vector.load %arg3[%c4_110, %c8_111] : memref<8x49xf32, #tpu.memory_space<vmem>>, vector<4x1xf32>
      %213 = vector.extract_strided_slice %210 {offsets = [0, 0], sizes = [1, 256], strides = [1, 1]} : vector<2x256xf32> to vector<1x256xf32>
      %214 = vector.broadcast %211 : vector<4x1xf32> to vector<4x256xf32>
      %215 = vector.broadcast %213 : vector<1x256xf32> to vector<4x256xf32>
      %216 = arith.mulf %214, %215 : vector<4x256xf32>
      %217 = arith.addf %206, %216 : vector<4x256xf32>
      %218 = vector.extract_strided_slice %210 {offsets = [1, 0], sizes = [1, 256], strides = [1, 1]} : vector<2x256xf32> to vector<1x256xf32>
      %219 = vector.broadcast %212 : vector<4x1xf32> to vector<4x256xf32>
      %220 = vector.broadcast %218 : vector<1x256xf32> to vector<4x256xf32>
      %221 = arith.mulf %219, %220 : vector<4x256xf32>
      %222 = arith.addf %217, %221 : vector<4x256xf32>
      %c33_i32 = arith.constant 33 : i32
      %223 = tpu.dynamic_rotate %77 by %c33_i32 dim 1 : vector<2x256xf32>, i32 -> vector<2x256xf32>
      %c9 = arith.constant 9 : index
      %c0_112 = arith.constant 0 : index
      %224 = vector.load %arg7[%c9, %c0_112] : memref<49x256xf32, #tpu.memory_space<vmem>>, vector<1x256xf32>
      %225 = vector.broadcast %224 : vector<1x256xf32> to vector<2x256xf32>
      %226 = arith.mulf %223, %225 : vector<2x256xf32>
      %c0_113 = arith.constant 0 : index
      %c9_114 = arith.constant 9 : index
      %227 = vector.load %arg3[%c0_113, %c9_114] : memref<8x49xf32, #tpu.memory_space<vmem>>, vector<4x1xf32>
      %c4_115 = arith.constant 4 : index
      %c9_116 = arith.constant 9 : index
      %228 = vector.load %arg3[%c4_115, %c9_116] : memref<8x49xf32, #tpu.memory_space<vmem>>, vector<4x1xf32>
      %229 = vector.extract_strided_slice %226 {offsets = [0, 0], sizes = [1, 256], strides = [1, 1]} : vector<2x256xf32> to vector<1x256xf32>
      %230 = vector.broadcast %227 : vector<4x1xf32> to vector<4x256xf32>
      %231 = vector.broadcast %229 : vector<1x256xf32> to vector<4x256xf32>
      %232 = arith.mulf %230, %231 : vector<4x256xf32>
      %233 = arith.addf %222, %232 : vector<4x256xf32>
      %234 = vector.extract_strided_slice %226 {offsets = [1, 0], sizes = [1, 256], strides = [1, 1]} : vector<2x256xf32> to vector<1x256xf32>
      %235 = vector.broadcast %228 : vector<4x1xf32> to vector<4x256xf32>
      %236 = vector.broadcast %234 : vector<1x256xf32> to vector<4x256xf32>
      %237 = arith.mulf %235, %236 : vector<4x256xf32>
      %238 = arith.addf %233, %237 : vector<4x256xf32>
      %c32_i32 = arith.constant 32 : i32
      %239 = tpu.dynamic_rotate %77 by %c32_i32 dim 1 : vector<2x256xf32>, i32 -> vector<2x256xf32>
      %c10 = arith.constant 10 : index
      %c0_117 = arith.constant 0 : index
      %240 = vector.load %arg7[%c10, %c0_117] : memref<49x256xf32, #tpu.memory_space<vmem>>, vector<1x256xf32>
      %241 = vector.broadcast %240 : vector<1x256xf32> to vector<2x256xf32>
      %242 = arith.mulf %239, %241 : vector<2x256xf32>
      %c0_118 = arith.constant 0 : index
      %c10_119 = arith.constant 10 : index
      %243 = vector.load %arg3[%c0_118, %c10_119] : memref<8x49xf32, #tpu.memory_space<vmem>>, vector<4x1xf32>
      %c4_120 = arith.constant 4 : index
      %c10_121 = arith.constant 10 : index
      %244 = vector.load %arg3[%c4_120, %c10_121] : memref<8x49xf32, #tpu.memory_space<vmem>>, vector<4x1xf32>
      %245 = vector.extract_strided_slice %242 {offsets = [0, 0], sizes = [1, 256], strides = [1, 1]} : vector<2x256xf32> to vector<1x256xf32>
      %246 = vector.broadcast %243 : vector<4x1xf32> to vector<4x256xf32>
      %247 = vector.broadcast %245 : vector<1x256xf32> to vector<4x256xf32>
      %248 = arith.mulf %246, %247 : vector<4x256xf32>
      %249 = arith.addf %238, %248 : vector<4x256xf32>
      %250 = vector.extract_strided_slice %242 {offsets = [1, 0], sizes = [1, 256], strides = [1, 1]} : vector<2x256xf32> to vector<1x256xf32>
      %251 = vector.broadcast %244 : vector<4x1xf32> to vector<4x256xf32>
      %252 = vector.broadcast %250 : vector<1x256xf32> to vector<4x256xf32>
      %253 = arith.mulf %251, %252 : vector<4x256xf32>
      %254 = arith.addf %249, %253 : vector<4x256xf32>
      %c31_i32 = arith.constant 31 : i32
      %255 = tpu.dynamic_rotate %77 by %c31_i32 dim 1 : vector<2x256xf32>, i32 -> vector<2x256xf32>
      %c11 = arith.constant 11 : index
      %c0_122 = arith.constant 0 : index
      %256 = vector.load %arg7[%c11, %c0_122] : memref<49x256xf32, #tpu.memory_space<vmem>>, vector<1x256xf32>
      %257 = vector.broadcast %256 : vector<1x256xf32> to vector<2x256xf32>
      %258 = arith.mulf %255, %257 : vector<2x256xf32>
      %c0_123 = arith.constant 0 : index
      %c11_124 = arith.constant 11 : index
      %259 = vector.load %arg3[%c0_123, %c11_124] : memref<8x49xf32, #tpu.memory_space<vmem>>, vector<4x1xf32>
      %c4_125 = arith.constant 4 : index
      %c11_126 = arith.constant 11 : index
      %260 = vector.load %arg3[%c4_125, %c11_126] : memref<8x49xf32, #tpu.memory_space<vmem>>, vector<4x1xf32>
      %261 = vector.extract_strided_slice %258 {offsets = [0, 0], sizes = [1, 256], strides = [1, 1]} : vector<2x256xf32> to vector<1x256xf32>
      %262 = vector.broadcast %259 : vector<4x1xf32> to vector<4x256xf32>
      %263 = vector.broadcast %261 : vector<1x256xf32> to vector<4x256xf32>
      %264 = arith.mulf %262, %263 : vector<4x256xf32>
      %265 = arith.addf %254, %264 : vector<4x256xf32>
      %266 = vector.extract_strided_slice %258 {offsets = [1, 0], sizes = [1, 256], strides = [1, 1]} : vector<2x256xf32> to vector<1x256xf32>
      %267 = vector.broadcast %260 : vector<4x1xf32> to vector<4x256xf32>
      %268 = vector.broadcast %266 : vector<1x256xf32> to vector<4x256xf32>
      %269 = arith.mulf %267, %268 : vector<4x256xf32>
      %270 = arith.addf %265, %269 : vector<4x256xf32>
      %c30_i32 = arith.constant 30 : i32
      %271 = tpu.dynamic_rotate %77 by %c30_i32 dim 1 : vector<2x256xf32>, i32 -> vector<2x256xf32>
      %c12 = arith.constant 12 : index
      %c0_127 = arith.constant 0 : index
      %272 = vector.load %arg7[%c12, %c0_127] : memref<49x256xf32, #tpu.memory_space<vmem>>, vector<1x256xf32>
      %273 = vector.broadcast %272 : vector<1x256xf32> to vector<2x256xf32>
      %274 = arith.mulf %271, %273 : vector<2x256xf32>
      %c0_128 = arith.constant 0 : index
      %c12_129 = arith.constant 12 : index
      %275 = vector.load %arg3[%c0_128, %c12_129] : memref<8x49xf32, #tpu.memory_space<vmem>>, vector<4x1xf32>
      %c4_130 = arith.constant 4 : index
      %c12_131 = arith.constant 12 : index
      %276 = vector.load %arg3[%c4_130, %c12_131] : memref<8x49xf32, #tpu.memory_space<vmem>>, vector<4x1xf32>
      %277 = vector.extract_strided_slice %274 {offsets = [0, 0], sizes = [1, 256], strides = [1, 1]} : vector<2x256xf32> to vector<1x256xf32>
      %278 = vector.broadcast %275 : vector<4x1xf32> to vector<4x256xf32>
      %279 = vector.broadcast %277 : vector<1x256xf32> to vector<4x256xf32>
      %280 = arith.mulf %278, %279 : vector<4x256xf32>
      %281 = arith.addf %270, %280 : vector<4x256xf32>
      %282 = vector.extract_strided_slice %274 {offsets = [1, 0], sizes = [1, 256], strides = [1, 1]} : vector<2x256xf32> to vector<1x256xf32>
      %283 = vector.broadcast %276 : vector<4x1xf32> to vector<4x256xf32>
      %284 = vector.broadcast %282 : vector<1x256xf32> to vector<4x256xf32>
      %285 = arith.mulf %283, %284 : vector<4x256xf32>
      %286 = arith.addf %281, %285 : vector<4x256xf32>
      %c29_i32 = arith.constant 29 : i32
      %287 = tpu.dynamic_rotate %77 by %c29_i32 dim 1 : vector<2x256xf32>, i32 -> vector<2x256xf32>
      %c13 = arith.constant 13 : index
      %c0_132 = arith.constant 0 : index
      %288 = vector.load %arg7[%c13, %c0_132] : memref<49x256xf32, #tpu.memory_space<vmem>>, vector<1x256xf32>
      %289 = vector.broadcast %288 : vector<1x256xf32> to vector<2x256xf32>
      %290 = arith.mulf %287, %289 : vector<2x256xf32>
      %c0_133 = arith.constant 0 : index
      %c13_134 = arith.constant 13 : index
      %291 = vector.load %arg3[%c0_133, %c13_134] : memref<8x49xf32, #tpu.memory_space<vmem>>, vector<4x1xf32>
      %c4_135 = arith.constant 4 : index
      %c13_136 = arith.constant 13 : index
      %292 = vector.load %arg3[%c4_135, %c13_136] : memref<8x49xf32, #tpu.memory_space<vmem>>, vector<4x1xf32>
      %293 = vector.extract_strided_slice %290 {offsets = [0, 0], sizes = [1, 256], strides = [1, 1]} : vector<2x256xf32> to vector<1x256xf32>
      %294 = vector.broadcast %291 : vector<4x1xf32> to vector<4x256xf32>
      %295 = vector.broadcast %293 : vector<1x256xf32> to vector<4x256xf32>
      %296 = arith.mulf %294, %295 : vector<4x256xf32>
      %297 = arith.addf %286, %296 : vector<4x256xf32>
      %298 = vector.extract_strided_slice %290 {offsets = [1, 0], sizes = [1, 256], strides = [1, 1]} : vector<2x256xf32> to vector<1x256xf32>
      %299 = vector.broadcast %292 : vector<4x1xf32> to vector<4x256xf32>
      %300 = vector.broadcast %298 : vector<1x256xf32> to vector<4x256xf32>
      %301 = arith.mulf %299, %300 : vector<4x256xf32>
      %302 = arith.addf %297, %301 : vector<4x256xf32>
      %c19_i32 = arith.constant 19 : i32
      %303 = tpu.dynamic_rotate %77 by %c19_i32 dim 1 : vector<2x256xf32>, i32 -> vector<2x256xf32>
      %c14 = arith.constant 14 : index
      %c0_137 = arith.constant 0 : index
      %304 = vector.load %arg7[%c14, %c0_137] : memref<49x256xf32, #tpu.memory_space<vmem>>, vector<1x256xf32>
      %305 = vector.broadcast %304 : vector<1x256xf32> to vector<2x256xf32>
      %306 = arith.mulf %303, %305 : vector<2x256xf32>
      %c0_138 = arith.constant 0 : index
      %c14_139 = arith.constant 14 : index
      %307 = vector.load %arg3[%c0_138, %c14_139] : memref<8x49xf32, #tpu.memory_space<vmem>>, vector<4x1xf32>
      %c4_140 = arith.constant 4 : index
      %c14_141 = arith.constant 14 : index
      %308 = vector.load %arg3[%c4_140, %c14_141] : memref<8x49xf32, #tpu.memory_space<vmem>>, vector<4x1xf32>
      %309 = vector.extract_strided_slice %306 {offsets = [0, 0], sizes = [1, 256], strides = [1, 1]} : vector<2x256xf32> to vector<1x256xf32>
      %310 = vector.broadcast %307 : vector<4x1xf32> to vector<4x256xf32>
      %311 = vector.broadcast %309 : vector<1x256xf32> to vector<4x256xf32>
      %312 = arith.mulf %310, %311 : vector<4x256xf32>
      %313 = arith.addf %302, %312 : vector<4x256xf32>
      %314 = vector.extract_strided_slice %306 {offsets = [1, 0], sizes = [1, 256], strides = [1, 1]} : vector<2x256xf32> to vector<1x256xf32>
      %315 = vector.broadcast %308 : vector<4x1xf32> to vector<4x256xf32>
      %316 = vector.broadcast %314 : vector<1x256xf32> to vector<4x256xf32>
      %317 = arith.mulf %315, %316 : vector<4x256xf32>
      %318 = arith.addf %313, %317 : vector<4x256xf32>
      %c18_i32 = arith.constant 18 : i32
      %319 = tpu.dynamic_rotate %77 by %c18_i32 dim 1 : vector<2x256xf32>, i32 -> vector<2x256xf32>
      %c15 = arith.constant 15 : index
      %c0_142 = arith.constant 0 : index
      %320 = vector.load %arg7[%c15, %c0_142] : memref<49x256xf32, #tpu.memory_space<vmem>>, vector<1x256xf32>
      %321 = vector.broadcast %320 : vector<1x256xf32> to vector<2x256xf32>
      %322 = arith.mulf %319, %321 : vector<2x256xf32>
      %c0_143 = arith.constant 0 : index
      %c15_144 = arith.constant 15 : index
      %323 = vector.load %arg3[%c0_143, %c15_144] : memref<8x49xf32, #tpu.memory_space<vmem>>, vector<4x1xf32>
      %c4_145 = arith.constant 4 : index
      %c15_146 = arith.constant 15 : index
      %324 = vector.load %arg3[%c4_145, %c15_146] : memref<8x49xf32, #tpu.memory_space<vmem>>, vector<4x1xf32>
      %325 = vector.extract_strided_slice %322 {offsets = [0, 0], sizes = [1, 256], strides = [1, 1]} : vector<2x256xf32> to vector<1x256xf32>
      %326 = vector.broadcast %323 : vector<4x1xf32> to vector<4x256xf32>
      %327 = vector.broadcast %325 : vector<1x256xf32> to vector<4x256xf32>
      %328 = arith.mulf %326, %327 : vector<4x256xf32>
      %329 = arith.addf %318, %328 : vector<4x256xf32>
      %330 = vector.extract_strided_slice %322 {offsets = [1, 0], sizes = [1, 256], strides = [1, 1]} : vector<2x256xf32> to vector<1x256xf32>
      %331 = vector.broadcast %324 : vector<4x1xf32> to vector<4x256xf32>
      %332 = vector.broadcast %330 : vector<1x256xf32> to vector<4x256xf32>
      %333 = arith.mulf %331, %332 : vector<4x256xf32>
      %334 = arith.addf %329, %333 : vector<4x256xf32>
      %c17_i32 = arith.constant 17 : i32
      %335 = tpu.dynamic_rotate %77 by %c17_i32 dim 1 : vector<2x256xf32>, i32 -> vector<2x256xf32>
      %c16 = arith.constant 16 : index
      %c0_147 = arith.constant 0 : index
      %336 = vector.load %arg7[%c16, %c0_147] : memref<49x256xf32, #tpu.memory_space<vmem>>, vector<1x256xf32>
      %337 = vector.broadcast %336 : vector<1x256xf32> to vector<2x256xf32>
      %338 = arith.mulf %335, %337 : vector<2x256xf32>
      %c0_148 = arith.constant 0 : index
      %c16_149 = arith.constant 16 : index
      %339 = vector.load %arg3[%c0_148, %c16_149] : memref<8x49xf32, #tpu.memory_space<vmem>>, vector<4x1xf32>
      %c4_150 = arith.constant 4 : index
      %c16_151 = arith.constant 16 : index
      %340 = vector.load %arg3[%c4_150, %c16_151] : memref<8x49xf32, #tpu.memory_space<vmem>>, vector<4x1xf32>
      %341 = vector.extract_strided_slice %338 {offsets = [0, 0], sizes = [1, 256], strides = [1, 1]} : vector<2x256xf32> to vector<1x256xf32>
      %342 = vector.broadcast %339 : vector<4x1xf32> to vector<4x256xf32>
      %343 = vector.broadcast %341 : vector<1x256xf32> to vector<4x256xf32>
      %344 = arith.mulf %342, %343 : vector<4x256xf32>
      %345 = arith.addf %334, %344 : vector<4x256xf32>
      %346 = vector.extract_strided_slice %338 {offsets = [1, 0], sizes = [1, 256], strides = [1, 1]} : vector<2x256xf32> to vector<1x256xf32>
      %347 = vector.broadcast %340 : vector<4x1xf32> to vector<4x256xf32>
      %348 = vector.broadcast %346 : vector<1x256xf32> to vector<4x256xf32>
      %349 = arith.mulf %347, %348 : vector<4x256xf32>
      %350 = arith.addf %345, %349 : vector<4x256xf32>
      %c16_i32 = arith.constant 16 : i32
      %351 = tpu.dynamic_rotate %77 by %c16_i32 dim 1 : vector<2x256xf32>, i32 -> vector<2x256xf32>
      %c17 = arith.constant 17 : index
      %c0_152 = arith.constant 0 : index
      %352 = vector.load %arg7[%c17, %c0_152] : memref<49x256xf32, #tpu.memory_space<vmem>>, vector<1x256xf32>
      %353 = vector.broadcast %352 : vector<1x256xf32> to vector<2x256xf32>
      %354 = arith.mulf %351, %353 : vector<2x256xf32>
      %c0_153 = arith.constant 0 : index
      %c17_154 = arith.constant 17 : index
      %355 = vector.load %arg3[%c0_153, %c17_154] : memref<8x49xf32, #tpu.memory_space<vmem>>, vector<4x1xf32>
      %c4_155 = arith.constant 4 : index
      %c17_156 = arith.constant 17 : index
      %356 = vector.load %arg3[%c4_155, %c17_156] : memref<8x49xf32, #tpu.memory_space<vmem>>, vector<4x1xf32>
      %357 = vector.extract_strided_slice %354 {offsets = [0, 0], sizes = [1, 256], strides = [1, 1]} : vector<2x256xf32> to vector<1x256xf32>
      %358 = vector.broadcast %355 : vector<4x1xf32> to vector<4x256xf32>
      %359 = vector.broadcast %357 : vector<1x256xf32> to vector<4x256xf32>
      %360 = arith.mulf %358, %359 : vector<4x256xf32>
      %361 = arith.addf %350, %360 : vector<4x256xf32>
      %362 = vector.extract_strided_slice %354 {offsets = [1, 0], sizes = [1, 256], strides = [1, 1]} : vector<2x256xf32> to vector<1x256xf32>
      %363 = vector.broadcast %356 : vector<4x1xf32> to vector<4x256xf32>
      %364 = vector.broadcast %362 : vector<1x256xf32> to vector<4x256xf32>
      %365 = arith.mulf %363, %364 : vector<4x256xf32>
      %366 = arith.addf %361, %365 : vector<4x256xf32>
      %c15_i32 = arith.constant 15 : i32
      %367 = tpu.dynamic_rotate %77 by %c15_i32 dim 1 : vector<2x256xf32>, i32 -> vector<2x256xf32>
      %c18 = arith.constant 18 : index
      %c0_157 = arith.constant 0 : index
      %368 = vector.load %arg7[%c18, %c0_157] : memref<49x256xf32, #tpu.memory_space<vmem>>, vector<1x256xf32>
      %369 = vector.broadcast %368 : vector<1x256xf32> to vector<2x256xf32>
      %370 = arith.mulf %367, %369 : vector<2x256xf32>
      %c0_158 = arith.constant 0 : index
      %c18_159 = arith.constant 18 : index
      %371 = vector.load %arg3[%c0_158, %c18_159] : memref<8x49xf32, #tpu.memory_space<vmem>>, vector<4x1xf32>
      %c4_160 = arith.constant 4 : index
      %c18_161 = arith.constant 18 : index
      %372 = vector.load %arg3[%c4_160, %c18_161] : memref<8x49xf32, #tpu.memory_space<vmem>>, vector<4x1xf32>
      %373 = vector.extract_strided_slice %370 {offsets = [0, 0], sizes = [1, 256], strides = [1, 1]} : vector<2x256xf32> to vector<1x256xf32>
      %374 = vector.broadcast %371 : vector<4x1xf32> to vector<4x256xf32>
      %375 = vector.broadcast %373 : vector<1x256xf32> to vector<4x256xf32>
      %376 = arith.mulf %374, %375 : vector<4x256xf32>
      %377 = arith.addf %366, %376 : vector<4x256xf32>
      %378 = vector.extract_strided_slice %370 {offsets = [1, 0], sizes = [1, 256], strides = [1, 1]} : vector<2x256xf32> to vector<1x256xf32>
      %379 = vector.broadcast %372 : vector<4x1xf32> to vector<4x256xf32>
      %380 = vector.broadcast %378 : vector<1x256xf32> to vector<4x256xf32>
      %381 = arith.mulf %379, %380 : vector<4x256xf32>
      %382 = arith.addf %377, %381 : vector<4x256xf32>
      %c14_i32 = arith.constant 14 : i32
      %383 = tpu.dynamic_rotate %77 by %c14_i32 dim 1 : vector<2x256xf32>, i32 -> vector<2x256xf32>
      %c19 = arith.constant 19 : index
      %c0_162 = arith.constant 0 : index
      %384 = vector.load %arg7[%c19, %c0_162] : memref<49x256xf32, #tpu.memory_space<vmem>>, vector<1x256xf32>
      %385 = vector.broadcast %384 : vector<1x256xf32> to vector<2x256xf32>
      %386 = arith.mulf %383, %385 : vector<2x256xf32>
      %c0_163 = arith.constant 0 : index
      %c19_164 = arith.constant 19 : index
      %387 = vector.load %arg3[%c0_163, %c19_164] : memref<8x49xf32, #tpu.memory_space<vmem>>, vector<4x1xf32>
      %c4_165 = arith.constant 4 : index
      %c19_166 = arith.constant 19 : index
      %388 = vector.load %arg3[%c4_165, %c19_166] : memref<8x49xf32, #tpu.memory_space<vmem>>, vector<4x1xf32>
      %389 = vector.extract_strided_slice %386 {offsets = [0, 0], sizes = [1, 256], strides = [1, 1]} : vector<2x256xf32> to vector<1x256xf32>
      %390 = vector.broadcast %387 : vector<4x1xf32> to vector<4x256xf32>
      %391 = vector.broadcast %389 : vector<1x256xf32> to vector<4x256xf32>
      %392 = arith.mulf %390, %391 : vector<4x256xf32>
      %393 = arith.addf %382, %392 : vector<4x256xf32>
      %394 = vector.extract_strided_slice %386 {offsets = [1, 0], sizes = [1, 256], strides = [1, 1]} : vector<2x256xf32> to vector<1x256xf32>
      %395 = vector.broadcast %388 : vector<4x1xf32> to vector<4x256xf32>
      %396 = vector.broadcast %394 : vector<1x256xf32> to vector<4x256xf32>
      %397 = arith.mulf %395, %396 : vector<4x256xf32>
      %398 = arith.addf %393, %397 : vector<4x256xf32>
      %c13_i32 = arith.constant 13 : i32
      %399 = tpu.dynamic_rotate %77 by %c13_i32 dim 1 : vector<2x256xf32>, i32 -> vector<2x256xf32>
      %c20 = arith.constant 20 : index
      %c0_167 = arith.constant 0 : index
      %400 = vector.load %arg7[%c20, %c0_167] : memref<49x256xf32, #tpu.memory_space<vmem>>, vector<1x256xf32>
      %401 = vector.broadcast %400 : vector<1x256xf32> to vector<2x256xf32>
      %402 = arith.mulf %399, %401 : vector<2x256xf32>
      %c0_168 = arith.constant 0 : index
      %c20_169 = arith.constant 20 : index
      %403 = vector.load %arg3[%c0_168, %c20_169] : memref<8x49xf32, #tpu.memory_space<vmem>>, vector<4x1xf32>
      %c4_170 = arith.constant 4 : index
      %c20_171 = arith.constant 20 : index
      %404 = vector.load %arg3[%c4_170, %c20_171] : memref<8x49xf32, #tpu.memory_space<vmem>>, vector<4x1xf32>
      %405 = vector.extract_strided_slice %402 {offsets = [0, 0], sizes = [1, 256], strides = [1, 1]} : vector<2x256xf32> to vector<1x256xf32>
      %406 = vector.broadcast %403 : vector<4x1xf32> to vector<4x256xf32>
      %407 = vector.broadcast %405 : vector<1x256xf32> to vector<4x256xf32>
      %408 = arith.mulf %406, %407 : vector<4x256xf32>
      %409 = arith.addf %398, %408 : vector<4x256xf32>
      %410 = vector.extract_strided_slice %402 {offsets = [1, 0], sizes = [1, 256], strides = [1, 1]} : vector<2x256xf32> to vector<1x256xf32>
      %411 = vector.broadcast %404 : vector<4x1xf32> to vector<4x256xf32>
      %412 = vector.broadcast %410 : vector<1x256xf32> to vector<4x256xf32>
      %413 = arith.mulf %411, %412 : vector<4x256xf32>
      %414 = arith.addf %409, %413 : vector<4x256xf32>
      %c3_i32 = arith.constant 3 : i32
      %415 = tpu.dynamic_rotate %77 by %c3_i32 dim 1 : vector<2x256xf32>, i32 -> vector<2x256xf32>
      %c21 = arith.constant 21 : index
      %c0_172 = arith.constant 0 : index
      %416 = vector.load %arg7[%c21, %c0_172] : memref<49x256xf32, #tpu.memory_space<vmem>>, vector<1x256xf32>
      %417 = vector.broadcast %416 : vector<1x256xf32> to vector<2x256xf32>
      %418 = arith.mulf %415, %417 : vector<2x256xf32>
      %c0_173 = arith.constant 0 : index
      %c21_174 = arith.constant 21 : index
      %419 = vector.load %arg3[%c0_173, %c21_174] : memref<8x49xf32, #tpu.memory_space<vmem>>, vector<4x1xf32>
      %c4_175 = arith.constant 4 : index
      %c21_176 = arith.constant 21 : index
      %420 = vector.load %arg3[%c4_175, %c21_176] : memref<8x49xf32, #tpu.memory_space<vmem>>, vector<4x1xf32>
      %421 = vector.extract_strided_slice %418 {offsets = [0, 0], sizes = [1, 256], strides = [1, 1]} : vector<2x256xf32> to vector<1x256xf32>
      %422 = vector.broadcast %419 : vector<4x1xf32> to vector<4x256xf32>
      %423 = vector.broadcast %421 : vector<1x256xf32> to vector<4x256xf32>
      %424 = arith.mulf %422, %423 : vector<4x256xf32>
      %425 = arith.addf %414, %424 : vector<4x256xf32>
      %426 = vector.extract_strided_slice %418 {offsets = [1, 0], sizes = [1, 256], strides = [1, 1]} : vector<2x256xf32> to vector<1x256xf32>
      %427 = vector.broadcast %420 : vector<4x1xf32> to vector<4x256xf32>
      %428 = vector.broadcast %426 : vector<1x256xf32> to vector<4x256xf32>
      %429 = arith.mulf %427, %428 : vector<4x256xf32>
      %430 = arith.addf %425, %429 : vector<4x256xf32>
      %c2_i32 = arith.constant 2 : i32
      %431 = tpu.dynamic_rotate %77 by %c2_i32 dim 1 : vector<2x256xf32>, i32 -> vector<2x256xf32>
      %c22 = arith.constant 22 : index
      %c0_177 = arith.constant 0 : index
      %432 = vector.load %arg7[%c22, %c0_177] : memref<49x256xf32, #tpu.memory_space<vmem>>, vector<1x256xf32>
      %433 = vector.broadcast %432 : vector<1x256xf32> to vector<2x256xf32>
      %434 = arith.mulf %431, %433 : vector<2x256xf32>
      %c0_178 = arith.constant 0 : index
      %c22_179 = arith.constant 22 : index
      %435 = vector.load %arg3[%c0_178, %c22_179] : memref<8x49xf32, #tpu.memory_space<vmem>>, vector<4x1xf32>
      %c4_180 = arith.constant 4 : index
      %c22_181 = arith.constant 22 : index
      %436 = vector.load %arg3[%c4_180, %c22_181] : memref<8x49xf32, #tpu.memory_space<vmem>>, vector<4x1xf32>
      %437 = vector.extract_strided_slice %434 {offsets = [0, 0], sizes = [1, 256], strides = [1, 1]} : vector<2x256xf32> to vector<1x256xf32>
      %438 = vector.broadcast %435 : vector<4x1xf32> to vector<4x256xf32>
      %439 = vector.broadcast %437 : vector<1x256xf32> to vector<4x256xf32>
      %440 = arith.mulf %438, %439 : vector<4x256xf32>
      %441 = arith.addf %430, %440 : vector<4x256xf32>
      %442 = vector.extract_strided_slice %434 {offsets = [1, 0], sizes = [1, 256], strides = [1, 1]} : vector<2x256xf32> to vector<1x256xf32>
      %443 = vector.broadcast %436 : vector<4x1xf32> to vector<4x256xf32>
      %444 = vector.broadcast %442 : vector<1x256xf32> to vector<4x256xf32>
      %445 = arith.mulf %443, %444 : vector<4x256xf32>
      %446 = arith.addf %441, %445 : vector<4x256xf32>
      %c1_i32_182 = arith.constant 1 : i32
      %447 = tpu.dynamic_rotate %77 by %c1_i32_182 dim 1 : vector<2x256xf32>, i32 -> vector<2x256xf32>
      %c23 = arith.constant 23 : index
      %c0_183 = arith.constant 0 : index
      %448 = vector.load %arg7[%c23, %c0_183] : memref<49x256xf32, #tpu.memory_space<vmem>>, vector<1x256xf32>
      %449 = vector.broadcast %448 : vector<1x256xf32> to vector<2x256xf32>
      %450 = arith.mulf %447, %449 : vector<2x256xf32>
      %c0_184 = arith.constant 0 : index
      %c23_185 = arith.constant 23 : index
      %451 = vector.load %arg3[%c0_184, %c23_185] : memref<8x49xf32, #tpu.memory_space<vmem>>, vector<4x1xf32>
      %c4_186 = arith.constant 4 : index
      %c23_187 = arith.constant 23 : index
      %452 = vector.load %arg3[%c4_186, %c23_187] : memref<8x49xf32, #tpu.memory_space<vmem>>, vector<4x1xf32>
      %453 = vector.extract_strided_slice %450 {offsets = [0, 0], sizes = [1, 256], strides = [1, 1]} : vector<2x256xf32> to vector<1x256xf32>
      %454 = vector.broadcast %451 : vector<4x1xf32> to vector<4x256xf32>
      %455 = vector.broadcast %453 : vector<1x256xf32> to vector<4x256xf32>
      %456 = arith.mulf %454, %455 : vector<4x256xf32>
      %457 = arith.addf %446, %456 : vector<4x256xf32>
      %458 = vector.extract_strided_slice %450 {offsets = [1, 0], sizes = [1, 256], strides = [1, 1]} : vector<2x256xf32> to vector<1x256xf32>
      %459 = vector.broadcast %452 : vector<4x1xf32> to vector<4x256xf32>
      %460 = vector.broadcast %458 : vector<1x256xf32> to vector<4x256xf32>
      %461 = arith.mulf %459, %460 : vector<4x256xf32>
      %462 = arith.addf %457, %461 : vector<4x256xf32>
      %c0_188 = arith.constant 0 : index
      %c24 = arith.constant 24 : index
      %463 = vector.load %arg3[%c0_188, %c24] : memref<8x49xf32, #tpu.memory_space<vmem>>, vector<4x1xf32>
      %c4_189 = arith.constant 4 : index
      %c24_190 = arith.constant 24 : index
      %464 = vector.load %arg3[%c4_189, %c24_190] : memref<8x49xf32, #tpu.memory_space<vmem>>, vector<4x1xf32>
      %465 = vector.extract_strided_slice %77 {offsets = [0, 0], sizes = [1, 256], strides = [1, 1]} : vector<2x256xf32> to vector<1x256xf32>
      %466 = vector.broadcast %463 : vector<4x1xf32> to vector<4x256xf32>
      %467 = vector.broadcast %465 : vector<1x256xf32> to vector<4x256xf32>
      %468 = arith.mulf %466, %467 : vector<4x256xf32>
      %469 = arith.addf %462, %468 : vector<4x256xf32>
      %470 = vector.extract_strided_slice %77 {offsets = [1, 0], sizes = [1, 256], strides = [1, 1]} : vector<2x256xf32> to vector<1x256xf32>
      %471 = vector.broadcast %464 : vector<4x1xf32> to vector<4x256xf32>
      %472 = vector.broadcast %470 : vector<1x256xf32> to vector<4x256xf32>
      %473 = arith.mulf %471, %472 : vector<4x256xf32>
      %474 = arith.addf %469, %473 : vector<4x256xf32>
      %c255_i32 = arith.constant 255 : i32
      %475 = tpu.dynamic_rotate %77 by %c255_i32 dim 1 : vector<2x256xf32>, i32 -> vector<2x256xf32>
      %c25 = arith.constant 25 : index
      %c0_191 = arith.constant 0 : index
      %476 = vector.load %arg7[%c25, %c0_191] : memref<49x256xf32, #tpu.memory_space<vmem>>, vector<1x256xf32>
      %477 = vector.broadcast %476 : vector<1x256xf32> to vector<2x256xf32>
      %478 = arith.mulf %475, %477 : vector<2x256xf32>
      %c0_192 = arith.constant 0 : index
      %c25_193 = arith.constant 25 : index
      %479 = vector.load %arg3[%c0_192, %c25_193] : memref<8x49xf32, #tpu.memory_space<vmem>>, vector<4x1xf32>
      %c4_194 = arith.constant 4 : index
      %c25_195 = arith.constant 25 : index
      %480 = vector.load %arg3[%c4_194, %c25_195] : memref<8x49xf32, #tpu.memory_space<vmem>>, vector<4x1xf32>
      %481 = vector.extract_strided_slice %478 {offsets = [0, 0], sizes = [1, 256], strides = [1, 1]} : vector<2x256xf32> to vector<1x256xf32>
      %482 = vector.broadcast %479 : vector<4x1xf32> to vector<4x256xf32>
      %483 = vector.broadcast %481 : vector<1x256xf32> to vector<4x256xf32>
      %484 = arith.mulf %482, %483 : vector<4x256xf32>
      %485 = arith.addf %474, %484 : vector<4x256xf32>
      %486 = vector.extract_strided_slice %478 {offsets = [1, 0], sizes = [1, 256], strides = [1, 1]} : vector<2x256xf32> to vector<1x256xf32>
      %487 = vector.broadcast %480 : vector<4x1xf32> to vector<4x256xf32>
      %488 = vector.broadcast %486 : vector<1x256xf32> to vector<4x256xf32>
      %489 = arith.mulf %487, %488 : vector<4x256xf32>
      %490 = arith.addf %485, %489 : vector<4x256xf32>
      %c254_i32 = arith.constant 254 : i32
      %491 = tpu.dynamic_rotate %77 by %c254_i32 dim 1 : vector<2x256xf32>, i32 -> vector<2x256xf32>
      %c26 = arith.constant 26 : index
      %c0_196 = arith.constant 0 : index
      %492 = vector.load %arg7[%c26, %c0_196] : memref<49x256xf32, #tpu.memory_space<vmem>>, vector<1x256xf32>
      %493 = vector.broadcast %492 : vector<1x256xf32> to vector<2x256xf32>
      %494 = arith.mulf %491, %493 : vector<2x256xf32>
      %c0_197 = arith.constant 0 : index
      %c26_198 = arith.constant 26 : index
      %495 = vector.load %arg3[%c0_197, %c26_198] : memref<8x49xf32, #tpu.memory_space<vmem>>, vector<4x1xf32>
      %c4_199 = arith.constant 4 : index
      %c26_200 = arith.constant 26 : index
      %496 = vector.load %arg3[%c4_199, %c26_200] : memref<8x49xf32, #tpu.memory_space<vmem>>, vector<4x1xf32>
      %497 = vector.extract_strided_slice %494 {offsets = [0, 0], sizes = [1, 256], strides = [1, 1]} : vector<2x256xf32> to vector<1x256xf32>
      %498 = vector.broadcast %495 : vector<4x1xf32> to vector<4x256xf32>
      %499 = vector.broadcast %497 : vector<1x256xf32> to vector<4x256xf32>
      %500 = arith.mulf %498, %499 : vector<4x256xf32>
      %501 = arith.addf %490, %500 : vector<4x256xf32>
      %502 = vector.extract_strided_slice %494 {offsets = [1, 0], sizes = [1, 256], strides = [1, 1]} : vector<2x256xf32> to vector<1x256xf32>
      %503 = vector.broadcast %496 : vector<4x1xf32> to vector<4x256xf32>
      %504 = vector.broadcast %502 : vector<1x256xf32> to vector<4x256xf32>
      %505 = arith.mulf %503, %504 : vector<4x256xf32>
      %506 = arith.addf %501, %505 : vector<4x256xf32>
      %c253_i32 = arith.constant 253 : i32
      %507 = tpu.dynamic_rotate %77 by %c253_i32 dim 1 : vector<2x256xf32>, i32 -> vector<2x256xf32>
      %c27 = arith.constant 27 : index
      %c0_201 = arith.constant 0 : index
      %508 = vector.load %arg7[%c27, %c0_201] : memref<49x256xf32, #tpu.memory_space<vmem>>, vector<1x256xf32>
      %509 = vector.broadcast %508 : vector<1x256xf32> to vector<2x256xf32>
      %510 = arith.mulf %507, %509 : vector<2x256xf32>
      %c0_202 = arith.constant 0 : index
      %c27_203 = arith.constant 27 : index
      %511 = vector.load %arg3[%c0_202, %c27_203] : memref<8x49xf32, #tpu.memory_space<vmem>>, vector<4x1xf32>
      %c4_204 = arith.constant 4 : index
      %c27_205 = arith.constant 27 : index
      %512 = vector.load %arg3[%c4_204, %c27_205] : memref<8x49xf32, #tpu.memory_space<vmem>>, vector<4x1xf32>
      %513 = vector.extract_strided_slice %510 {offsets = [0, 0], sizes = [1, 256], strides = [1, 1]} : vector<2x256xf32> to vector<1x256xf32>
      %514 = vector.broadcast %511 : vector<4x1xf32> to vector<4x256xf32>
      %515 = vector.broadcast %513 : vector<1x256xf32> to vector<4x256xf32>
      %516 = arith.mulf %514, %515 : vector<4x256xf32>
      %517 = arith.addf %506, %516 : vector<4x256xf32>
      %518 = vector.extract_strided_slice %510 {offsets = [1, 0], sizes = [1, 256], strides = [1, 1]} : vector<2x256xf32> to vector<1x256xf32>
      %519 = vector.broadcast %512 : vector<4x1xf32> to vector<4x256xf32>
      %520 = vector.broadcast %518 : vector<1x256xf32> to vector<4x256xf32>
      %521 = arith.mulf %519, %520 : vector<4x256xf32>
      %522 = arith.addf %517, %521 : vector<4x256xf32>
      %c243_i32 = arith.constant 243 : i32
      %523 = tpu.dynamic_rotate %77 by %c243_i32 dim 1 : vector<2x256xf32>, i32 -> vector<2x256xf32>
      %c28 = arith.constant 28 : index
      %c0_206 = arith.constant 0 : index
      %524 = vector.load %arg7[%c28, %c0_206] : memref<49x256xf32, #tpu.memory_space<vmem>>, vector<1x256xf32>
      %525 = vector.broadcast %524 : vector<1x256xf32> to vector<2x256xf32>
      %526 = arith.mulf %523, %525 : vector<2x256xf32>
      %c0_207 = arith.constant 0 : index
      %c28_208 = arith.constant 28 : index
      %527 = vector.load %arg3[%c0_207, %c28_208] : memref<8x49xf32, #tpu.memory_space<vmem>>, vector<4x1xf32>
      %c4_209 = arith.constant 4 : index
      %c28_210 = arith.constant 28 : index
      %528 = vector.load %arg3[%c4_209, %c28_210] : memref<8x49xf32, #tpu.memory_space<vmem>>, vector<4x1xf32>
      %529 = vector.extract_strided_slice %526 {offsets = [0, 0], sizes = [1, 256], strides = [1, 1]} : vector<2x256xf32> to vector<1x256xf32>
      %530 = vector.broadcast %527 : vector<4x1xf32> to vector<4x256xf32>
      %531 = vector.broadcast %529 : vector<1x256xf32> to vector<4x256xf32>
      %532 = arith.mulf %530, %531 : vector<4x256xf32>
      %533 = arith.addf %522, %532 : vector<4x256xf32>
      %534 = vector.extract_strided_slice %526 {offsets = [1, 0], sizes = [1, 256], strides = [1, 1]} : vector<2x256xf32> to vector<1x256xf32>
      %535 = vector.broadcast %528 : vector<4x1xf32> to vector<4x256xf32>
      %536 = vector.broadcast %534 : vector<1x256xf32> to vector<4x256xf32>
      %537 = arith.mulf %535, %536 : vector<4x256xf32>
      %538 = arith.addf %533, %537 : vector<4x256xf32>
      %c242_i32 = arith.constant 242 : i32
      %539 = tpu.dynamic_rotate %77 by %c242_i32 dim 1 : vector<2x256xf32>, i32 -> vector<2x256xf32>
      %c29 = arith.constant 29 : index
      %c0_211 = arith.constant 0 : index
      %540 = vector.load %arg7[%c29, %c0_211] : memref<49x256xf32, #tpu.memory_space<vmem>>, vector<1x256xf32>
      %541 = vector.broadcast %540 : vector<1x256xf32> to vector<2x256xf32>
      %542 = arith.mulf %539, %541 : vector<2x256xf32>
      %c0_212 = arith.constant 0 : index
      %c29_213 = arith.constant 29 : index
      %543 = vector.load %arg3[%c0_212, %c29_213] : memref<8x49xf32, #tpu.memory_space<vmem>>, vector<4x1xf32>
      %c4_214 = arith.constant 4 : index
      %c29_215 = arith.constant 29 : index
      %544 = vector.load %arg3[%c4_214, %c29_215] : memref<8x49xf32, #tpu.memory_space<vmem>>, vector<4x1xf32>
      %545 = vector.extract_strided_slice %542 {offsets = [0, 0], sizes = [1, 256], strides = [1, 1]} : vector<2x256xf32> to vector<1x256xf32>
      %546 = vector.broadcast %543 : vector<4x1xf32> to vector<4x256xf32>
      %547 = vector.broadcast %545 : vector<1x256xf32> to vector<4x256xf32>
      %548 = arith.mulf %546, %547 : vector<4x256xf32>
      %549 = arith.addf %538, %548 : vector<4x256xf32>
      %550 = vector.extract_strided_slice %542 {offsets = [1, 0], sizes = [1, 256], strides = [1, 1]} : vector<2x256xf32> to vector<1x256xf32>
      %551 = vector.broadcast %544 : vector<4x1xf32> to vector<4x256xf32>
      %552 = vector.broadcast %550 : vector<1x256xf32> to vector<4x256xf32>
      %553 = arith.mulf %551, %552 : vector<4x256xf32>
      %554 = arith.addf %549, %553 : vector<4x256xf32>
      %c241_i32 = arith.constant 241 : i32
      %555 = tpu.dynamic_rotate %77 by %c241_i32 dim 1 : vector<2x256xf32>, i32 -> vector<2x256xf32>
      %c30 = arith.constant 30 : index
      %c0_216 = arith.constant 0 : index
      %556 = vector.load %arg7[%c30, %c0_216] : memref<49x256xf32, #tpu.memory_space<vmem>>, vector<1x256xf32>
      %557 = vector.broadcast %556 : vector<1x256xf32> to vector<2x256xf32>
      %558 = arith.mulf %555, %557 : vector<2x256xf32>
      %c0_217 = arith.constant 0 : index
      %c30_218 = arith.constant 30 : index
      %559 = vector.load %arg3[%c0_217, %c30_218] : memref<8x49xf32, #tpu.memory_space<vmem>>, vector<4x1xf32>
      %c4_219 = arith.constant 4 : index
      %c30_220 = arith.constant 30 : index
      %560 = vector.load %arg3[%c4_219, %c30_220] : memref<8x49xf32, #tpu.memory_space<vmem>>, vector<4x1xf32>
      %561 = vector.extract_strided_slice %558 {offsets = [0, 0], sizes = [1, 256], strides = [1, 1]} : vector<2x256xf32> to vector<1x256xf32>
      %562 = vector.broadcast %559 : vector<4x1xf32> to vector<4x256xf32>
      %563 = vector.broadcast %561 : vector<1x256xf32> to vector<4x256xf32>
      %564 = arith.mulf %562, %563 : vector<4x256xf32>
      %565 = arith.addf %554, %564 : vector<4x256xf32>
      %566 = vector.extract_strided_slice %558 {offsets = [1, 0], sizes = [1, 256], strides = [1, 1]} : vector<2x256xf32> to vector<1x256xf32>
      %567 = vector.broadcast %560 : vector<4x1xf32> to vector<4x256xf32>
      %568 = vector.broadcast %566 : vector<1x256xf32> to vector<4x256xf32>
      %569 = arith.mulf %567, %568 : vector<4x256xf32>
      %570 = arith.addf %565, %569 : vector<4x256xf32>
      %c240_i32 = arith.constant 240 : i32
      %571 = tpu.dynamic_rotate %77 by %c240_i32 dim 1 : vector<2x256xf32>, i32 -> vector<2x256xf32>
      %c31 = arith.constant 31 : index
      %c0_221 = arith.constant 0 : index
      %572 = vector.load %arg7[%c31, %c0_221] : memref<49x256xf32, #tpu.memory_space<vmem>>, vector<1x256xf32>
      %573 = vector.broadcast %572 : vector<1x256xf32> to vector<2x256xf32>
      %574 = arith.mulf %571, %573 : vector<2x256xf32>
      %c0_222 = arith.constant 0 : index
      %c31_223 = arith.constant 31 : index
      %575 = vector.load %arg3[%c0_222, %c31_223] : memref<8x49xf32, #tpu.memory_space<vmem>>, vector<4x1xf32>
      %c4_224 = arith.constant 4 : index
      %c31_225 = arith.constant 31 : index
      %576 = vector.load %arg3[%c4_224, %c31_225] : memref<8x49xf32, #tpu.memory_space<vmem>>, vector<4x1xf32>
      %577 = vector.extract_strided_slice %574 {offsets = [0, 0], sizes = [1, 256], strides = [1, 1]} : vector<2x256xf32> to vector<1x256xf32>
      %578 = vector.broadcast %575 : vector<4x1xf32> to vector<4x256xf32>
      %579 = vector.broadcast %577 : vector<1x256xf32> to vector<4x256xf32>
      %580 = arith.mulf %578, %579 : vector<4x256xf32>
      %581 = arith.addf %570, %580 : vector<4x256xf32>
      %582 = vector.extract_strided_slice %574 {offsets = [1, 0], sizes = [1, 256], strides = [1, 1]} : vector<2x256xf32> to vector<1x256xf32>
      %583 = vector.broadcast %576 : vector<4x1xf32> to vector<4x256xf32>
      %584 = vector.broadcast %582 : vector<1x256xf32> to vector<4x256xf32>
      %585 = arith.mulf %583, %584 : vector<4x256xf32>
      %586 = arith.addf %581, %585 : vector<4x256xf32>
      %c239_i32 = arith.constant 239 : i32
      %587 = tpu.dynamic_rotate %77 by %c239_i32 dim 1 : vector<2x256xf32>, i32 -> vector<2x256xf32>
      %c32 = arith.constant 32 : index
      %c0_226 = arith.constant 0 : index
      %588 = vector.load %arg7[%c32, %c0_226] : memref<49x256xf32, #tpu.memory_space<vmem>>, vector<1x256xf32>
      %589 = vector.broadcast %588 : vector<1x256xf32> to vector<2x256xf32>
      %590 = arith.mulf %587, %589 : vector<2x256xf32>
      %c0_227 = arith.constant 0 : index
      %c32_228 = arith.constant 32 : index
      %591 = vector.load %arg3[%c0_227, %c32_228] : memref<8x49xf32, #tpu.memory_space<vmem>>, vector<4x1xf32>
      %c4_229 = arith.constant 4 : index
      %c32_230 = arith.constant 32 : index
      %592 = vector.load %arg3[%c4_229, %c32_230] : memref<8x49xf32, #tpu.memory_space<vmem>>, vector<4x1xf32>
      %593 = vector.extract_strided_slice %590 {offsets = [0, 0], sizes = [1, 256], strides = [1, 1]} : vector<2x256xf32> to vector<1x256xf32>
      %594 = vector.broadcast %591 : vector<4x1xf32> to vector<4x256xf32>
      %595 = vector.broadcast %593 : vector<1x256xf32> to vector<4x256xf32>
      %596 = arith.mulf %594, %595 : vector<4x256xf32>
      %597 = arith.addf %586, %596 : vector<4x256xf32>
      %598 = vector.extract_strided_slice %590 {offsets = [1, 0], sizes = [1, 256], strides = [1, 1]} : vector<2x256xf32> to vector<1x256xf32>
      %599 = vector.broadcast %592 : vector<4x1xf32> to vector<4x256xf32>
      %600 = vector.broadcast %598 : vector<1x256xf32> to vector<4x256xf32>
      %601 = arith.mulf %599, %600 : vector<4x256xf32>
      %602 = arith.addf %597, %601 : vector<4x256xf32>
      %c238_i32 = arith.constant 238 : i32
      %603 = tpu.dynamic_rotate %77 by %c238_i32 dim 1 : vector<2x256xf32>, i32 -> vector<2x256xf32>
      %c33 = arith.constant 33 : index
      %c0_231 = arith.constant 0 : index
      %604 = vector.load %arg7[%c33, %c0_231] : memref<49x256xf32, #tpu.memory_space<vmem>>, vector<1x256xf32>
      %605 = vector.broadcast %604 : vector<1x256xf32> to vector<2x256xf32>
      %606 = arith.mulf %603, %605 : vector<2x256xf32>
      %c0_232 = arith.constant 0 : index
      %c33_233 = arith.constant 33 : index
      %607 = vector.load %arg3[%c0_232, %c33_233] : memref<8x49xf32, #tpu.memory_space<vmem>>, vector<4x1xf32>
      %c4_234 = arith.constant 4 : index
      %c33_235 = arith.constant 33 : index
      %608 = vector.load %arg3[%c4_234, %c33_235] : memref<8x49xf32, #tpu.memory_space<vmem>>, vector<4x1xf32>
      %609 = vector.extract_strided_slice %606 {offsets = [0, 0], sizes = [1, 256], strides = [1, 1]} : vector<2x256xf32> to vector<1x256xf32>
      %610 = vector.broadcast %607 : vector<4x1xf32> to vector<4x256xf32>
      %611 = vector.broadcast %609 : vector<1x256xf32> to vector<4x256xf32>
      %612 = arith.mulf %610, %611 : vector<4x256xf32>
      %613 = arith.addf %602, %612 : vector<4x256xf32>
      %614 = vector.extract_strided_slice %606 {offsets = [1, 0], sizes = [1, 256], strides = [1, 1]} : vector<2x256xf32> to vector<1x256xf32>
      %615 = vector.broadcast %608 : vector<4x1xf32> to vector<4x256xf32>
      %616 = vector.broadcast %614 : vector<1x256xf32> to vector<4x256xf32>
      %617 = arith.mulf %615, %616 : vector<4x256xf32>
      %618 = arith.addf %613, %617 : vector<4x256xf32>
      %c237_i32 = arith.constant 237 : i32
      %619 = tpu.dynamic_rotate %77 by %c237_i32 dim 1 : vector<2x256xf32>, i32 -> vector<2x256xf32>
      %c34 = arith.constant 34 : index
      %c0_236 = arith.constant 0 : index
      %620 = vector.load %arg7[%c34, %c0_236] : memref<49x256xf32, #tpu.memory_space<vmem>>, vector<1x256xf32>
      %621 = vector.broadcast %620 : vector<1x256xf32> to vector<2x256xf32>
      %622 = arith.mulf %619, %621 : vector<2x256xf32>
      %c0_237 = arith.constant 0 : index
      %c34_238 = arith.constant 34 : index
      %623 = vector.load %arg3[%c0_237, %c34_238] : memref<8x49xf32, #tpu.memory_space<vmem>>, vector<4x1xf32>
      %c4_239 = arith.constant 4 : index
      %c34_240 = arith.constant 34 : index
      %624 = vector.load %arg3[%c4_239, %c34_240] : memref<8x49xf32, #tpu.memory_space<vmem>>, vector<4x1xf32>
      %625 = vector.extract_strided_slice %622 {offsets = [0, 0], sizes = [1, 256], strides = [1, 1]} : vector<2x256xf32> to vector<1x256xf32>
      %626 = vector.broadcast %623 : vector<4x1xf32> to vector<4x256xf32>
      %627 = vector.broadcast %625 : vector<1x256xf32> to vector<4x256xf32>
      %628 = arith.mulf %626, %627 : vector<4x256xf32>
      %629 = arith.addf %618, %628 : vector<4x256xf32>
      %630 = vector.extract_strided_slice %622 {offsets = [1, 0], sizes = [1, 256], strides = [1, 1]} : vector<2x256xf32> to vector<1x256xf32>
      %631 = vector.broadcast %624 : vector<4x1xf32> to vector<4x256xf32>
      %632 = vector.broadcast %630 : vector<1x256xf32> to vector<4x256xf32>
      %633 = arith.mulf %631, %632 : vector<4x256xf32>
      %634 = arith.addf %629, %633 : vector<4x256xf32>
      %c227_i32 = arith.constant 227 : i32
      %635 = tpu.dynamic_rotate %77 by %c227_i32 dim 1 : vector<2x256xf32>, i32 -> vector<2x256xf32>
      %c35 = arith.constant 35 : index
      %c0_241 = arith.constant 0 : index
      %636 = vector.load %arg7[%c35, %c0_241] : memref<49x256xf32, #tpu.memory_space<vmem>>, vector<1x256xf32>
      %637 = vector.broadcast %636 : vector<1x256xf32> to vector<2x256xf32>
      %638 = arith.mulf %635, %637 : vector<2x256xf32>
      %c0_242 = arith.constant 0 : index
      %c35_243 = arith.constant 35 : index
      %639 = vector.load %arg3[%c0_242, %c35_243] : memref<8x49xf32, #tpu.memory_space<vmem>>, vector<4x1xf32>
      %c4_244 = arith.constant 4 : index
      %c35_245 = arith.constant 35 : index
      %640 = vector.load %arg3[%c4_244, %c35_245] : memref<8x49xf32, #tpu.memory_space<vmem>>, vector<4x1xf32>
      %641 = vector.extract_strided_slice %638 {offsets = [0, 0], sizes = [1, 256], strides = [1, 1]} : vector<2x256xf32> to vector<1x256xf32>
      %642 = vector.broadcast %639 : vector<4x1xf32> to vector<4x256xf32>
      %643 = vector.broadcast %641 : vector<1x256xf32> to vector<4x256xf32>
      %644 = arith.mulf %642, %643 : vector<4x256xf32>
      %645 = arith.addf %634, %644 : vector<4x256xf32>
      %646 = vector.extract_strided_slice %638 {offsets = [1, 0], sizes = [1, 256], strides = [1, 1]} : vector<2x256xf32> to vector<1x256xf32>
      %647 = vector.broadcast %640 : vector<4x1xf32> to vector<4x256xf32>
      %648 = vector.broadcast %646 : vector<1x256xf32> to vector<4x256xf32>
      %649 = arith.mulf %647, %648 : vector<4x256xf32>
      %650 = arith.addf %645, %649 : vector<4x256xf32>
      %c226_i32 = arith.constant 226 : i32
      %651 = tpu.dynamic_rotate %77 by %c226_i32 dim 1 : vector<2x256xf32>, i32 -> vector<2x256xf32>
      %c36 = arith.constant 36 : index
      %c0_246 = arith.constant 0 : index
      %652 = vector.load %arg7[%c36, %c0_246] : memref<49x256xf32, #tpu.memory_space<vmem>>, vector<1x256xf32>
      %653 = vector.broadcast %652 : vector<1x256xf32> to vector<2x256xf32>
      %654 = arith.mulf %651, %653 : vector<2x256xf32>
      %c0_247 = arith.constant 0 : index
      %c36_248 = arith.constant 36 : index
      %655 = vector.load %arg3[%c0_247, %c36_248] : memref<8x49xf32, #tpu.memory_space<vmem>>, vector<4x1xf32>
      %c4_249 = arith.constant 4 : index
      %c36_250 = arith.constant 36 : index
      %656 = vector.load %arg3[%c4_249, %c36_250] : memref<8x49xf32, #tpu.memory_space<vmem>>, vector<4x1xf32>
      %657 = vector.extract_strided_slice %654 {offsets = [0, 0], sizes = [1, 256], strides = [1, 1]} : vector<2x256xf32> to vector<1x256xf32>
      %658 = vector.broadcast %655 : vector<4x1xf32> to vector<4x256xf32>
      %659 = vector.broadcast %657 : vector<1x256xf32> to vector<4x256xf32>
      %660 = arith.mulf %658, %659 : vector<4x256xf32>
      %661 = arith.addf %650, %660 : vector<4x256xf32>
      %662 = vector.extract_strided_slice %654 {offsets = [1, 0], sizes = [1, 256], strides = [1, 1]} : vector<2x256xf32> to vector<1x256xf32>
      %663 = vector.broadcast %656 : vector<4x1xf32> to vector<4x256xf32>
      %664 = vector.broadcast %662 : vector<1x256xf32> to vector<4x256xf32>
      %665 = arith.mulf %663, %664 : vector<4x256xf32>
      %666 = arith.addf %661, %665 : vector<4x256xf32>
      %c225_i32 = arith.constant 225 : i32
      %667 = tpu.dynamic_rotate %77 by %c225_i32 dim 1 : vector<2x256xf32>, i32 -> vector<2x256xf32>
      %c37 = arith.constant 37 : index
      %c0_251 = arith.constant 0 : index
      %668 = vector.load %arg7[%c37, %c0_251] : memref<49x256xf32, #tpu.memory_space<vmem>>, vector<1x256xf32>
      %669 = vector.broadcast %668 : vector<1x256xf32> to vector<2x256xf32>
      %670 = arith.mulf %667, %669 : vector<2x256xf32>
      %c0_252 = arith.constant 0 : index
      %c37_253 = arith.constant 37 : index
      %671 = vector.load %arg3[%c0_252, %c37_253] : memref<8x49xf32, #tpu.memory_space<vmem>>, vector<4x1xf32>
      %c4_254 = arith.constant 4 : index
      %c37_255 = arith.constant 37 : index
      %672 = vector.load %arg3[%c4_254, %c37_255] : memref<8x49xf32, #tpu.memory_space<vmem>>, vector<4x1xf32>
      %673 = vector.extract_strided_slice %670 {offsets = [0, 0], sizes = [1, 256], strides = [1, 1]} : vector<2x256xf32> to vector<1x256xf32>
      %674 = vector.broadcast %671 : vector<4x1xf32> to vector<4x256xf32>
      %675 = vector.broadcast %673 : vector<1x256xf32> to vector<4x256xf32>
      %676 = arith.mulf %674, %675 : vector<4x256xf32>
      %677 = arith.addf %666, %676 : vector<4x256xf32>
      %678 = vector.extract_strided_slice %670 {offsets = [1, 0], sizes = [1, 256], strides = [1, 1]} : vector<2x256xf32> to vector<1x256xf32>
      %679 = vector.broadcast %672 : vector<4x1xf32> to vector<4x256xf32>
      %680 = vector.broadcast %678 : vector<1x256xf32> to vector<4x256xf32>
      %681 = arith.mulf %679, %680 : vector<4x256xf32>
      %682 = arith.addf %677, %681 : vector<4x256xf32>
      %c224_i32 = arith.constant 224 : i32
      %683 = tpu.dynamic_rotate %77 by %c224_i32 dim 1 : vector<2x256xf32>, i32 -> vector<2x256xf32>
      %c38 = arith.constant 38 : index
      %c0_256 = arith.constant 0 : index
      %684 = vector.load %arg7[%c38, %c0_256] : memref<49x256xf32, #tpu.memory_space<vmem>>, vector<1x256xf32>
      %685 = vector.broadcast %684 : vector<1x256xf32> to vector<2x256xf32>
      %686 = arith.mulf %683, %685 : vector<2x256xf32>
      %c0_257 = arith.constant 0 : index
      %c38_258 = arith.constant 38 : index
      %687 = vector.load %arg3[%c0_257, %c38_258] : memref<8x49xf32, #tpu.memory_space<vmem>>, vector<4x1xf32>
      %c4_259 = arith.constant 4 : index
      %c38_260 = arith.constant 38 : index
      %688 = vector.load %arg3[%c4_259, %c38_260] : memref<8x49xf32, #tpu.memory_space<vmem>>, vector<4x1xf32>
      %689 = vector.extract_strided_slice %686 {offsets = [0, 0], sizes = [1, 256], strides = [1, 1]} : vector<2x256xf32> to vector<1x256xf32>
      %690 = vector.broadcast %687 : vector<4x1xf32> to vector<4x256xf32>
      %691 = vector.broadcast %689 : vector<1x256xf32> to vector<4x256xf32>
      %692 = arith.mulf %690, %691 : vector<4x256xf32>
      %693 = arith.addf %682, %692 : vector<4x256xf32>
      %694 = vector.extract_strided_slice %686 {offsets = [1, 0], sizes = [1, 256], strides = [1, 1]} : vector<2x256xf32> to vector<1x256xf32>
      %695 = vector.broadcast %688 : vector<4x1xf32> to vector<4x256xf32>
      %696 = vector.broadcast %694 : vector<1x256xf32> to vector<4x256xf32>
      %697 = arith.mulf %695, %696 : vector<4x256xf32>
      %698 = arith.addf %693, %697 : vector<4x256xf32>
      %c223_i32 = arith.constant 223 : i32
      %699 = tpu.dynamic_rotate %77 by %c223_i32 dim 1 : vector<2x256xf32>, i32 -> vector<2x256xf32>
      %c39 = arith.constant 39 : index
      %c0_261 = arith.constant 0 : index
      %700 = vector.load %arg7[%c39, %c0_261] : memref<49x256xf32, #tpu.memory_space<vmem>>, vector<1x256xf32>
      %701 = vector.broadcast %700 : vector<1x256xf32> to vector<2x256xf32>
      %702 = arith.mulf %699, %701 : vector<2x256xf32>
      %c0_262 = arith.constant 0 : index
      %c39_263 = arith.constant 39 : index
      %703 = vector.load %arg3[%c0_262, %c39_263] : memref<8x49xf32, #tpu.memory_space<vmem>>, vector<4x1xf32>
      %c4_264 = arith.constant 4 : index
      %c39_265 = arith.constant 39 : index
      %704 = vector.load %arg3[%c4_264, %c39_265] : memref<8x49xf32, #tpu.memory_space<vmem>>, vector<4x1xf32>
      %705 = vector.extract_strided_slice %702 {offsets = [0, 0], sizes = [1, 256], strides = [1, 1]} : vector<2x256xf32> to vector<1x256xf32>
      %706 = vector.broadcast %703 : vector<4x1xf32> to vector<4x256xf32>
      %707 = vector.broadcast %705 : vector<1x256xf32> to vector<4x256xf32>
      %708 = arith.mulf %706, %707 : vector<4x256xf32>
      %709 = arith.addf %698, %708 : vector<4x256xf32>
      %710 = vector.extract_strided_slice %702 {offsets = [1, 0], sizes = [1, 256], strides = [1, 1]} : vector<2x256xf32> to vector<1x256xf32>
      %711 = vector.broadcast %704 : vector<4x1xf32> to vector<4x256xf32>
      %712 = vector.broadcast %710 : vector<1x256xf32> to vector<4x256xf32>
      %713 = arith.mulf %711, %712 : vector<4x256xf32>
      %714 = arith.addf %709, %713 : vector<4x256xf32>
      %c222_i32 = arith.constant 222 : i32
      %715 = tpu.dynamic_rotate %77 by %c222_i32 dim 1 : vector<2x256xf32>, i32 -> vector<2x256xf32>
      %c40 = arith.constant 40 : index
      %c0_266 = arith.constant 0 : index
      %716 = vector.load %arg7[%c40, %c0_266] : memref<49x256xf32, #tpu.memory_space<vmem>>, vector<1x256xf32>
      %717 = vector.broadcast %716 : vector<1x256xf32> to vector<2x256xf32>
      %718 = arith.mulf %715, %717 : vector<2x256xf32>
      %c0_267 = arith.constant 0 : index
      %c40_268 = arith.constant 40 : index
      %719 = vector.load %arg3[%c0_267, %c40_268] : memref<8x49xf32, #tpu.memory_space<vmem>>, vector<4x1xf32>
      %c4_269 = arith.constant 4 : index
      %c40_270 = arith.constant 40 : index
      %720 = vector.load %arg3[%c4_269, %c40_270] : memref<8x49xf32, #tpu.memory_space<vmem>>, vector<4x1xf32>
      %721 = vector.extract_strided_slice %718 {offsets = [0, 0], sizes = [1, 256], strides = [1, 1]} : vector<2x256xf32> to vector<1x256xf32>
      %722 = vector.broadcast %719 : vector<4x1xf32> to vector<4x256xf32>
      %723 = vector.broadcast %721 : vector<1x256xf32> to vector<4x256xf32>
      %724 = arith.mulf %722, %723 : vector<4x256xf32>
      %725 = arith.addf %714, %724 : vector<4x256xf32>
      %726 = vector.extract_strided_slice %718 {offsets = [1, 0], sizes = [1, 256], strides = [1, 1]} : vector<2x256xf32> to vector<1x256xf32>
      %727 = vector.broadcast %720 : vector<4x1xf32> to vector<4x256xf32>
      %728 = vector.broadcast %726 : vector<1x256xf32> to vector<4x256xf32>
      %729 = arith.mulf %727, %728 : vector<4x256xf32>
      %730 = arith.addf %725, %729 : vector<4x256xf32>
      %c221_i32 = arith.constant 221 : i32
      %731 = tpu.dynamic_rotate %77 by %c221_i32 dim 1 : vector<2x256xf32>, i32 -> vector<2x256xf32>
      %c41 = arith.constant 41 : index
      %c0_271 = arith.constant 0 : index
      %732 = vector.load %arg7[%c41, %c0_271] : memref<49x256xf32, #tpu.memory_space<vmem>>, vector<1x256xf32>
      %733 = vector.broadcast %732 : vector<1x256xf32> to vector<2x256xf32>
      %734 = arith.mulf %731, %733 : vector<2x256xf32>
      %c0_272 = arith.constant 0 : index
      %c41_273 = arith.constant 41 : index
      %735 = vector.load %arg3[%c0_272, %c41_273] : memref<8x49xf32, #tpu.memory_space<vmem>>, vector<4x1xf32>
      %c4_274 = arith.constant 4 : index
      %c41_275 = arith.constant 41 : index
      %736 = vector.load %arg3[%c4_274, %c41_275] : memref<8x49xf32, #tpu.memory_space<vmem>>, vector<4x1xf32>
      %737 = vector.extract_strided_slice %734 {offsets = [0, 0], sizes = [1, 256], strides = [1, 1]} : vector<2x256xf32> to vector<1x256xf32>
      %738 = vector.broadcast %735 : vector<4x1xf32> to vector<4x256xf32>
      %739 = vector.broadcast %737 : vector<1x256xf32> to vector<4x256xf32>
      %740 = arith.mulf %738, %739 : vector<4x256xf32>
      %741 = arith.addf %730, %740 : vector<4x256xf32>
      %742 = vector.extract_strided_slice %734 {offsets = [1, 0], sizes = [1, 256], strides = [1, 1]} : vector<2x256xf32> to vector<1x256xf32>
      %743 = vector.broadcast %736 : vector<4x1xf32> to vector<4x256xf32>
      %744 = vector.broadcast %742 : vector<1x256xf32> to vector<4x256xf32>
      %745 = arith.mulf %743, %744 : vector<4x256xf32>
      %746 = arith.addf %741, %745 : vector<4x256xf32>
      %c211_i32 = arith.constant 211 : i32
      %747 = tpu.dynamic_rotate %77 by %c211_i32 dim 1 : vector<2x256xf32>, i32 -> vector<2x256xf32>
      %c42 = arith.constant 42 : index
      %c0_276 = arith.constant 0 : index
      %748 = vector.load %arg7[%c42, %c0_276] : memref<49x256xf32, #tpu.memory_space<vmem>>, vector<1x256xf32>
      %749 = vector.broadcast %748 : vector<1x256xf32> to vector<2x256xf32>
      %750 = arith.mulf %747, %749 : vector<2x256xf32>
      %c0_277 = arith.constant 0 : index
      %c42_278 = arith.constant 42 : index
      %751 = vector.load %arg3[%c0_277, %c42_278] : memref<8x49xf32, #tpu.memory_space<vmem>>, vector<4x1xf32>
      %c4_279 = arith.constant 4 : index
      %c42_280 = arith.constant 42 : index
      %752 = vector.load %arg3[%c4_279, %c42_280] : memref<8x49xf32, #tpu.memory_space<vmem>>, vector<4x1xf32>
      %753 = vector.extract_strided_slice %750 {offsets = [0, 0], sizes = [1, 256], strides = [1, 1]} : vector<2x256xf32> to vector<1x256xf32>
      %754 = vector.broadcast %751 : vector<4x1xf32> to vector<4x256xf32>
      %755 = vector.broadcast %753 : vector<1x256xf32> to vector<4x256xf32>
      %756 = arith.mulf %754, %755 : vector<4x256xf32>
      %757 = arith.addf %746, %756 : vector<4x256xf32>
      %758 = vector.extract_strided_slice %750 {offsets = [1, 0], sizes = [1, 256], strides = [1, 1]} : vector<2x256xf32> to vector<1x256xf32>
      %759 = vector.broadcast %752 : vector<4x1xf32> to vector<4x256xf32>
      %760 = vector.broadcast %758 : vector<1x256xf32> to vector<4x256xf32>
      %761 = arith.mulf %759, %760 : vector<4x256xf32>
      %762 = arith.addf %757, %761 : vector<4x256xf32>
      %c210_i32 = arith.constant 210 : i32
      %763 = tpu.dynamic_rotate %77 by %c210_i32 dim 1 : vector<2x256xf32>, i32 -> vector<2x256xf32>
      %c43 = arith.constant 43 : index
      %c0_281 = arith.constant 0 : index
      %764 = vector.load %arg7[%c43, %c0_281] : memref<49x256xf32, #tpu.memory_space<vmem>>, vector<1x256xf32>
      %765 = vector.broadcast %764 : vector<1x256xf32> to vector<2x256xf32>
      %766 = arith.mulf %763, %765 : vector<2x256xf32>
      %c0_282 = arith.constant 0 : index
      %c43_283 = arith.constant 43 : index
      %767 = vector.load %arg3[%c0_282, %c43_283] : memref<8x49xf32, #tpu.memory_space<vmem>>, vector<4x1xf32>
      %c4_284 = arith.constant 4 : index
      %c43_285 = arith.constant 43 : index
      %768 = vector.load %arg3[%c4_284, %c43_285] : memref<8x49xf32, #tpu.memory_space<vmem>>, vector<4x1xf32>
      %769 = vector.extract_strided_slice %766 {offsets = [0, 0], sizes = [1, 256], strides = [1, 1]} : vector<2x256xf32> to vector<1x256xf32>
      %770 = vector.broadcast %767 : vector<4x1xf32> to vector<4x256xf32>
      %771 = vector.broadcast %769 : vector<1x256xf32> to vector<4x256xf32>
      %772 = arith.mulf %770, %771 : vector<4x256xf32>
      %773 = arith.addf %762, %772 : vector<4x256xf32>
      %774 = vector.extract_strided_slice %766 {offsets = [1, 0], sizes = [1, 256], strides = [1, 1]} : vector<2x256xf32> to vector<1x256xf32>
      %775 = vector.broadcast %768 : vector<4x1xf32> to vector<4x256xf32>
      %776 = vector.broadcast %774 : vector<1x256xf32> to vector<4x256xf32>
      %777 = arith.mulf %775, %776 : vector<4x256xf32>
      %778 = arith.addf %773, %777 : vector<4x256xf32>
      %c209_i32 = arith.constant 209 : i32
      %779 = tpu.dynamic_rotate %77 by %c209_i32 dim 1 : vector<2x256xf32>, i32 -> vector<2x256xf32>
      %c44 = arith.constant 44 : index
      %c0_286 = arith.constant 0 : index
      %780 = vector.load %arg7[%c44, %c0_286] : memref<49x256xf32, #tpu.memory_space<vmem>>, vector<1x256xf32>
      %781 = vector.broadcast %780 : vector<1x256xf32> to vector<2x256xf32>
      %782 = arith.mulf %779, %781 : vector<2x256xf32>
      %c0_287 = arith.constant 0 : index
      %c44_288 = arith.constant 44 : index
      %783 = vector.load %arg3[%c0_287, %c44_288] : memref<8x49xf32, #tpu.memory_space<vmem>>, vector<4x1xf32>
      %c4_289 = arith.constant 4 : index
      %c44_290 = arith.constant 44 : index
      %784 = vector.load %arg3[%c4_289, %c44_290] : memref<8x49xf32, #tpu.memory_space<vmem>>, vector<4x1xf32>
      %785 = vector.extract_strided_slice %782 {offsets = [0, 0], sizes = [1, 256], strides = [1, 1]} : vector<2x256xf32> to vector<1x256xf32>
      %786 = vector.broadcast %783 : vector<4x1xf32> to vector<4x256xf32>
      %787 = vector.broadcast %785 : vector<1x256xf32> to vector<4x256xf32>
      %788 = arith.mulf %786, %787 : vector<4x256xf32>
      %789 = arith.addf %778, %788 : vector<4x256xf32>
      %790 = vector.extract_strided_slice %782 {offsets = [1, 0], sizes = [1, 256], strides = [1, 1]} : vector<2x256xf32> to vector<1x256xf32>
      %791 = vector.broadcast %784 : vector<4x1xf32> to vector<4x256xf32>
      %792 = vector.broadcast %790 : vector<1x256xf32> to vector<4x256xf32>
      %793 = arith.mulf %791, %792 : vector<4x256xf32>
      %794 = arith.addf %789, %793 : vector<4x256xf32>
      %c208_i32 = arith.constant 208 : i32
      %795 = tpu.dynamic_rotate %77 by %c208_i32 dim 1 : vector<2x256xf32>, i32 -> vector<2x256xf32>
      %c45 = arith.constant 45 : index
      %c0_291 = arith.constant 0 : index
      %796 = vector.load %arg7[%c45, %c0_291] : memref<49x256xf32, #tpu.memory_space<vmem>>, vector<1x256xf32>
      %797 = vector.broadcast %796 : vector<1x256xf32> to vector<2x256xf32>
      %798 = arith.mulf %795, %797 : vector<2x256xf32>
      %c0_292 = arith.constant 0 : index
      %c45_293 = arith.constant 45 : index
      %799 = vector.load %arg3[%c0_292, %c45_293] : memref<8x49xf32, #tpu.memory_space<vmem>>, vector<4x1xf32>
      %c4_294 = arith.constant 4 : index
      %c45_295 = arith.constant 45 : index
      %800 = vector.load %arg3[%c4_294, %c45_295] : memref<8x49xf32, #tpu.memory_space<vmem>>, vector<4x1xf32>
      %801 = vector.extract_strided_slice %798 {offsets = [0, 0], sizes = [1, 256], strides = [1, 1]} : vector<2x256xf32> to vector<1x256xf32>
      %802 = vector.broadcast %799 : vector<4x1xf32> to vector<4x256xf32>
      %803 = vector.broadcast %801 : vector<1x256xf32> to vector<4x256xf32>
      %804 = arith.mulf %802, %803 : vector<4x256xf32>
      %805 = arith.addf %794, %804 : vector<4x256xf32>
      %806 = vector.extract_strided_slice %798 {offsets = [1, 0], sizes = [1, 256], strides = [1, 1]} : vector<2x256xf32> to vector<1x256xf32>
      %807 = vector.broadcast %800 : vector<4x1xf32> to vector<4x256xf32>
      %808 = vector.broadcast %806 : vector<1x256xf32> to vector<4x256xf32>
      %809 = arith.mulf %807, %808 : vector<4x256xf32>
      %810 = arith.addf %805, %809 : vector<4x256xf32>
      %c207_i32 = arith.constant 207 : i32
      %811 = tpu.dynamic_rotate %77 by %c207_i32 dim 1 : vector<2x256xf32>, i32 -> vector<2x256xf32>
      %c46 = arith.constant 46 : index
      %c0_296 = arith.constant 0 : index
      %812 = vector.load %arg7[%c46, %c0_296] : memref<49x256xf32, #tpu.memory_space<vmem>>, vector<1x256xf32>
      %813 = vector.broadcast %812 : vector<1x256xf32> to vector<2x256xf32>
      %814 = arith.mulf %811, %813 : vector<2x256xf32>
      %c0_297 = arith.constant 0 : index
      %c46_298 = arith.constant 46 : index
      %815 = vector.load %arg3[%c0_297, %c46_298] : memref<8x49xf32, #tpu.memory_space<vmem>>, vector<4x1xf32>
      %c4_299 = arith.constant 4 : index
      %c46_300 = arith.constant 46 : index
      %816 = vector.load %arg3[%c4_299, %c46_300] : memref<8x49xf32, #tpu.memory_space<vmem>>, vector<4x1xf32>
      %817 = vector.extract_strided_slice %814 {offsets = [0, 0], sizes = [1, 256], strides = [1, 1]} : vector<2x256xf32> to vector<1x256xf32>
      %818 = vector.broadcast %815 : vector<4x1xf32> to vector<4x256xf32>
      %819 = vector.broadcast %817 : vector<1x256xf32> to vector<4x256xf32>
      %820 = arith.mulf %818, %819 : vector<4x256xf32>
      %821 = arith.addf %810, %820 : vector<4x256xf32>
      %822 = vector.extract_strided_slice %814 {offsets = [1, 0], sizes = [1, 256], strides = [1, 1]} : vector<2x256xf32> to vector<1x256xf32>
      %823 = vector.broadcast %816 : vector<4x1xf32> to vector<4x256xf32>
      %824 = vector.broadcast %822 : vector<1x256xf32> to vector<4x256xf32>
      %825 = arith.mulf %823, %824 : vector<4x256xf32>
      %826 = arith.addf %821, %825 : vector<4x256xf32>
      %c206_i32 = arith.constant 206 : i32
      %827 = tpu.dynamic_rotate %77 by %c206_i32 dim 1 : vector<2x256xf32>, i32 -> vector<2x256xf32>
      %c47 = arith.constant 47 : index
      %c0_301 = arith.constant 0 : index
      %828 = vector.load %arg7[%c47, %c0_301] : memref<49x256xf32, #tpu.memory_space<vmem>>, vector<1x256xf32>
      %829 = vector.broadcast %828 : vector<1x256xf32> to vector<2x256xf32>
      %830 = arith.mulf %827, %829 : vector<2x256xf32>
      %c0_302 = arith.constant 0 : index
      %c47_303 = arith.constant 47 : index
      %831 = vector.load %arg3[%c0_302, %c47_303] : memref<8x49xf32, #tpu.memory_space<vmem>>, vector<4x1xf32>
      %c4_304 = arith.constant 4 : index
      %c47_305 = arith.constant 47 : index
      %832 = vector.load %arg3[%c4_304, %c47_305] : memref<8x49xf32, #tpu.memory_space<vmem>>, vector<4x1xf32>
      %833 = vector.extract_strided_slice %830 {offsets = [0, 0], sizes = [1, 256], strides = [1, 1]} : vector<2x256xf32> to vector<1x256xf32>
      %834 = vector.broadcast %831 : vector<4x1xf32> to vector<4x256xf32>
      %835 = vector.broadcast %833 : vector<1x256xf32> to vector<4x256xf32>
      %836 = arith.mulf %834, %835 : vector<4x256xf32>
      %837 = arith.addf %826, %836 : vector<4x256xf32>
      %838 = vector.extract_strided_slice %830 {offsets = [1, 0], sizes = [1, 256], strides = [1, 1]} : vector<2x256xf32> to vector<1x256xf32>
      %839 = vector.broadcast %832 : vector<4x1xf32> to vector<4x256xf32>
      %840 = vector.broadcast %838 : vector<1x256xf32> to vector<4x256xf32>
      %841 = arith.mulf %839, %840 : vector<4x256xf32>
      %842 = arith.addf %837, %841 : vector<4x256xf32>
      %c205_i32 = arith.constant 205 : i32
      %843 = tpu.dynamic_rotate %77 by %c205_i32 dim 1 : vector<2x256xf32>, i32 -> vector<2x256xf32>
      %c48 = arith.constant 48 : index
      %c0_306 = arith.constant 0 : index
      %844 = vector.load %arg7[%c48, %c0_306] : memref<49x256xf32, #tpu.memory_space<vmem>>, vector<1x256xf32>
      %845 = vector.broadcast %844 : vector<1x256xf32> to vector<2x256xf32>
      %846 = arith.mulf %843, %845 : vector<2x256xf32>
      %c0_307 = arith.constant 0 : index
      %c48_308 = arith.constant 48 : index
      %847 = vector.load %arg3[%c0_307, %c48_308] : memref<8x49xf32, #tpu.memory_space<vmem>>, vector<4x1xf32>
      %c4_309 = arith.constant 4 : index
      %c48_310 = arith.constant 48 : index
      %848 = vector.load %arg3[%c4_309, %c48_310] : memref<8x49xf32, #tpu.memory_space<vmem>>, vector<4x1xf32>
      %849 = vector.extract_strided_slice %846 {offsets = [0, 0], sizes = [1, 256], strides = [1, 1]} : vector<2x256xf32> to vector<1x256xf32>
      %850 = vector.broadcast %847 : vector<4x1xf32> to vector<4x256xf32>
      %851 = vector.broadcast %849 : vector<1x256xf32> to vector<4x256xf32>
      %852 = arith.mulf %850, %851 : vector<4x256xf32>
      %853 = arith.addf %842, %852 : vector<4x256xf32>
      %854 = vector.extract_strided_slice %846 {offsets = [1, 0], sizes = [1, 256], strides = [1, 1]} : vector<2x256xf32> to vector<1x256xf32>
      %855 = vector.broadcast %848 : vector<4x1xf32> to vector<4x256xf32>
      %856 = vector.broadcast %854 : vector<1x256xf32> to vector<4x256xf32>
      %857 = arith.mulf %855, %856 : vector<4x256xf32>
      %858 = arith.addf %853, %857 : vector<4x256xf32>
      %c0_311 = arith.constant 0 : index
      %c0_312 = arith.constant 0 : index
      %859 = vector.load %arg4[%c0_311, %c0_312] : memref<4x1xf32, #tpu.memory_space<vmem>>, vector<4x1xf32>
      %860 = vector.broadcast %859 : vector<4x1xf32> to vector<4x256xf32>
      %861 = arith.addf %858, %860 : vector<4x256xf32>
      %862 = arith.negf %861 : vector<4x256xf32>
      %863 = math.exp %862 : vector<4x256xf32>
      %cst_313 = arith.constant 1.000000e+00 : f32
      %864 = vector.broadcast %cst_313 : f32 to vector<4x256xf32>
      %865 = arith.addf %864, %863 : vector<4x256xf32>
      %866 = arith.divf %864, %865 : vector<4x256xf32>
      %c0_314 = arith.constant 0 : index
      %c0_315 = arith.constant 0 : index
      %c0_316 = arith.constant 0 : index
      %867 = vector.load %arg9[%c0_314, %c0_315, %c0_316] : memref<1x4x256xf32, #tpu.memory_space<vmem>>, vector<1x4x256xf32>
      %868 = vector.shape_cast %867 : vector<1x4x256xf32> to vector<4x256xf32>
      %869 = vector.shape_cast %866 : vector<4x256xf32> to vector<1x4x256xf32>
      tpu.vector_store %arg9[%c0_314, %c0_315, %c0_316], %869 {strides = array<i32>} : memref<1x4x256xf32, #tpu.memory_space<vmem>>, vector<1x4x256xf32>,
      %870 = arith.mulf %72, %866 : vector<4x256xf32>
      %cst_317 = arith.constant dense<0.000000e+00> : vector<4xf32>
      %871 = vector.multi_reduction <add>, %870, %cst_317 [1] : vector<4x256xf32> to vector<4xf32>
      %872 = vector.shape_cast %871 : vector<4xf32> to vector<4x1xf32>
      %cst_318 = arith.constant 3.906250e-03 : f32
      %873 = vector.broadcast %cst_318 : f32 to vector<4x1xf32>
      %874 = arith.mulf %872, %873 : vector<4x1xf32>
      %c0_319 = arith.constant 0 : index
      %c0_320 = arith.constant 0 : index
      %875 = vector.load %arg6[%c0_319, %c0_320] : memref<4x1xf32, #tpu.memory_space<vmem>>, vector<4x1xf32>
      %876 = arith.addf %874, %875 : vector<4x1xf32>
      %c0_321 = arith.constant 0 : index
      %c0_322 = arith.constant 0 : index
      %c0_323 = arith.constant 0 : index
      %877 = vector.load %arg8[%c0_321, %c0_322, %c0_323] : memref<1x4x1xf32, #tpu.memory_space<vmem>>, vector<1x4x1xf32>
      %878 = vector.shape_cast %877 : vector<1x4x1xf32> to vector<4x1xf32>
      %879 = vector.shape_cast %876 : vector<4x1xf32> to vector<1x4x1xf32>
      tpu.vector_store %arg8[%c0_321, %c0_322, %c0_323], %879 {strides = array<i32>} : memref<1x4x1xf32, #tpu.memory_space<vmem>>, vector<1x4x1xf32>,
    } else {
    }
    return
  }
  func.func @transform_0(%arg0: i32, %arg1: i32) -> (i32, i32, i32) {
    %c0_i32 = arith.constant 0 : i32
    %c0_i32_0 = arith.constant 0 : i32
    return %arg0, %arg1, %c0_i32 : i32, i32, i32
  }
  func.func @transform_1(%arg0: i32, %arg1: i32) -> (i32, i32) {
    %c0_i32 = arith.constant 0 : i32
    %c0_i32_0 = arith.constant 0 : i32
    %c0_i32_1 = arith.constant 0 : i32
    return %c0_i32, %c0_i32_0 : i32, i32
  }
  func.func @transform_2(%arg0: i32, %arg1: i32) -> (i32, i32) {
    %c0_i32 = arith.constant 0 : i32
    %c0_i32_0 = arith.constant 0 : i32
    %c0_i32_1 = arith.constant 0 : i32
    return %c0_i32, %c0_i32_0 : i32, i32
  }
  func.func @transform_3(%arg0: i32, %arg1: i32) -> (i32, i32) {
    %c0_i32 = arith.constant 0 : i32
    %c0_i32_0 = arith.constant 0 : i32
    return %c0_i32, %arg1 : i32, i32
  }
  func.func @transform_4(%arg0: i32, %arg1: i32) -> (i32, i32) {
    %c0_i32 = arith.constant 0 : i32
    %c0_i32_0 = arith.constant 0 : i32
    %c0_i32_1 = arith.constant 0 : i32
    return %c0_i32, %c0_i32_0 : i32, i32
  }
  func.func @transform_5(%arg0: i32, %arg1: i32) -> (i32, i32) {
    %c0_i32 = arith.constant 0 : i32
    %c0_i32_0 = arith.constant 0 : i32
    %c0_i32_1 = arith.constant 0 : i32
    return %c0_i32, %c0_i32_0 : i32, i32
  }
  func.func @transform_6(%arg0: i32, %arg1: i32) -> (i32, i32, i32) {
    %c0_i32 = arith.constant 0 : i32
    %c0_i32_0 = arith.constant 0 : i32
    %c0_i32_1 = arith.constant 0 : i32
    return %arg0, %c0_i32, %c0_i32_0 : i32, i32, i32
  }
  func.func @transform_7(%arg0: i32, %arg1: i32) -> (i32, i32, i32) {
    %c0_i32 = arith.constant 0 : i32
    %c0_i32_0 = arith.constant 0 : i32
    %c0_i32_1 = arith.constant 0 : i32
    return %arg0, %c0_i32, %c0_i32_0 : i32, i32, i32
  }
}

</mosaic_0001>

<bundles_post_ra>
// kernel: tpu_custom_call.1
= control target key start
LH: loop header
LB: loop body
LE: loop exit
PB: predicated region body
PF: predicated region fallthrough
CT: control target
= control target key end

     0   :  { %s8174_s0 = inlined_call_operand.hbm [shape: bf16[2,2048,256], index: 0, kind: input, shape index: {}]   ;;  %s8175_s1 = inlined_call_operand.hbm [shape: f32[8,49], index: 1, kind: input, shape index: {}]   ;;  %s8176_s2 = inlined_call_operand.vmem [shape: f32[4,1], index: 2, kind: input, shape index: {}]   ;;  %s8177_s3 = inlined_call_operand.hbm [shape: bf16[8,2048], index: 3, kind: input, shape index: {}]   ;;  %s8178_s4 = inlined_call_operand.vmem [shape: f32[4,1], index: 4, kind: input, shape index: {}]   ;;  %s8179_s5 = inlined_call_operand.hbm [shape: f32[49,256], index: 5, kind: input, shape index: {}]   ;;  %s8180_s6 = inlined_call_operand.vmem [shape: f32[2,4,1], index: 6, kind: output, shape index: {0}]   ;;  %s8181_s7 = inlined_call_operand.hbm [shape: f32[2,4,256], index: 7, kind: output, shape index: {1}]  }
   0x1   :  { %8242 = sst [smem:[#allocation43_spill]] %s8175_s1 }
   0x2   :  { %8243 = sst [smem:[#allocation44_spill]] %s8176_s2 }
   0x3   :  { %8244 = sst [smem:[#allocation45_spill]] %s8178_s4 }
   0x4   :  { %8245 = sst [smem:[#allocation46_spill]] %s8180_s6 }
   0x5   :  { %8246 = sst [smem:[#allocation47_spill]] %s8181_s7 }
   0x6   :  { %13 = vsyncpa [#allocation5], 0 }
   0x7   :  { %15 = vsyncpa [#allocation5 + $0x1], 0 }
   0x8   :  { %16 = vsyncpa [#allocation8], 0 }
   0x9   :  { %17 = vsyncpa [#allocation6], 0 }
   0xa   :  { %19 = vsyncpa [#allocation6 + $0x1], 0  ;;  %s5675_s24 = smov 0   ;;  %s5677_s25 = smov 0  }
   0xb   :  { %s5679_s26 = smov 0   ;;  %s5681_s27 = smov 0  }
   0xc   :  { %s5683_s28 = smov 0   ;;  %s5685_s29 = smov 0  }
   0xd   :  { %s5687_s30 = smov 0   ;;  %s5689_s8 = smov 0  }
   0xe   :  { %s5691_s9 = smov 0   ;;  %s5693_s10 = smov 0  }
   0xf   :  { %s5695_s11 = smov 0   ;;  %s5697_s12 = smov 0  }
  0x10   :  { %s5699_s13 = smov 0   ;;  %s5701_s14 = smov 0  }
  0x11 LB: > { %8247 = sst [smem:[#allocation17_spill]] %s5471_s24  ;;  %s5742_s15 = sadd.s32 4294967295, %s5523_s14   ;;  %s5523_s14 = sphi %s5701_s14, %s25_s14   ;;  %s5519_s13 = sphi %s5699_s13, %s8388_s13   ;;  %s5515_s12 = sphi %s5697_s12, %s8387_s12   ;;  %s5511_s11 = sphi %s5695_s11, %s8386_s11   ;;  %s5507_s10 = sphi %s5693_s10, %s8385_s10   ;;  %s5503_s9 = sphi %s5691_s9, %s8384_s9   ;;  %s5499_s8 = sphi %s5689_s8, %s8383_s8   ;;  %s5495_s30 = sphi %s5687_s30, %s8375_s30   ;;  %s5491_s29 = sphi %s5685_s29, %s8382_s29   ;;  %s5487_s28 = sphi %s5683_s28, %s8381_s28   ;;  %s5483_s27 = sphi %s5681_s27, %s8380_s27   ;;  %s5479_s26 = sphi %s5679_s26, %s8379_s26   ;;  %s5475_s25 = sphi %s5677_s25, %s8378_s25   ;;  %s5471_s24 = sphi %s5675_s24, %s8374_s24  }
  0x12   : > { %8248 = sst [smem:[#allocation18_spill]] %s5475_s25  ;;  %s4605_s16 = sadd.s32 4294967294, %s5523_s14  }
  0x13   : > { %8249 = sst [smem:[#allocation19_spill]] %s5499_s8  ;;  %p59_p0 = scmp.ne.s32.totalorder %s5499_s8, %s5495_s30 }
  0x14   : > { %8250 = sst [smem:[#allocation20_spill]] %s5507_s10  ;;  %p8198_p1 = scmp.eq.s32.totalorder %s5742_s15, 0 }
  0x15   : > { %8251 = sst [smem:[#allocation21_spill]] %s5511_s11  ;;  %p127_p2 = scmp.ne.s32.totalorder %s5487_s28, %s5483_s27 }
  0x16   : > { %p5751_p3 = por %p8198_p1, %p59_p0  ;;  %p218_p4 = scmp.ne.s32.totalorder %s5479_s26, %s5475_s25 }
  0x17   : > { %p5759_p5 = por %p127_p2, %p8198_p1  ;;  %p219_p6 = scmp.eq.s32.totalorder %s5742_s15, 3 }
  0x18   : > { %s8252_s18 = scalar_select %p5751_p3, 1, 0 }
  0x19   : > { %s8254_s19 = scalar_select %p5759_p5, 1, 0 }
  0x1a   : > { %8253 = sst [smem:[#allocation22_spill]] %s8252_s18  ;;  %p224_p7 = scmp.ne.s32.totalorder %s5475_s25, %s5471_s24 }
  0x1b   : > { %8255 = sst [smem:[#allocation23_spill]] %s8254_s19  ;;  %p225_p8 = scmp.eq.s32.totalorder %s4605_s16, 3 }
  0x1c   : > { %p5766_p9 = por %p219_p6, %p218_p4  ;;  %p4606_p10 = scmp.ge.s32.totalorder %s5523_s14, 1 }
  0x1d   : > { %p5771_p11 = por %p225_p8, %p224_p7  ;;  %p232_p12 = scmp.lt.s32.totalorder %s5523_s14, 5 }
  0x1e   : > { %s8256_s20 = scalar_select %p5766_p9, 1, 0 }
  0x1f   : > { %s8258_s21 = scalar_select %p5771_p11, 1, 0 }
  0x20   : > { %8257 = sst [smem:[#allocation24_spill]] %s8256_s20  ;;  %p5776_p13 = pnand %p4606_p10, %p232_p12 }
  0x21   : > { %8259 = sst [smem:[#allocation25_spill]] %s8258_s21  ;;  %s5525_s23 = smov [#allocation7]  }
  0x22   : > { %s245_s27 = sshll.u32 %s5525_s23, 4  ;;  %p4779_p0 = pneg %p5776_p13  ;;  %s246_s27 = int_to_ptr.vmem [resolvable:$true] %s245_s27 }
  0x23   : > { %s34_s16 = sadd.s32 1, %s5515_s12  ;;  %s5270_s17 = scalar_lea.vmem %s246_s27, 128 }
  0x24   : > { %p5784_p2 = pnand %p4779_p0, %p8198_p1  ;;  %p5271_p6 = scmp.ne.s32.totalorder %s246_s27, %s5270_s17 }
  0x25   : > { %p5278_p10 = scmp.lt.s32.totalorder %s246_s27, %s246_s27  ;;  %p5279_p12 = scmp.lt.s32.totalorder %s5270_s17, %s5270_s17 }
  0x26   : > { %p5261_p4 = pneg %p5784_p2 }
  0x27   : > { %p5280_p11 = por %p5279_p12, %p5278_p10 }
  0x28   : > { %p5273_p7 = pnand %p5271_p6, %p5261_p4 }
  0x2a   : > { %p5274_p8 = pneg %p5273_p7 }
  0x2c   : > { %p5281_p9 = pnand %p5280_p11, %p5274_p8 }
  0x2e   : > { %5284 = shalt.err (!%p5281_p9)
}
  0x2f   : > { %s8262_s1 = sld [smem:[#allocation43_spill]]  ;;  %p35_p11 = scmp.ge.s32.totalorder %s34_s16, 2 }
  0x30   : > { %s37_s17 = sadd.s32 1, %s5519_s13  ;;  %s46_s24 = sadd.s32 1, %s5503_s9 }
  0x31   : > { %p53_p9 = scmp.ne.s32.totalorder %s5503_s9, %s5499_s8  ;;  %s8390_s16 = smov (%p35_p11, %s34_s16), 0 }
  0x32   : > { %8263 = sst [smem:[#allocation26_spill]] %s8390_s16  ;;  %s8392_s17 = smov (!%p35_p11, %s37_s17), %s5519_s13 }
  0x33   : > { %s5808_s21 = ssub.s32 %s5515_s12, %s8390_s16  ;;  %p8200_p0 = scmp.eq.s32.totalorder %s5523_s14, 0 }
  0x34   : > { %p39_p6 = scmp.ge.s32.totalorder %s8392_s17, 2  ;;  %p8199_p10 = scmp.lt.s32.totalorder %s5523_s14, 4 }
  0x35   : > { %4782 = dma.hbm_to_vmem [thread:$0]  (!%p5784_p2), %s8262_s1, 128, %s246_s27, [#allocation8]  }
  0x36   : > { %p5814_p8 = por %p8200_p0, %p53_p9  ;;  %s8394_s17 = smov (%p39_p6, %s8392_s17), 0 }
  0x37   : > { %8265 = sst [smem:[#allocation27_spill]] %s8394_s17  ;;  %s275_s23 = sand.u32 1, %s5523_s14  }
  0x38   : > { %s277_s1 = sand.u32 1, %s5503_s9   ;;  %s41_s16 = ssub.s32 %s5519_s13, %s8394_s17 }
  0x39   : > { %s43_s7 = sor.u32 %s5808_s21, %s41_s16  ;;  %p206_p12 = scmp.eq.s32.totalorder %s41_s16, 0 }
  0x3a   : > { %p44_p11 = scmp.eq.s32.totalorder %s43_s7, 0  ;;  %s4610_s20 = sshll.u32 %s277_s1, 10 }
  0x3b   : > { %s8266_s4 = sadd.s32 1, %s5479_s26  ;;  %s4762_s6 = sshll.u32 %s5515_s12, 8 }
  0x3c   : > { %s5829_s2 = scalar_select %p206_p12, %s5479_s26, %s8266_s4  }
  0x3d   : > { %s5832_s10 = scalar_select %p44_p11, %s5503_s9, %s46_s24  }
  0x3e   : > { %s4613_s11 = sshll.u32 %s5519_s13, 9  ;;  %s279_s25 = scalar_lea.vmem [#allocation4], %s4610_s20 }
  0x3f   : > { %s289_s19 = sshll.u32 %s279_s25, 4  ;;  %s286_s18 = sadd.s32 %s4762_s6, %s4613_s11  ;;  %s290_s19 = int_to_ptr.vmem [resolvable:$true] %s289_s19 }
  0x40   : > { %s4614_s8 = sshll.u32 %s286_s18, 6  ;;  %p5840_p9 = pnand %p8199_p10, %p5814_p8 }
  0x41   : > { %s288_s4 = scalar_lea.hbm %s8174_s0, %s4614_s8  ;;  %s5847_s24 = scalar_lea.sflag [#allocation5], %s275_s23 }
  0x42   : > { %p5287_p6 = pneg %p5840_p9  ;;  %s5298_s20 = scalar_lea.vmem %s290_s19, 16384 }
  0x43   : > { %p5299_p12 = scmp.ne.s32.totalorder %s290_s19, %s5298_s20  ;;  %s5526_s6 = smov [#allocation4]  }
  0x44   : > { %s5303_s25 = sshll.u32 %s5526_s6, 4  ;;  %s5304_s25 = int_to_ptr.vmem [resolvable:$false] %s5303_s25 }
  0x45   : > { %p5301_p11 = pnand %p5299_p12, %p5287_p6  ;;  %s5305_s11 = scalar_lea.vmem %s5304_s25, 32768 }
  0x46   : > { %p5306_p8 = scmp.lt.s32.totalorder %s290_s19, %s5304_s25  ;;  %p5307_p10 = scmp.lt.s32.totalorder %s5305_s11, %s5298_s20 }
  0x47   : > { %p5302_p1 = pneg %p5301_p11 }
  0x48   : > { %p5308_p0 = por %p5307_p10, %p5306_p8 }
  0x4a   : > { %p5309_p7 = pnand %p5308_p0, %p5302_p1 }
  0x4c   : > { %5312 = shalt.err (!%p5309_p7)
}
  0x4d   : > { %s5527_s18 = smov 128   ;;  %s5528_s8 = smov 8  }
  0x4e   : > { %4789 = dma.hbm_to_vmem [thread:$0]  (!%p5840_p9), %s288_s4, 16384, %s290_s19, %s5847_s24, %s5527_s18, %s5527_s18, %s5528_s8  }
  0x4f   : > { %s5529_s16 = smov [#allocation10]  }
  0x50   : > { %s261_s27 = sshll.u32 %s5529_s16, 4  ;;  %s262_s27 = int_to_ptr.vmem [resolvable:$true] %s261_s27 }
  0x51   : > { %s5324_s23 = scalar_lea.vmem %s262_s27, 1792  ;;  %p5332_p5 = scmp.lt.s32.totalorder %s262_s27, %s262_s27 }
  0x52   : > { %p5325_p6 = scmp.ne.s32.totalorder %s262_s27, %s5324_s23  ;;  %p5333_p10 = scmp.lt.s32.totalorder %s5324_s23, %s5324_s23 }
  0x54   : > { %p5327_p12 = pnand %p5325_p6, %p5261_p4  ;;  %p5334_p1 = por %p5333_p10, %p5332_p5 }
  0x56   : > { %p5328_p11 = pneg %p5327_p12 }
  0x58   : > { %p5335_p0 = pnand %p5334_p1, %p5328_p11 }
  0x5a   : > { %5338 = shalt.err (!%p5335_p0)
}
  0x5b   : > { %s5530_s7 = smov 256   ;;  %s5531_s19 = smov 16  }
  0x5c   : > { %4785 = dma.hbm_to_vmem [thread:$0]  (!%p5784_p2), %s8179_s5, 1792, %s262_s27, [#allocation8], %s5530_s7, %s5530_s7, %s5531_s19  }
  0x5d   : > { %s4763_s4 = sshll.u32 %s5515_s12, 9  ;;  %s114_s20 = sadd.s32 1, %s5491_s29 }
  0x5e   : > { %p121_p5 = scmp.ne.s32.totalorder %s5491_s29, %s5487_s28  ;;  %p8268_p4 = scmp.eq.s32.totalorder %s5808_s21, 0 }
  0x5f   : > { %p8269_p7 = scmp.eq.s32.totalorder %s5523_s14, 0  ;;  %s301_s25 = sand.u32 1, %s5491_s29  }
  0x60   : > { %s5869_s6 = scalar_select %p8268_p4, %s5491_s29, %s114_s20  }
  0x61   : > { %p123_p9 = por %p121_p5, %p8269_p7  ;;  %s4615_s11 = sshll.u32 %s301_s25, 5 }
  0x62   : > { %s309_s16 = scalar_lea.hbm %s8177_s3, %s4763_s4  ;;  %p8270_p8 = scmp.lt.s32.totalorder %s5523_s14, 4 }
  0x63   : > { %s303_s27 = scalar_lea.vmem [#allocation9], %s4615_s11  ;;  %s5532_s7 = smov [#allocation9]  }
  0x64   : > { %p5879_p6 = pnand %p8270_p8, %p123_p9  ;;  %s311_s23 = sshll.u32 %s303_s27, 4  ;;  %s312_s23 = int_to_ptr.vmem [resolvable:$true] %s311_s23 }
  0x65   : > { %s5352_s21 = scalar_lea.vmem %s312_s23, 512  ;;  %s5357_s19 = sshll.u32 %s5532_s7, 4  ;;  %s5358_s19 = int_to_ptr.vmem [resolvable:$false] %s5357_s19 }
  0x66   : > { %p5341_p2 = pneg %p5879_p6  ;;  %p5353_p12 = scmp.ne.s32.totalorder %s312_s23, %s5352_s21 }
  0x67   : > { %s5359_s17 = scalar_lea.vmem %s5358_s19, 1024  ;;  %p5360_p1 = scmp.lt.s32.totalorder %s312_s23, %s5358_s19 }
  0x68   : > { %p5355_p11 = pnand %p5353_p12, %p5341_p2  ;;  %p5361_p0 = scmp.lt.s32.totalorder %s5359_s17, %s5352_s21 }
  0x6a   : > { %p5356_p10 = pneg %p5355_p11  ;;  %p5362_p5 = por %p5361_p0, %p5360_p1 }
  0x6c   : > { %p5363_p4 = pnand %p5362_p5, %p5356_p10 }
  0x6e   : > { %5366 = shalt.err (!%p5363_p4)
}
  0x6f   : > { %4792 = dma.hbm_to_vmem [thread:$0]  (!%p5879_p6), %s309_s16, 512, %s312_s23, %s5847_s24  }
  0x70   : > { %320 = sbr.rel (%p5776_p13) target bundleno = 1321 (0x529), region = 44 }
  0x75   : > { %s8272_s1 = sld [smem:[#allocation19_spill]]  ;;  %s322_s20 = sand.u32 1, %s5742_s15  }
  0x76   : > { %s323_s18 = scalar_lea.sflag [#allocation5], %s322_s20 }
  0x7b   : > { %s324_s25 = sand.u32 1, %s8272_s1  }
  0x7c   : > { %s4619_s11 = sshll.u32 %s324_s25, 10 }
  0x7d   : > { %s5892_s8 = scalar_lea.vmem [#allocation4], %s4619_s11 }
  0x7e   : > { %5450 = dma.done.wait (%p5751_p3), %s323_s18, 16384  }
  0x7f   : > { %5452 = vsyncadd (%p5751_p3), %s323_s18, 4294950912  ;;  %p8274_p7 = scmp.eq.s32.totalorder %s5742_s15, 0 }
  0x81   : > { %5454 = dma.done.wait (%p8274_p7), [#allocation8], 128   ;;  %p8275_p9 = pmov %p8274_p7 }
  0x82   : > { %s8276_s22 = sld [smem:[#allocation23_spill]]  ;;  %s337_s24 = sand.u32 1, %s5487_s28  }
  0x83   : > { %5456 = vsyncadd (%p8275_p9), [#allocation8], 4294967168  ;;  %s4621_s16 = sshll.u32 %s337_s24, 5 }
  0x84   : > { %s5903_s30 = scalar_lea.vmem [#allocation9], %s4621_s16 }
  0x88   : > { %p8277_p13 = scmp.ne.s32.totalorder %s8276_s22, 0 }
  0x8a   : > { %5458 = dma.done.wait (%p8277_p13), %s323_s18, 512  }
  0x8b   : > { %5460 = vsyncadd (%p8277_p13), %s323_s18, 4294966784  ;;  %p8278_p8 = pmov %p8274_p7 }
  0x8c   : > { %p8279_p3 = pmov %p8274_p7 }
  0x8d   : > { %5462 = dma.done.wait (%p8278_p8), [#allocation8], 1792  }
  0x8e   : > { %5464 = vsyncadd (%p8279_p3), [#allocation8], 4294965504  ;;  %s8280_s27 = sld [smem:[#allocation18_spill]] }
  0x8f   : > { %s8281_s23 = sld [smem:[#allocation21_spill]] }
  0x90   : > { %s8282_s4 = sld [smem:[#allocation46_spill]] }
  0x91   : > { %s8283_s15 = sld [smem:[#allocation20_spill]] }
  0x94   : > { %s380_s21 = sand.u32 1, %s8280_s27  }
  0x95   : > { %p385_p6 = scmp.lt.s32.totalorder %s8281_s23, 1  ;;  %s5917_s7 = sshll.u32 %s380_s21, 3 }
  0x96   : > { %s382_s25 = scalar_lea.vmem [#allocation11], %s5917_s7 }
  0x97   : > { %s8396_s23 = smov (!%p385_p6, %s8281_s23), 1  ;;  %p4625_p2 = scmp.ne.s32.totalorder %s8283_s15, 0 }
  0x98   : > { %s4624_s19 = sshll.u32 %s8396_s23, 2 }
  0x99   : > { %s5923_s20 = scalar_lea.vmem %s8282_s4, %s4624_s19  ;;  %393 = sbr.rel (%p4625_p2) target bundleno = 162 (0xa2), region = 64 }
  0x9e   : > { %v396_v0 = vlaneseq  ;;  %v5533_v1 = vmov 0.0   ;;  %v5534_v2 = vmov -inf  }
  0x9f   : > { %394 = vst [vmem:[#allocation2] sm:$0xff] %v5533_v1  ;;  %395 = vst [vmem:[#allocation2 + $0x8] sm:$0xff] %v5533_v1 }
  0xa0   : > { %vm398_vm0 = vcmp.lt.s32.totalorder %v396_v0, 256 }
  0xa1   : > { %400 = vst.msk [vmem:[#allocation3] sm:$0x3] %vm398_vm0, %v5534_v2 }
  0xa2 PF: > { %v5928_v3 = vld [vmem:[%s5892_s8 + $0xf0] sm:$0xff]  ;;  %v5931_v4 = vld [vmem:[%s5892_s8 + $0xf8] sm:$0xff]  ;;  %v5944_v9 = vld [vmem:[%s5892_s8 + $0xe0] sm:$0xff]  ;;  %v8202_v11 = vmov 0   ;;  %s8355_s11 = sld [smem:[#allocation20_spill]] }
  0xa3   : > { %v5934_v5 = vld [vmem:[%s5892_s8 + $0x70] sm:$0xff]  ;;  %v4641_v6 = vcombine.high %v5928_v3, %v5931_v4  ;;  %v5939_v7 = vld [vmem:[%s5892_s8 + $0x78] sm:$0xff]  ;;  %v4640_v8 = vcombine.low %v5928_v3, %v5931_v4  ;;  %v5947_v10 = vld [vmem:[%s5892_s8 + $0xe8] sm:$0xff]  ;;  %547 = vmatprep.mubr.bf16.mxu0 %v8202_v11  ;;  %668 = vmatprep.mubr.bf16.mxu1 %v8202_v11 }
  0xa4   : > { %v4657_v12 = vcombine.high %v5934_v5, %v5939_v7  ;;  %v4656_v13 = vcombine.low %v5934_v5, %v5939_v7  ;;  %v4639_v14 = vcombine.high %v5944_v9, %v5947_v10  ;;  %v5958_v15 = vld [vmem:[%s5892_s8 + $0x60] sm:$0xff]  ;;  %v5961_v16 = vld [vmem:[%s5892_s8 + $0x68] sm:$0xff]  ;;  %v5964_v17 = vld [vmem:[%s5892_s8 + $0xd0] sm:$0xff]  ;;  %v4638_v22 = vcombine.low %v5944_v9, %v5947_v10 }
  0xa5   : > { %515 = vmatprep.subr.bf16.mxu0 %v4641_v6  ;;  %v4655_v18 = vcombine.high %v5958_v15, %v5961_v16  ;;  %v5969_v19 = vld [vmem:[%s5892_s8 + $0xd8] sm:$0xff]  ;;  %v5972_v20 = vld [vmem:[%s5892_s8 + $0x50] sm:$0xff]  ;;  %v4654_v23 = vcombine.low %v5958_v15, %v5961_v16  ;;  %v5986_v26 = vld [vmem:[%s5892_s8 + $0xc0] sm:$0xff]  ;;  %v691_v55 = vmax.bf16 %v5928_v3, %v5934_v5  ;;  %v692_v58 = vmax.bf16 %v5931_v4, %v5939_v7 }
  0xa6   : > { %v5975_v21 = vld [vmem:[%s5892_s8 + $0x58] sm:$0xff]  ;;  %636 = vmatprep.subr.bf16.mxu1 %v4657_v12  ;;  %516 = vmatpush1.bf16.msra.mxu0 %v4640_v8  ;;  %v4637_v24 = vcombine.high %v5964_v17, %v5969_v19  ;;  %v5989_v27 = vld [vmem:[%s5892_s8 + $0xc8] sm:$0xff]  ;;  %v5992_v28 = vld [vmem:[%s5892_s8 + $0x40] sm:$0xff]  ;;  %v4636_v30 = vcombine.low %v5964_v17, %v5969_v19  ;;  %v689_v59 = vmax.bf16 %v5944_v9, %v5958_v15 }
  0xa7   : > { %637 = vmatpush1.bf16.msra.mxu1 %v4656_v13  ;;  %517 = vmatprep.subr.bf16.mxu0 %v4639_v14  ;;  %v4653_v25 = vcombine.high %v5972_v20, %v5975_v21  ;;  %v5995_v29 = vld [vmem:[%s5892_s8 + $0x48] sm:$0xff]  ;;  %v4652_v31 = vcombine.low %v5972_v20, %v5975_v21  ;;  %v4635_v32 = vcombine.high %v5986_v26, %v5989_v27  ;;  %v6006_v34 = vld [vmem:[%s5892_s8 + $0xb0] sm:$0xff]  ;;  %v6009_v35 = vld [vmem:[%s5892_s8 + $0xb8] sm:$0xff] }
  0xa8   : > { %638 = vmatprep.subr.bf16.mxu1 %v4655_v18  ;;  %v4651_v33 = vcombine.high %v5992_v28, %v5995_v29  ;;  %v6012_v36 = vld [vmem:[%s5892_s8 + $0x30] sm:$0xff]  ;;  %v6015_v37 = vld [vmem:[%s5892_s8 + $0x38] sm:$0xff]  ;;  %v4634_v38 = vcombine.low %v5986_v26, %v5989_v27  ;;  %v4650_v39 = vcombine.low %v5992_v28, %v5995_v29  ;;  %v4633_v40 = vcombine.high %v6006_v34, %v6009_v35  ;;  %v6026_v42 = vld [vmem:[%s5892_s8 + $0xa0] sm:$0xff]  ;;  %p4754_p12 = scmp.ne.s32.totalorder %s8355_s11, 1 }
  0xa9   : > { %v4649_v41 = vcombine.high %v6012_v36, %v6015_v37  ;;  %v6029_v43 = vld [vmem:[%s5892_s8 + $0xa8] sm:$0xff]  ;;  %v6032_v44 = vld [vmem:[%s5892_s8 + $0x20] sm:$0xff]  ;;  %v4632_v46 = vcombine.low %v6006_v34, %v6009_v35  ;;  %v4648_v47 = vcombine.low %v6012_v36, %v6015_v37  ;;  %v6046_v50 = vld [vmem:[%s5892_s8 + $0x90] sm:$0xff]  ;;  %v690_v60 = vmax.bf16 %v5947_v10, %v5961_v16  ;;  %s5539_s18 = smov (!%p4754_p12), 51   ;;  %s5541_s22 = smov (!%p4754_p12), 49  }
  0xaa   : > { %518 = vmatpush1.bf16.msra.mxu0 %v4638_v22  ;;  %v6035_v45 = vld [vmem:[%s5892_s8 + $0x28] sm:$0xff]  ;;  %v4631_v48 = vcombine.high %v6026_v42, %v6029_v43  ;;  %v6049_v51 = vld [vmem:[%s5892_s8 + $0x98] sm:$0xff]  ;;  %v6052_v52 = vld [vmem:[%s5892_s8 + $0x10] sm:$0xff]  ;;  %v4630_v54 = vcombine.low %v6026_v42, %v6029_v43  ;;  %v687_v0 = vmax.bf16 %v5964_v17, %v5972_v20  ;;  %v688_v1 = vmax.bf16 %v5969_v19, %v5975_v21  ;;  %s5543_s24 = smov (!%p4754_p12), 48   ;;  %s5545_s16 = smov (!%p4754_p12), 47  }
  0xab   : > { %639 = vmatpush1.bf16.msra.mxu1 %v4654_v23  ;;  %519 = vmatprep.subr.bf16.mxu0 %v4637_v24  ;;  %v4647_v49 = vcombine.high %v6032_v44, %v6035_v45  ;;  %v6055_v53 = vld [vmem:[%s5892_s8 + $0x18] sm:$0xff]  ;;  %v4646_v56 = vcombine.low %v6032_v44, %v6035_v45  ;;  %v4629_v57 = vcombine.high %v6046_v50, %v6049_v51  ;;  %v6074_v62 = vld [vmem:[%s5892_s8 + $0x80] sm:$0xff]  ;;  %v6077_v63 = vld [vmem:[%s5892_s8 + $0x88] sm:$0xff]  ;;  %s5549_s27 = smov (!%p4754_p12), 45   ;;  %s5552_s23 = smov (!%p4754_p12), 34  }
  0xac   : > { %640 = vmatprep.subr.bf16.mxu1 %v4653_v25  ;;  %v4645_v61 = vcombine.high %v6052_v52, %v6055_v53  ;;  %v685_v2 = vmax.bf16 %v5986_v26, %v5992_v28  ;;  %v686_v3 = vmax.bf16 %v5989_v27, %v5995_v29  ;;  %v6088_v4 = vld [vmem:[%s5892_s8] sm:$0xff]  ;;  %v6091_v5 = vld [vmem:[%s5892_s8 + $0x8] sm:$0xff]  ;;  %v683_v6 = vmax.bf16 %v6006_v34, %v6012_v36  ;;  %v6108_v14 = vld [vmem:[%s5892_s8 + $0x170] sm:$0xff]  ;;  %s5554_s19 = smov (!%p4754_p12), 35   ;;  %s5556_s17 = smov (!%p4754_p12), 32  }
  0xad   : > { %v684_v7 = vmax.bf16 %v6009_v35, %v6015_v37  ;;  %v681_v8 = vmax.bf16 %v6026_v42, %v6032_v44  ;;  %v4628_v9 = vcombine.low %v6046_v50, %v6049_v51  ;;  %v682_v10 = vmax.bf16 %v6029_v43, %v6035_v45  ;;  %v6111_v15 = vld [vmem:[%s5892_s8 + $0x178] sm:$0xff]  ;;  %v6123_v20 = vld [vmem:[%s5892_s8 + $0x1f0] sm:$0xff]  ;;  %v6138_v26 = vld [vmem:[%s5892_s8 + $0x160] sm:$0xff]  ;;  %s5559_s1 = smov (!%p4754_p12), 33   ;;  %s5560_s4 = smov (!%p4754_p12), 30  }
  0xae   : > { %520 = vmatpush1.bf16.msra.mxu0 %v4636_v30  ;;  %v4644_v12 = vcombine.low %v6052_v52, %v6055_v53  ;;  %v4627_v13 = vcombine.high %v6074_v62, %v6077_v63  ;;  %v679_v16 = vmax.bf16 %v6046_v50, %v6052_v52  ;;  %v680_v17 = vmax.bf16 %v6049_v51, %v6055_v53  ;;  %v6126_v21 = vld [vmem:[%s5892_s8 + $0x1f8] sm:$0xff]  ;;  %v6141_v28 = vld [vmem:[%s5892_s8 + $0x168] sm:$0xff]  ;;  %v6237_v22 = vld [vmem:[%s5892_s8 + $0x130] sm:$0xff]  ;;  %s5563_s15 = smov (!%p4754_p12), 19   ;;  %s5565_s11 = smov (!%p4754_p12), 31  }
  0xaf   : > { %641 = vmatpush1.bf16.msra.mxu1 %v4652_v31  ;;  %521 = vmatprep.subr.bf16.mxu0 %v4635_v32  ;;  %v4643_v18 = vcombine.high %v6088_v4, %v6091_v5  ;;  %v6120_v19 = vmax.bf16 %v6108_v14, %v691_v55  ;;  %v4626_v24 = vcombine.low %v6074_v62, %v6077_v63  ;;  %v6240_v27 = vld [vmem:[%s5892_s8 + $0x138] sm:$0xff]  ;;  %v6243_v29 = vld [vmem:[%s5892_s8 + $0x1b0] sm:$0xff]  ;;  %v6285_v37 = vld [vmem:[%s5892_s8 + $0x1a0] sm:$0xff] }
  0xb0   : > { %642 = vmatprep.subr.bf16.mxu1 %v4651_v33  ;;  %v6135_v25 = vmax.bf16 %v6111_v15, %v692_v58  ;;  %v4642_v30 = vcombine.low %v6088_v4, %v6091_v5  ;;  %v4673_v31 = vcombine.high %v6108_v14, %v6111_v15  ;;  %v6148_v32 = vmax.bf16 %v6138_v26, %v689_v59  ;;  %v6185_v58 = vld [vmem:[%s5892_s8 + $0x1d8] sm:$0xff]  ;;  %v6470_v52 = vld [vmem:[%s5892_s8 + $0x370] sm:$0xff]  ;;  %v6548_v50 = vld [vmem:[%s5892_s8 + $0x3e0] sm:$0xff] }
  0xb1   : > { %v6151_v33 = vmax.bf16 %v6141_v28, %v690_v60  ;;  %v4665_v43 = vcombine.high %v6237_v22, %v6240_v27  ;;  %v8284_v51 = vmax.bf16 %v6074_v62, %v6088_v4  ;;  %v6398_v4 = vld [vmem:[%s5892_s8 + $0x2f0] sm:$0xff]  ;;  %8296 = vst [vmem:[#allocation30_spill] sm:$0xff] %v6548_v50 }
  0xb2   : > { %522 = vmatpush1.bf16.msra.mxu0 %v4634_v38  ;;  %v6154_v38 = vld [vmem:[%s5892_s8 + $0x1e0] sm:$0xff]  ;;  %v1004_v59 = vmax.bf16 %v6126_v21, %v6135_v25  ;;  %v6363_v25 = vld [vmem:[%s5892_s8 + $0x108] sm:$0xff] }
  0xb3   : > { %643 = vmatpush1.bf16.msra.mxu1 %v4650_v39  ;;  %523 = vmatprep.subr.bf16.mxu0 %v4633_v40  ;;  %v6157_v39 = vld [vmem:[%s5892_s8 + $0x1e8] sm:$0xff]  ;;  %v4689_v40 = vcombine.high %v6123_v20, %v6126_v21 }
  0xb4   : > { %644 = vmatprep.subr.bf16.mxu1 %v4649_v41  ;;  %v4672_v41 = vcombine.low %v6108_v14, %v6111_v15  ;;  %v4687_v60 = vcombine.high %v6154_v38, %v6157_v39  ;;  %v6262_v14 = vld [vmem:[%s5892_s8 + $0x1b8] sm:$0xff] }
  0xb5   : > { %v4681_v45 = vcombine.high %v6243_v29, %v6262_v14 }
  0xb6   : > { %524 = vmatpush1.bf16.msra.mxu0 %v4632_v46  ;;  %v4688_v46 = vcombine.low %v6123_v20, %v6126_v21  ;;  %v6360_v21 = vld [vmem:[%s5892_s8 + $0x100] sm:$0xff] }
  0xb7   : > { %645 = vmatpush1.bf16.msra.mxu1 %v4648_v47  ;;  %525 = vmatprep.subr.bf16.mxu0 %v4631_v48  ;;  %v6166_v47 = vld [vmem:[%s5892_s8 + $0x150] sm:$0xff]  ;;  %v6169_v48 = vld [vmem:[%s5892_s8 + $0x158] sm:$0xff]  ;;  %v6376_v53 = vmax.bf16 %v6360_v21, %v8284_v51 }
  0xb8   : > { %646 = vmatprep.subr.bf16.mxu1 %v4647_v49  ;;  %v1003_v49 = vmax.bf16 %v6123_v20, %v6120_v19  ;;  %v6176_v55 = vmax.bf16 %v6166_v47, %v687_v0  ;;  %v4686_v0 = vcombine.low %v6154_v38, %v6157_v39  ;;  %v4669_v15 = vcombine.high %v6166_v47, %v6169_v48  ;;  %v6401_v51 = vld [vmem:[%s5892_s8 + $0x2f8] sm:$0xff] }
  0xba   : > { %526 = vmatpush1.bf16.msra.mxu0 %v4630_v54  ;;  %v4671_v54 = vcombine.high %v6138_v26, %v6141_v28 }
  0xbb   : > { %647 = vmatpush1.bf16.msra.mxu1 %v4646_v56  ;;  %527 = vmatprep.subr.bf16.mxu0 %v4629_v57  ;;  %v6179_v56 = vmax.bf16 %v6169_v48, %v688_v1  ;;  %v6182_v57 = vld [vmem:[%s5892_s8 + $0x1d0] sm:$0xff]  ;;  %v6196_v1 = vld [vmem:[%s5892_s8 + $0x140] sm:$0xff] }
  0xbc   : > { %648 = vmatprep.subr.bf16.mxu1 %v4645_v61  ;;  %v4670_v61 = vcombine.low %v6138_v26, %v6141_v28  ;;  %v6212_v26 = vld [vmem:[%s5892_s8 + $0x1c0] sm:$0xff]  ;;  %v6215_v28 = vld [vmem:[%s5892_s8 + $0x1c8] sm:$0xff]  ;;  %v4684_v23 = vcombine.low %v6182_v57, %v6185_v58 }
  0xbd   : > { %v4682_v44 = vcombine.low %v6212_v26, %v6215_v28 }
  0xbe   : > { %528 = vmatpush1.bf16.msra.mxu0 %v4628_v9  ;;  %v6199_v9 = vld [vmem:[%s5892_s8 + $0x148] sm:$0xff] }
  0xbf   : > { %649 = vmatpush1.bf16.msra.mxu1 %v4644_v12  ;;  %529 = vmatprep.subr.bf16.mxu0 %v4627_v13  ;;  %v434_v12 = vld [vmem:[%s5903_s30 + $0x4] sm:$0xf]  ;;  %v4685_v13 = vcombine.high %v6182_v57, %v6185_v58 }
  0xc0   : > { %650 = vmatprep.subr.bf16.mxu1 %v4643_v18  ;;  %v6209_v18 = vmax.bf16 %v6196_v1, %v685_v2  ;;  %v6226_v2 = vmax.bf16 %v6199_v9, %v686_v3  ;;  %v6268_v3 = vld [vmem:[%s5892_s8 + $0x128] sm:$0xff] }
  0xc1   : > { %v6282_v36 = vmax.bf16 %v6268_v3, %v682_v10  ;;  %v6303_v10 = vld [vmem:[%s5892_s8 + $0x110] sm:$0xff] }
  0xc2   : > { %530 = vmatpush1.bf16.msra.mxu0 %v4626_v24  ;;  %v417_v24 = vld [vmem:[%s5903_s30] sm:$0xf]  ;;  %v997_v34 = vmax.bf16 %v6212_v26, %v6209_v18  ;;  %v998_v42 = vmax.bf16 %v6215_v28, %v6226_v2  ;;  %v6351_v19 = vmax.bf16 %v6303_v10, %v679_v16  ;;  %v8285_v16 = vmax.bf16 %v6077_v63, %v6091_v5 }
  0xc3   : > { %651 = vmatpush1.bf16.msra.mxu1 %v4642_v30  ;;  %790 = vmatprep.subr.bf16.mxu0 %v4673_v31  ;;  %v6253_v31 = vmax.bf16 %v6237_v22, %v683_v6  ;;  %v6259_v30 = vmax.bf16 %v6240_v27, %v684_v7  ;;  %v6288_v6 = vld [vmem:[%s5892_s8 + $0x1a8] sm:$0xff]  ;;  %v6322_v7 = vld [vmem:[%s5892_s8 + $0x278] sm:$0xff]  ;;  %v8286_v63 = vmax.bf16 %v6154_v38, %v6148_v32 }
  0xc4   : > { %946 = vmatprep.subr.bf16.mxu1 %v4689_v40  ;;  %v4666_v40 = vcombine.low %v6196_v1, %v6199_v9 }
  0xc5   : > { %548 = vmatmul.mubr.bf16.vlgmr.msra.gmra.mxu0 %v434_v12  ;;  %v6265_v12 = vld [vmem:[%s5892_s8 + $0x120] sm:$0xff] }
  0xc6   : > { %669 = vmatmul.mubr.bf16.vlgmr.msra.gmra.mxu1 %v417_v24  ;;  %791 = vmatpush1.bf16.msra.mxu0 %v4672_v41  ;;  %v6276_v35 = vmax.bf16 %v6265_v12, %v681_v8  ;;  %v6315_v24 = vld [vmem:[%s5892_s8 + $0x118] sm:$0xff]  ;;  %v6319_v8 = vld [vmem:[%s5892_s8 + $0x270] sm:$0xff] }
  0xc7   : > { %947 = vmatpush1.bf16.msra.mxu1 %v4688_v46  ;;  %792 = vmatprep.subr.bf16.mxu0 %v4671_v54  ;;  %v6329_v54 = vld [vmem:[%s5892_s8 + $0x190] sm:$0xff]  ;;  %v6357_v20 = vmax.bf16 %v6315_v24, %v680_v17  ;;  %v6382_v17 = vmax.bf16 %v6363_v25, %v8285_v16  ;;  %v8287_v16 = vmax.bf16 %v6157_v39, %v6151_v33  ;;  %v6453_v39 = vld [vmem:[%s5892_s8 + $0x258] sm:$0xff] }
  0xc8   : > { %948 = vmatprep.subr.bf16.mxu1 %v4687_v60  ;;  %822 = vmatprep.mubr.bf16.mxu0 %v8202_v11  ;;  %v6332_v60 = vld [vmem:[%s5892_s8 + $0x198] sm:$0xff]  ;;  %v8289_v33 = vcombine.high %v6196_v1, %v6199_v9  ;;  %v6530_v9 = vld [vmem:[%s5892_s8 + $0x360] sm:$0xff] }
  0xc9   : > { %978 = vmatprep.mubr.bf16.mxu1 %v8202_v11  ;;  %v1159_v11 = vmax.bf16 %v6319_v8, %v1003_v49  ;;  %v6366_v49 = vld [vmem:[%s5892_s8 + $0x180] sm:$0xff]  ;;  %8293 = vst [vmem:[#allocation28_spill] sm:$0xff] %v6530_v9 }
  0xca   : > { %793 = vmatpush1.bf16.msra.mxu0 %v4670_v61  ;;  %v1160_v61 = vmax.bf16 %v6322_v7, %v1004_v59  ;;  %v6385_v59 = vld [vmem:[%s5892_s8 + $0x188] sm:$0xff] }
  0xcb   : > { %949 = vmatpush1.bf16.msra.mxu1 %v4686_v0  ;;  %794 = vmatprep.subr.bf16.mxu0 %v4669_v15  ;;  %v6388_v0 = vld [vmem:[%s5892_s8 + $0x260] sm:$0xff]  ;;  %v8288_v15 = vcombine.low %v6166_v47, %v6169_v48  ;;  %v1315_v32 = vmax.bf16 %v6398_v4, %v1159_v11  ;;  %v6450_v47 = vld [vmem:[%s5892_s8 + $0x250] sm:$0xff] }
  0xcc   : > { %950 = vmatprep.subr.bf16.mxu1 %v4685_v13  ;;  %v6391_v13 = vld [vmem:[%s5892_s8 + $0x268] sm:$0xff]  ;;  %v1157_v5 = vmax.bf16 %v6388_v0, %v8286_v63  ;;  %v1316_v38 = vmax.bf16 %v6401_v51, %v1160_v61  ;;  %v6433_v48 = vld [vmem:[%s5892_s8 + $0x2e0] sm:$0xff] }
  0xcd   : > { %v1158_v46 = vmax.bf16 %v6391_v13, %v8287_v16  ;;  %v8292_v16 = vmax.bf16 %v6185_v58, %v6179_v56  ;;  %v6486_v58 = vld [vmem:[%s5892_s8 + $0x240] sm:$0xff] }
  0xce   : > { %795 = vmatpush1.bf16.msra.mxu0 %v8288_v15  ;;  %v8291_v15 = vmax.bf16 %v6182_v57, %v6176_v55  ;;  %v6483_v57 = vld [vmem:[%s5892_s8 + $0x2d0] sm:$0xff] }
  0xcf   : > { %951 = vmatpush1.bf16.msra.mxu1 %v4684_v23  ;;  %796 = vmatprep.subr.bf16.mxu0 %v8289_v33  ;;  %v8290_v23 = vcombine.high %v6212_v26, %v6215_v28  ;;  %v6447_v33 = vld [vmem:[%s5892_s8 + $0x2e8] sm:$0xff]  ;;  %v6467_v63 = vmax.bf16 %v6453_v39, %v8292_v16  ;;  %v6521_v16 = vld [vmem:[%s5892_s8 + $0x2d8] sm:$0xff] }
  0xd0   : > { %v1314_v61 = vmax.bf16 %v6447_v33, %v1158_v46  ;;  %v6461_v11 = vmax.bf16 %v6450_v47, %v8291_v15  ;;  %v1471_v46 = vmax.bf16 %v6470_v52, %v1315_v32  ;;  %v6507_v32 = vmax.bf16 %v6486_v58, %v997_v34 }
  0xd1   : > { %952 = vmatprep.subr.bf16.mxu1 %v8290_v23  ;;  %v1313_v23 = vmax.bf16 %v6433_v48, %v1157_v5  ;;  %v6473_v5 = vld [vmem:[%s5892_s8 + $0x378] sm:$0xff]  ;;  %v1312_v28 = vmax.bf16 %v6521_v16, %v6467_v63  ;;  %v8298_v63 = vcombine.low %v6243_v29, %v6262_v14 }
  0xd2   : > { %797 = vmatpush1.bf16.msra.mxu0 %v4666_v40  ;;  %v1472_v15 = vmax.bf16 %v6473_v5, %v1316_v38  ;;  %v6501_v40 = vld [vmem:[%s5892_s8 + $0x248] sm:$0xff]  ;;  %v6513_v38 = vld [vmem:[%s5892_s8 + $0x3f8] sm:$0xff] }
  0xd3   : > { %953 = vmatpush1.bf16.msra.mxu1 %v4682_v44  ;;  %798 = vmatprep.subr.bf16.mxu0 %v4665_v43  ;;  %v6510_v44 = vld [vmem:[%s5892_s8 + $0x3f0] sm:$0xff]  ;;  %v1154_v18 = vmax.bf16 %v6501_v40, %v998_v42  ;;  %v1311_v43 = vmax.bf16 %v6483_v57, %v6461_v11  ;;  %v1469_v2 = vmax.bf16 %v6530_v9, %v1313_v23  ;;  %v6551_v11 = vld [vmem:[%s5892_s8 + $0x3e8] sm:$0xff] }
  0xd4   : > { %954 = vmatprep.subr.bf16.mxu1 %v4681_v45  ;;  %v1627_v26 = vmax.bf16 %v6510_v44, %v1471_v46  ;;  %v1628_v34 = vmax.bf16 %v6513_v38, %v1472_v15  ;;  %v6533_v45 = vld [vmem:[%s5892_s8 + $0x368] sm:$0xff]  ;;  %v8295_v46 = vcombine.low %v6237_v22, %v6240_v27  ;;  %v6545_v15 = vld [vmem:[%s5892_s8 + $0x2c0] sm:$0xff]  ;;  %8297 = vst [vmem:[#allocation31_spill] sm:$0xff] %v6551_v11  ;;  %v6565_v23 = vld [vmem:[%s5892_s8 + $0x230] sm:$0xff] }
  0xd5   : > { %8294 = vst [vmem:[#allocation29_spill] sm:$0xff] %v6533_v45  ;;  %v1470_v42 = vmax.bf16 %v6533_v45, %v1314_v61  ;;  %v8299_v61 = vcombine.high %v6265_v12, %v6268_v3  ;;  %v6560_v22 = vld [vmem:[%s5892_s8 + $0x2c8] sm:$0xff]  ;;  %v1309_v27 = vmax.bf16 %v6545_v15, %v6507_v32 }
  0xd6   : > { %799 = vmatpush1.bf16.msra.mxu0 %v8295_v46  ;;  %v1663_v1 = vunpack.c.l.bf16 %v1627_v26  ;;  %v1664_v56 = vunpack.c.h.bf16 %v1627_v26  ;;  %v1665_v55 = vunpack.c.l.bf16 %v1628_v34  ;;  %v1666_v62 = vunpack.c.h.bf16 %v1628_v34 }
  0xd7   : > { %955 = vmatpush1.bf16.msra.mxu1 %v8298_v63  ;;  %800 = vmatprep.subr.bf16.mxu0 %v8299_v61  ;;  %v1625_v26 = vmax.bf16 %v6548_v50, %v1469_v2  ;;  %v1626_v34 = vmax.bf16 %v6551_v11, %v1470_v42  ;;  %v8300_v46 = vcombine.high %v6285_v37, %v6288_v6  ;;  %v6580_v11 = vld [vmem:[%s5892_s8 + $0x350] sm:$0xff] }
  0xd8   : > { %v1310_v63 = vmax.bf16 %v6560_v22, %v1154_v18  ;;  %v8301_v61 = vmax.bf16 %v6243_v29, %v6253_v31  ;;  %v1671_v32 = vmax.f32 %v1665_v55, %v1663_v1  ;;  %v1692_v9 = vmax.f32 %v1666_v62, %v1664_v56  ;;  %v6593_v62 = vld [vmem:[%s5892_s8 + $0x238] sm:$0xff]  ;;  %v6596_v55 = vld [vmem:[%s5892_s8 + $0x2b0] sm:$0xff] }
  0xd9   : > { %956 = vmatprep.subr.bf16.mxu1 %v8300_v46  ;;  %v1659_v45 = vunpack.c.l.bf16 %v1625_v26  ;;  %v1660_v2 = vunpack.c.h.bf16 %v1625_v26  ;;  %v1661_v50 = vunpack.c.l.bf16 %v1626_v34  ;;  %v1662_v42 = vunpack.c.h.bf16 %v1626_v34  ;;  %v6583_v46 = vld [vmem:[%s5892_s8 + $0x358] sm:$0xff]  ;;  %v6611_v29 = vld [vmem:[%s5892_s8 + $0x3d0] sm:$0xff] }
  0xda   : > { %v6577_v41 = vmax.bf16 %v6565_v23, %v8301_v61  ;;  %v8302_v18 = vcombine.low %v6265_v12, %v6268_v3  ;;  %v1467_v56 = vmax.bf16 %v6580_v11, %v1311_v43  ;;  %v1468_v1 = vmax.bf16 %v6583_v46, %v1312_v28  ;;  %8306 = vst [vmem:[#allocation32_spill] sm:$0xff] %v6611_v29  ;;  %v6614_v43 = vld [vmem:[%s5892_s8 + $0x3d8] sm:$0xff]  ;;  %v6617_v28 = vld [vmem:[%s5892_s8 + $0x340] sm:$0xff] }
  0xdb   : > { %v8303_v3 = vcombine.low %v6285_v37, %v6288_v6  ;;  %v8304_v12 = vcombine.high %v6303_v10, %v6315_v24  ;;  %v8305_v26 = vmax.bf16 %v6262_v14, %v6259_v30  ;;  %v1672_v61 = vmax.f32 %v1659_v45, %v1671_v32  ;;  %8307 = vst [vmem:[#allocation33_spill] sm:$0xff] %v6617_v28  ;;  %v6625_v14 = vld [vmem:[%s5892_s8 + $0x220] sm:$0xff]  ;;  %v6630_v45 = vld [vmem:[%s5892_s8 + $0x348] sm:$0xff] }
  0xdc   : > { %801 = vmatpush1.bf16.msra.mxu0 %v8302_v18  ;;  %v1693_v18 = vmax.f32 %v1660_v2, %v1692_v9  ;;  %v1623_v30 = vmax.bf16 %v6611_v29, %v1467_v56  ;;  %v1624_v9 = vmax.bf16 %v6614_v43, %v1468_v1  ;;  %v1465_v32 = vmax.bf16 %v6617_v28, %v1309_v27  ;;  %v6644_v1 = vld [vmem:[%s5892_s8 + $0x2b8] sm:$0xff]  ;;  %v6647_v29 = vld [vmem:[%s5892_s8 + $0x228] sm:$0xff] }
  0xdd   : > { %957 = vmatpush1.bf16.msra.mxu1 %v8303_v3  ;;  %802 = vmatprep.subr.bf16.mxu0 %v8304_v12  ;;  %v1152_v34 = vmax.bf16 %v6593_v62, %v8305_v26  ;;  %v8308_v3 = vcombine.high %v6329_v54, %v6332_v60  ;;  %v1307_v12 = vmax.bf16 %v6596_v55, %v6577_v41 }
  0xde   : > { %v8309_v2 = vmax.bf16 %v6285_v37, %v6276_v35  ;;  %v1694_v41 = vmax.f32 %v1662_v42, %v1693_v18  ;;  %v1466_v31 = vmax.bf16 %v6630_v45, %v1310_v63  ;;  %v8310_v56 = vcombine.low %v6303_v10, %v6315_v24 }
  0xdf   : > { %958 = vmatprep.subr.bf16.mxu1 %v8308_v3  ;;  %v1673_v3 = vmax.f32 %v1661_v50, %v1672_v61  ;;  %v1655_v27 = vunpack.c.l.bf16 %v1623_v30  ;;  %v1656_v28 = vunpack.c.h.bf16 %v1623_v30  ;;  %v1657_v35 = vunpack.c.l.bf16 %v1624_v9  ;;  %v6666_v61 = vld [vmem:[%s5892_s8 + $0x3c8] sm:$0xff] }
  0xe0   : > { %v6637_v26 = vmax.bf16 %v6625_v14, %v8309_v2  ;;  %803 = vmatpush1.bf16.msra.mxu0 %v8310_v56  ;;  %v1658_v37 = vunpack.c.h.bf16 %v1624_v9  ;;  %v6650_v2 = vld [vmem:[%s5892_s8 + $0x3c0] sm:$0xff]  ;;  %v8312_v50 = vcombine.low %v6329_v54, %v6332_v60  ;;  %v8313_v10 = vcombine.high %v6360_v21, %v6363_v25  ;;  %8315 = vst [vmem:[#allocation35_spill] sm:$0xff] %v6666_v61 }
  0xe1   : > { %8311 = vst [vmem:[#allocation34_spill] sm:$0xff] %v6650_v2  ;;  %v1308_v24 = vmax.bf16 %v6644_v1, %v1152_v34  ;;  %v8314_v63 = vmax.bf16 %v6288_v6, %v6282_v36  ;;  %v1621_v18 = vmax.bf16 %v6650_v2, %v1465_v32  ;;  %v8316_v30 = vcombine.high %v6366_v49, %v6385_v59  ;;  %v6675_v9 = vld [vmem:[%s5892_s8 + $0x2a0] sm:$0xff]  ;;  %v6687_v2 = vld [vmem:[%s5892_s8 + $0x330] sm:$0xff]  ;;  %v6705_v32 = vld [vmem:[%s5892_s8 + $0x338] sm:$0xff] }
  0xe2   : > { %959 = vmatpush1.bf16.msra.mxu1 %v8312_v50  ;;  %804 = vmatprep.subr.bf16.mxu0 %v8313_v10  ;;  %v1674_v36 = vmax.f32 %v1655_v27, %v1673_v3  ;;  %v1695_v6 = vmax.f32 %v1656_v28, %v1694_v41  ;;  %v1622_v56 = vmax.bf16 %v6666_v61, %v1466_v31  ;;  %v709_v50 = vld [vmem:[%s5903_s30 + $0x8] sm:$0xf]  ;;  %v6693_v31 = vld [vmem:[%s5892_s8 + $0x2a8] sm:$0xff]  ;;  %v6696_v3 = vld [vmem:[%s5892_s8 + $0x218] sm:$0xff] }
  0xe3   : > { %v6663_v42 = vmax.bf16 %v6647_v29, %v8314_v63  ;;  %960 = vmatprep.subr.bf16.mxu1 %v8316_v30  ;;  %v1305_v10 = vmax.bf16 %v6675_v9, %v6637_v26  ;;  %v6684_v63 = vld [vmem:[%s5892_s8 + $0x210] sm:$0xff]  ;;  %v1651_v30 = vunpack.c.l.bf16 %v1621_v18  ;;  %v1652_v34 = vunpack.c.h.bf16 %v1621_v18  ;;  %8317 = vst [vmem:[#allocation36_spill] sm:$0xff] %v6687_v2 }
  0xe4   : > { %v8318_v28 = vcombine.low %v6360_v21, %v6363_v25  ;;  %v8319_v26 = vmax.bf16 %v6329_v54, %v6351_v19  ;;  %v1675_v27 = vmax.f32 %v1657_v35, %v1674_v36  ;;  %v1696_v18 = vmax.f32 %v1658_v37, %v1695_v6  ;;  %v865_v25 = vld [vmem:[%s5903_s30 + $0xc] sm:$0xf]  ;;  %v6722_v37 = vld [vmem:[%s5892_s8 + $0x200] sm:$0xff] }
  0xe5   : > { %v1463_v61 = vmax.bf16 %v6687_v2, %v1307_v12  ;;  %v8320_v21 = vcombine.low %v6366_v49, %v6385_v59  ;;  %v1306_v54 = vmax.bf16 %v6693_v31, %v6663_v42  ;;  %v8322_v19 = vmax.bf16 %v6332_v60, %v6357_v20  ;;  %v6726_v36 = vld [vmem:[%s5892_s8 + $0x3b0] sm:$0xff] }
  0xe6   : > { %805 = vmatpush1.bf16.msra.mxu0 %v8318_v28  ;;  %v6702_v41 = vmax.bf16 %v6684_v63, %v8319_v26  ;;  %v8321_v28 = vcombine.high %v6319_v8, %v6322_v7  ;;  %v1464_v12 = vmax.bf16 %v6705_v32, %v1308_v24  ;;  %v8323_v6 = vcombine.high %v6398_v4, %v6401_v51  ;;  %v6732_v26 = vld [vmem:[%s5892_s8 + $0x208] sm:$0xff] }
  0xe7   : > { %961 = vmatpush1.bf16.msra.mxu1 %v8320_v21  ;;  %v1148_v35 = vmax.bf16 %v6696_v3, %v8322_v19  ;;  %v8324_v42 = vmax.bf16 %v6366_v49, %v6376_v53  ;;  %v1676_v20 = vmax.f32 %v1651_v30, %v1675_v27  ;;  %v1653_v21 = vunpack.c.l.bf16 %v1622_v56  ;;  %v6746_v53 = vld [vmem:[%s5892_s8 + $0x320] sm:$0xff] }
  0xe8   : > { %1102 = vmatprep.subr.bf16.mxu0 %v8321_v28  ;;  %1258 = vmatprep.subr.bf16.mxu1 %v8323_v6  ;;  %v1619_v24 = vmax.bf16 %v6726_v36, %v1463_v61  ;;  %v4717_v28 = vcombine.high %v6483_v57, %v6521_v16  ;;  %v8325_v19 = vmax.bf16 %v6385_v59, %v6382_v17  ;;  %v1654_v49 = vunpack.c.h.bf16 %v1622_v56  ;;  %v6756_v59 = vld [vmem:[%s5892_s8 + $0x290] sm:$0xff] }
  0xe9   : > { %v1145_v60 = vmax.bf16 %v6722_v37, %v8324_v42  ;;  %823 = vmatmul.mubr.bf16.vlgmr.msra.gmra.mxu0 %v709_v50  ;;  %v1697_v2 = vmax.f32 %v1652_v34, %v1696_v18  ;;  %v8326_v30 = vcombine.low %v6319_v8, %v6322_v7  ;;  %v4700_v61 = vcombine.low %v6450_v47, %v6453_v39  ;;  %v6759_v50 = vld [vmem:[%s5892_s8 + $0x298] sm:$0xff] }
  0xea   : > { %v1146_v6 = vmax.bf16 %v6732_v26, %v8325_v19  ;;  %979 = vmatmul.mubr.bf16.vlgmr.msra.gmra.mxu1 %v865_v25  ;;  %v4716_v17 = vcombine.low %v6483_v57, %v6521_v16  ;;  %v6762_v34 = vld [vmem:[%s5892_s8 + $0x3b8] sm:$0xff]  ;;  %v1461_v56 = vmax.bf16 %v6746_v53, %v1305_v10  ;;  %v8327_v27 = vcombine.low %v6398_v4, %v6401_v51  ;;  %v6775_v16 = vld [vmem:[%s5892_s8 + $0x280] sm:$0xff]  ;;  %v6779_v25 = vld [vmem:[%s5892_s8 + $0x328] sm:$0xff] }
  0xeb   : > { %1103 = vmatpush1.bf16.msra.mxu0 %v8326_v30  ;;  %v8328_v7 = vcombine.high %v6388_v0, %v6391_v13  ;;  %v1303_v8 = vmax.bf16 %v6756_v59, %v6702_v41  ;;  %v1304_v57 = vmax.bf16 %v6759_v50, %v1148_v35  ;;  %v1620_v18 = vmax.bf16 %v6762_v34, %v1464_v12  ;;  %v6785_v51 = vld [vmem:[%s5892_s8 + $0x288] sm:$0xff] }
  0xec   : > { %1259 = vmatpush1.bf16.msra.mxu1 %v8327_v27  ;;  %v8329_v4 = vcombine.high %v6433_v48, %v6447_v33  ;;  %v1301_v10 = vmax.bf16 %v6775_v16, %v1145_v60  ;;  %v8330_v42 = vmov 0   ;;  %v1677_v41 = vmax.f32 %v1653_v21, %v1676_v20  ;;  %v6795_v60 = vld [vmem:[%s5892_s8 + $0x3a0] sm:$0xff] }
  0xed   : > { %1104 = vmatprep.subr.bf16.mxu0 %v8328_v7  ;;  %1134 = vmatprep.mubr.bf16.mxu0 %v8330_v42  ;;  %v1647_v35 = vunpack.c.l.bf16 %v1619_v24  ;;  %v1462_v19 = vmax.bf16 %v6779_v25, %v1306_v54  ;;  %v4699_v12 = vcombine.high %v6486_v58, %v6501_v40  ;;  %v1302_v30 = vmax.bf16 %v6785_v51, %v1146_v6  ;;  %v6811_v6 = vld [vmem:[%s5892_s8 + $0x318] sm:$0xff] }
  0xee   : > { %1260 = vmatprep.subr.bf16.mxu1 %v8329_v4  ;;  %1290 = vmatprep.mubr.bf16.mxu1 %v8330_v42  ;;  %v1698_v27 = vmax.f32 %v1654_v49, %v1697_v2  ;;  %v1648_v7 = vunpack.c.h.bf16 %v1619_v24  ;;  %8331 = vst [vmem:[#allocation37_spill] sm:$0xff] %v6795_v60  ;;  %v8332_v4 = vcombine.low %v6388_v0, %v6391_v13  ;;  %v6808_v24 = vld [vmem:[%s5892_s8 + $0x310] sm:$0xff] }
  0xef   : > { %v4715_v54 = vcombine.high %v6545_v15, %v6560_v22  ;;  %v4698_v20 = vcombine.low %v6486_v58, %v6501_v40  ;;  %v4714_v21 = vcombine.low %v6545_v15, %v6560_v22  ;;  %v1617_v2 = vmax.bf16 %v6795_v60, %v1461_v56  ;;  %8333 = vst [vmem:[#allocation38_spill] sm:$0xff] %v6808_v24  ;;  %v6822_v15 = vld [vmem:[%s5892_s8 + $0x3a8] sm:$0xff]  ;;  %v6827_v56 = vld [vmem:[%s5892_s8 + $0x300] sm:$0xff] }
  0xf0   : > { %1105 = vmatpush1.bf16.msra.mxu0 %v8332_v4  ;;  %v8334_v0 = vcombine.low %v6433_v48, %v6447_v33  ;;  %v8335_v13 = vcombine.high %v6450_v47, %v6453_v39  ;;  %v4697_v58 = vcombine.high %v6565_v23, %v6593_v62  ;;  %v1649_v40 = vunpack.c.l.bf16 %v1620_v18  ;;  %8336 = vst [vmem:[#allocation39_spill] sm:$0xff] %v6827_v56  ;;  %v6831_v39 = vld [vmem:[%s5892_s8 + $0x390] sm:$0xff]  ;;  %v6834_v47 = vld [vmem:[%s5892_s8 + $0x398] sm:$0xff] }
  0xf1   : > { %v1459_v22 = vmax.bf16 %v6808_v24, %v1303_v8  ;;  %v1460_v49 = vmax.bf16 %v6811_v6, %v1304_v57  ;;  %v1678_v48 = vmax.f32 %v1647_v35, %v1677_v41  ;;  %v1650_v33 = vunpack.c.h.bf16 %v1620_v18  ;;  %8337 = vst [vmem:[#allocation40_spill] sm:$0xff] %v6831_v39  ;;  %8338 = vst [vmem:[#allocation41_spill] sm:$0xff] %v6834_v47  ;;  %v6844_v41 = vld [vmem:[%s5892_s8 + $0x380] sm:$0xff] }
  0xf2   : > { %1261 = vmatpush1.bf16.msra.mxu1 %v8334_v0  ;;  %1106 = vmatprep.subr.bf16.mxu0 %v8335_v13  ;;  %v1618_v4 = vmax.bf16 %v6822_v15, %v1462_v19  ;;  %v6837_v0 = vld [vmem:[%s5892_s8 + $0x308] sm:$0xff]  ;;  %v1457_v13 = vmax.bf16 %v6827_v56, %v1301_v10  ;;  %v1699_v60 = vmax.f32 %v1648_v7, %v1698_v27  ;;  %v1643_v19 = vunpack.c.l.bf16 %v1617_v2 }
  0xf3   : > { %1262 = vmatprep.subr.bf16.mxu1 %v4717_v28  ;;  %8339 = vst [vmem:[#allocation42_spill] sm:$0xff] %v6837_v0  ;;  %v1615_v8 = vmax.bf16 %v6831_v39, %v1459_v22  ;;  %v1616_v57 = vmax.bf16 %v6834_v47, %v1460_v49  ;;  %v1458_v28 = vmax.bf16 %v6837_v0, %v1302_v30  ;;  %v1644_v27 = vunpack.c.h.bf16 %v1617_v2  ;;  %v6852_v56 = vld [vmem:[%s5892_s8 + $0x388] sm:$0xff]  ;;  %s5540_s8 = smov (!%p4754_p12), 50  }
  0xf4   : > { %1107 = vmatpush1.bf16.msra.mxu0 %v4700_v61  ;;  %v4713_v18 = vcombine.high %v6596_v55, %v6644_v1  ;;  %v4696_v35 = vcombine.low %v6565_v23, %v6593_v62  ;;  %v1613_v10 = vmax.bf16 %v6844_v41, %v1457_v13  ;;  %v1679_v47 = vmax.f32 %v1649_v40, %v1678_v48 }
  0xf5   : > { %1108 = vmatprep.subr.bf16.mxu0 %v4699_v12  ;;  %v1639_v7 = vunpack.c.l.bf16 %v1615_v8  ;;  %v1640_v22 = vunpack.c.h.bf16 %v1615_v8  ;;  %v1641_v49 = vunpack.c.l.bf16 %v1616_v57  ;;  %v1642_v30 = vunpack.c.h.bf16 %v1616_v57 }
  0xf6   : > { %1263 = vmatpush1.bf16.msra.mxu1 %v4716_v17  ;;  %v1614_v61 = vmax.bf16 %v6852_v56, %v1458_v28  ;;  %v1635_v0 = vunpack.c.l.bf16 %v1613_v10  ;;  %v1636_v39 = vunpack.c.h.bf16 %v1613_v10  ;;  %v1700_v24 = vmax.f32 %v1650_v33, %v1699_v60 }
  0xf7   : > { %1264 = vmatprep.subr.bf16.mxu1 %v4715_v54  ;;  %v1645_v23 = vunpack.c.l.bf16 %v1618_v4  ;;  %v1646_v62 = vunpack.c.h.bf16 %v1618_v4  ;;  %v4712_v8 = vcombine.low %v6596_v55, %v6644_v1  ;;  %v4695_v54 = vcombine.high %v6625_v14, %v6647_v29 }
  0xf8   : > { %1109 = vmatpush1.bf16.msra.mxu0 %v4698_v20  ;;  %v1637_v13 = vunpack.c.l.bf16 %v1614_v61  ;;  %v1638_v17 = vunpack.c.h.bf16 %v1614_v61  ;;  %v1667_v12 = vmax.f32 %v1635_v0, %v1639_v7  ;;  %v1688_v2 = vmax.f32 %v1636_v39, %v1640_v22 }
  0xf9   : > { %1110 = vmatprep.subr.bf16.mxu0 %v4697_v58  ;;  %v4711_v57 = vcombine.high %v6675_v9, %v6693_v31  ;;  %v4694_v33 = vcombine.low %v6625_v14, %v6647_v29  ;;  %v4710_v55 = vcombine.low %v6675_v9, %v6693_v31  ;;  %v4693_v1 = vcombine.high %v6684_v63, %v6696_v3 }
  0xfa   : > { %1265 = vmatpush1.bf16.msra.mxu1 %v4714_v21  ;;  %v1668_v60 = vmax.f32 %v1637_v13, %v1641_v49  ;;  %v1669_v40 = vmax.f32 %v1667_v12, %v1643_v19  ;;  %v1689_v48 = vmax.f32 %v1638_v17, %v1642_v30  ;;  %v1690_v20 = vmax.f32 %v1688_v2, %v1644_v27  ;;  %v8340_v12 = vld [vmem:[#allocation29_spill] sm:$0xff]  ;;  %v8341_v2 = vld [vmem:[#allocation28_spill] sm:$0xff] }
  0xfb   : > { %1266 = vmatprep.subr.bf16.mxu1 %v4713_v18  ;;  %v4709_v0 = vcombine.high %v6756_v59, %v6759_v50  ;;  %v4692_v29 = vcombine.low %v6684_v63, %v6696_v3  ;;  %v4708_v9 = vcombine.low %v6756_v59, %v6759_v50  ;;  %v4691_v31 = vcombine.high %v6722_v37, %v6732_v26 }
  0xfc   : > { %1111 = vmatpush1.bf16.msra.mxu0 %v4696_v35  ;;  %v1680_v21 = vmax.f32 %v1669_v40, %v1679_v47  ;;  %v1670_v58 = vmax.f32 %v1668_v60, %v1645_v23  ;;  %v1701_v4 = vmax.f32 %v1690_v20, %v1700_v24  ;;  %v1691_v39 = vmax.f32 %v1689_v48, %v1646_v62 }
  0xfd   : > { %1112 = vmatprep.subr.bf16.mxu0 %v4695_v54  ;;  %v5536_v47 = vmov 1966171168   ;;  %v4707_v19 = vcombine.high %v6775_v16, %v6785_v51  ;;  %v1716_v7 = vlaneseq  ;;  %v4690_v63 = vcombine.low %v6722_v37, %v6732_v26  ;;  %v1021_v26 = vld [vmem:[%s5903_s30 + $0x10] sm:$0xf]  ;;  %v8342_v54 = vld [vmem:[#allocation31_spill] sm:$0xff] }
  0xfe   : > { %1267 = vmatpush1.bf16.msra.mxu1 %v4712_v8  ;;  %v1681_v28 = vmax.f32 %v1670_v58, %v1680_v21  ;;  %v1702_v18 = vmax.f32 %v1691_v39, %v1701_v4  ;;  %v1714_v35 = vunpack.c.l.s4 %v5536_v47  ;;  %v4706_v59 = vcombine.low %v6775_v16, %v6785_v51  ;;  %v1177_v51 = vld [vmem:[%s5903_s30 + $0x14] sm:$0xf] }
  0xff   : > { %1268 = vmatprep.subr.bf16.mxu1 %v4711_v57  ;;  %v4737_v50 = vcombine.high %v6470_v52, %v6473_v5  ;;  %v4753_v30 = vcombine.high %v6510_v44, %v6513_v38  ;;  %v6886_v37 = vshrl.u32 %v1716_v7, 7  ;;  %v4736_v62 = vcombine.low %v6470_v52, %v6473_v5  ;;  %v8343_v57 = vld [vmem:[#allocation30_spill] sm:$0xff] }
 0x100   : > { %1113 = vmatpush1.bf16.msra.mxu0 %v4694_v33  ;;  %v1682_v14 = vrot.slane %v1681_v28, 4  ;;  %v1703_v24 = vrot.slane %v1702_v18, 4  ;;  %v1715_v49 = vunpack.c.0.s8 %v1714_v35  ;;  %v4752_v17 = vcombine.low %v6510_v44, %v6513_v38  ;;  %v8344_v33 = vld [vmem:[#allocation32_spill] sm:$0xff]  ;;  %v1709_v4 = vld [vmem:[#allocation3] sm:$0x3]  ;;  %v8349_v35 = vld [vmem:[#allocation37_spill] sm:$0xff] }
 0x101   : > { %1114 = vmatprep.subr.bf16.mxu0 %v4693_v1  ;;  %v4735_v8 = vcombine.high %v8341_v2, %v8340_v12  ;;  %v4751_v60 = vcombine.high %v8343_v57, %v8342_v54  ;;  %v4734_v52 = vcombine.low %v8341_v2, %v8340_v12  ;;  %v4750_v44 = vcombine.low %v8343_v57, %v8342_v54 }
 0x102   : > { %1269 = vmatpush1.bf16.msra.mxu1 %v4710_v55  ;;  %v1683_v10 = vmax.f32 %v1681_v28, %v1682_v14  ;;  %v1704_v27 = vmax.f32 %v1702_v18, %v1703_v24  ;;  %v1718_v20 = vsub.s32 %v1715_v49, %v6886_v37  ;;  %v4733_v38 = vcombine.high %v6580_v11, %v6583_v46  ;;  %v8346_v18 = vld [vmem:[#allocation35_spill] sm:$0xff] }
 0x103   : > { %1270 = vmatprep.subr.bf16.mxu1 %v4709_v0  ;;  %v4749_v21 = vcombine.high %v8344_v33, %v6614_v43  ;;  %v4732_v39 = vcombine.low %v6580_v11, %v6583_v46  ;;  %v4748_v1 = vcombine.low %v8344_v33, %v6614_v43  ;;  %v8345_v0 = vld [vmem:[#allocation33_spill] sm:$0xff]  ;;  %vm1731_vm1 = vcmp.lt.s32.totalorder %v1716_v7, 256  ;;  %v8348_v43 = vld [vmem:[#allocation36_spill] sm:$0xff] }
 0x104   : > { %1115 = vmatpush1.bf16.msra.mxu0 %v4692_v29  ;;  %v1684_v3 = vrot.slane %v1683_v10, 2  ;;  %v1705_v22 = vrot.slane %v1704_v27, 2  ;;  %v4731_v28 = vcombine.high %v8345_v0, %v6630_v45  ;;  %v8347_v29 = vld [vmem:[#allocation34_spill] sm:$0xff]  ;;  %v4730_v11 = vcombine.low %v8345_v0, %v6630_v45 }
 0x105   : > { %1116 = vmatprep.subr.bf16.mxu0 %v4691_v31  ;;  %v4747_v14 = vcombine.high %v8347_v29, %v8346_v18  ;;  %v4746_v46 = vcombine.low %v8347_v29, %v8346_v18  ;;  %v4729_v24 = vcombine.high %v8348_v43, %v6705_v32  ;;  %v4728_v31 = vcombine.low %v8348_v43, %v6705_v32  ;;  %v1629_v43 = vld [vmem:[#allocation2] sm:$0xff] }
 0x106   : > { %1271 = vmatpush1.bf16.msra.mxu1 %v4708_v9  ;;  %v1685_v61 = vmax.f32 %v1683_v10, %v1684_v3  ;;  %v1706_v23 = vmax.f32 %v1704_v27, %v1705_v22  ;;  %v4745_v9 = vcombine.high %v6726_v36, %v6762_v34  ;;  %v4744_v45 = vcombine.low %v6726_v36, %v6762_v34  ;;  %v8350_v27 = vld [vmem:[#allocation38_spill] sm:$0xff]  ;;  %v8351_v36 = vld [vmem:[#allocation41_spill] sm:$0xff]  ;;  %v8352_v34 = vld [vmem:[#allocation40_spill] sm:$0xff] }
 0x107   : > { %1272 = vmatprep.subr.bf16.mxu1 %v4707_v19  ;;  %v4727_v47 = vcombine.high %v6746_v53, %v6779_v25  ;;  %v4743_v19 = vcombine.high %v8349_v35, %v6822_v15  ;;  %v4726_v10 = vcombine.low %v6746_v53, %v6779_v25  ;;  %v4742_v32 = vcombine.low %v8349_v35, %v6822_v15  ;;  %v8353_v25 = vld [vmem:[#allocation42_spill] sm:$0xff]  ;;  %v8354_v15 = vld [vmem:[#allocation39_spill] sm:$0xff] }
 0x108   : > { %1117 = vmatpush1.bf16.msra.mxu0 %v4690_v63  ;;  %v1686_v13 = vrot.slane %v1685_v61, 1  ;;  %v1707_v16 = vrot.slane %v1706_v23, 1  ;;  %v4725_v63 = vcombine.high %v8350_v27, %v6811_v6  ;;  %v4741_v3 = vcombine.high %v8352_v34, %v8351_v36 }
 0x109   : > { %1414 = vmatprep.subr.bf16.mxu0 %v4737_v50  ;;  %v4724_v22 = vcombine.low %v8350_v27, %v6811_v6  ;;  %v4740_v53 = vcombine.low %v8352_v34, %v8351_v36  ;;  %v4739_v50 = vcombine.high %v6844_v41, %v6852_v56  ;;  %v4722_v49 = vcombine.low %v8354_v15, %v8353_v25 }
 0x10a   : > { %1273 = vmatpush1.bf16.msra.mxu1 %v4706_v59  ;;  %v1687_v40 = vmax.f32 %v1685_v61, %v1686_v13  ;;  %v1708_v48 = vmax.f32 %v1706_v23, %v1707_v16  ;;  %v4723_v59 = vcombine.high %v8354_v15, %v8353_v25  ;;  %v4738_v6 = vcombine.low %v6844_v41, %v6852_v56  ;;  %v1489_v61 = vld [vmem:[%s5903_s30 + $0x1c] sm:$0xf] }
 0x10b   : > { %1570 = vmatprep.subr.bf16.mxu1 %v4753_v30  ;;  %1135 = vmatmul.mubr.bf16.vlgmr.msra.gmra.mxu0 %v1021_v26  ;;  %v1333_v30 = vld [vmem:[%s5903_s30 + $0x18] sm:$0xf]  ;;  %s5548_s30 = smov (!%p4754_p12), 46  }
 0x10c   : > { %1415 = vmatpush1.bf16.msra.mxu0 %v4736_v62  ;;  %v1712_v5 = vcombine.low %v1687_v40, %v1708_v48  ;;  %1446 = vmatprep.mubr.bf16.mxu0 %v8330_v42 }
 0x10d   : > { %1291 = vmatmul.mubr.bf16.vlgmr.msra.gmra.mxu1 %v1177_v51  ;;  %1416 = vmatprep.subr.bf16.mxu0 %v4735_v8 }
 0x10e   : > { %1571 = vmatpush1.bf16.msra.mxu1 %v4752_v17  ;;  %v1719_v58 = vrot.slane %v1712_v5, %v1718_v20  ;;  %1602 = vmatprep.mubr.bf16.mxu1 %v8330_v42 }
 0x10f   : > { %1572 = vmatprep.subr.bf16.mxu1 %v4751_v60 }
 0x110   : > { %1417 = vmatpush1.bf16.msra.mxu0 %v4734_v52  ;;  %v1726_v55 = vrot.slane %v1719_v58, %v1718_v20 }
 0x111   : > { %1418 = vmatprep.subr.bf16.mxu0 %v4733_v38 }
 0x112   : > { %1573 = vmatpush1.bf16.msra.mxu1 %v4750_v44  ;;  %v1728_v42 = vmax.f32 %v1709_v4, %v1726_v55 }
 0x113   : > { %1574 = vmatprep.subr.bf16.mxu1 %v4749_v21 }
 0x114   : > { %1419 = vmatpush1.bf16.msra.mxu0 %v4732_v39  ;;  %1733 = vst.msk [vmem:[#allocation3] sm:$0x3] %vm1731_vm1, %v1728_v42 }
 0x115   : > { %1420 = vmatprep.subr.bf16.mxu0 %v4731_v28 }
 0x116   : > { %1575 = vmatpush1.bf16.msra.mxu1 %v4748_v1 }
 0x117   : > { %1576 = vmatprep.subr.bf16.mxu1 %v4747_v14 }
 0x118   : > { %1421 = vmatpush1.bf16.msra.mxu0 %v4730_v11 }
 0x119   : > { %1422 = vmatprep.subr.bf16.mxu0 %v4729_v24 }
 0x11a   : > { %1577 = vmatpush1.bf16.msra.mxu1 %v4746_v46 }
 0x11b   : > { %1578 = vmatprep.subr.bf16.mxu1 %v4745_v9 }
 0x11c   : > { %1423 = vmatpush1.bf16.msra.mxu0 %v4728_v31 }
 0x11d   : > { %1424 = vmatprep.subr.bf16.mxu0 %v4727_v47  ;;  %v1630_v47 = vld [vmem:[#allocation2 + $0x8] sm:$0xff] }
 0x11e   : > { %1579 = vmatpush1.bf16.msra.mxu1 %v4744_v45 }
 0x11f   : > { %1580 = vmatprep.subr.bf16.mxu1 %v4743_v19 }
 0x120   : > { %1425 = vmatpush1.bf16.msra.mxu0 %v4726_v10 }
 0x121   : > { %1426 = vmatprep.subr.bf16.mxu0 %v4725_v63 }
 0x122   : > { %1581 = vmatpush1.bf16.msra.mxu1 %v4742_v32 }
 0x123   : > { %1582 = vmatprep.subr.bf16.mxu1 %v4741_v3 }
 0x124   : > { %1427 = vmatpush1.bf16.msra.mxu0 %v4724_v22 }
 0x125   : > { %1428 = vmatprep.subr.bf16.mxu0 %v4723_v59 }
 0x126   : > { %1583 = vmatpush1.bf16.msra.mxu1 %v4740_v53 }
 0x127   : > { %1584 = vmatprep.subr.bf16.mxu1 %v4739_v50 }
 0x128   : > { %1429 = vmatpush1.bf16.msra.mxu0 %v4722_v49 }
 0x12a   : > { %1585 = vmatpush1.bf16.msra.mxu1 %v4738_v6 }
 0x12b   : > { %1447 = vmatmul.mubr.bf16.vlgmr.msra.gmra.mxu0 %v1333_v30 }
 0x12d   : > { %1603 = vmatmul.mubr.bf16.vlgmr.msra.gmra.mxu1 %v1489_v61 }
 0x185   : > { %v549_v23 = vpop.f32.mrf.mxu0 }
 0x186   : > { %v670_v26 = vpop.f32.mrf.mxu1 }
 0x187   : > { %v671_v62 = vadd.f32 %v670_v26, %v549_v23  ;;  %v551_v13 = vpop.f32.mrf.mxu0 }
 0x188   : > { %v672_v16 = vpop.f32.mrf.mxu1 }
 0x189   : > { %v673_v51 = vadd.f32 %v672_v16, %v551_v13  ;;  %v553_v17 = vpop.f32.mrf.mxu0 }
 0x18a   : > { %v674_v12 = vpop.f32.mrf.mxu1 }
 0x18b   : > { %v554_v2 = vpop.f32.mrf.mxu0 }
 0x18c   : > { %v675_v8 = vpop.f32.mrf.mxu1 }
 0x1a9   : > { %v824_v54 = vpop.f32.mrf.mxu0 }
 0x1aa   : > { %v980_v57 = vpop.f32.mrf.mxu1  ;;  %v831_v39 = vadd.f32 %v824_v54, %v671_v62 }
 0x1ab   : > { %v826_v56 = vpop.f32.mrf.mxu0 }
 0x1ac   : > { %v982_v41 = vpop.f32.mrf.mxu1  ;;  %v832_v55 = vadd.f32 %v826_v56, %v673_v51  ;;  %v987_v1 = vadd.f32 %v980_v57, %v831_v39 }
 0x1ad   : > { %v828_v60 = vpop.f32.mrf.mxu0 }
 0x1ae   : > { %v984_v40 = vpop.f32.mrf.mxu1  ;;  %v988_v0 = vadd.f32 %v982_v41, %v832_v55 }
 0x1af   : > { %v829_v48 = vpop.f32.mrf.mxu0 }
 0x1b0   : > { %v985_v20 = vpop.f32.mrf.mxu1 }
 0x1cb   : > { %v1136_v52 = vpop.f32.mrf.mxu0 }
 0x1cc   : > { %v1143_v28 = vadd.f32 %v1136_v52, %v987_v1 }
 0x1cd   : > { %v1292_v5 = vpop.f32.mrf.mxu1  ;;  %v1138_v44 = vpop.f32.mrf.mxu0 }
 0x1ce   : > { %v1144_v18 = vadd.f32 %v1138_v44, %v988_v0  ;;  %v1299_v29 = vadd.f32 %v1292_v5, %v1143_v28 }
 0x1cf   : > { %v1294_v38 = vpop.f32.mrf.mxu1  ;;  %v1140_v33 = vpop.f32.mrf.mxu0 }
 0x1d0   : > { %v1300_v42 = vadd.f32 %v1294_v38, %v1144_v18 }
 0x1d1   : > { %v1296_v21 = vpop.f32.mrf.mxu1  ;;  %v1141_v58 = vpop.f32.mrf.mxu0 }
 0x1d3   : > { %v1297_v4 = vpop.f32.mrf.mxu1 }
 0x1eb   : > { %v1448_v14 = vpop.f32.mrf.mxu0 }
 0x1ec   : > { %v1455_v11 = vadd.f32 %v1448_v14, %v1299_v29 }
 0x1ed   : > { %v1604_v46 = vpop.f32.mrf.mxu1  ;;  %v1450_v24 = vpop.f32.mrf.mxu0 }
 0x1ee   : > { %v1611_v9 = vadd.f32 %v1604_v46, %v1455_v11  ;;  %v1456_v31 = vadd.f32 %v1450_v24, %v1300_v42 }
 0x1ef   : > { %v1606_v45 = vpop.f32.mrf.mxu1  ;;  %v1452_v35 = vpop.f32.mrf.mxu0 }
 0x1f0   : > { %v1631_v19 = vadd.f32 %v1629_v43, %v1611_v9  ;;  %v1612_v10 = vadd.f32 %v1606_v45, %v1456_v31  ;;  %1737 = sbr.rel (%p4754_p12) target bundleno = 1294 (0x50e), region = 68 }
 0x1f1   : > { %v1608_v32 = vpop.f32.mrf.mxu1  ;;  %v1453_v27 = vpop.f32.mrf.mxu0 }
 0x1f2   : > { %1633 = vst [vmem:[#allocation2] sm:$0xff] %v1631_v19  ;;  %v1632_v63 = vadd.f32 %v1630_v47, %v1612_v10 }
 0x1f3   : > { %v1609_v36 = vpop.f32.mrf.mxu1 }
 0x1f4   : > { %1634 = vst [vmem:[#allocation2 + $0x8] sm:$0xff] %v1632_v63 }
 0x1f5   : > { %v6957_v34 = vld [vmem:[#allocation7] sm:$0xf]  ;;  %v8234_v22 = vmov 0   ;;  %v1742_v53 = vld [vmem:[#allocation3] sm:$0x3]  ;;  %v6961_v25 = vsub.s32 0, %v6886_v37 }
 0x1f6   : > { %5148 = vset.pattern.permute.xlu1 %v8234_v22  ;;  %v6964_v15 = vsub.s32 1, %v6886_v37  ;;  %vm1765_vm2 = vcmask 1040384   ;;  %v6969_v49 = vld [vmem:[#allocation7 + $0x4] sm:$0xf]  ;;  %v5538_v61 = vmov 1   ;;  %v5542_v26 = vmov 2  }
 0x1f7   : > { %1795 = vperm.xlu1 %5148, %v6957_v34   ;;  %v1758_v50 = vrot.slane %v1742_v53, %v6961_v25  ;;  %5149 = vset.pattern.permute.xlu0 %v5538_v61  ;;  %v5544_v62 = vmov 3   ;;  %v5546_v13 = vmov 4   ;;  %v5547_v16 = vmov 5  }
 0x1f8   : > { %v1762_v30 = vrot.slane %v1742_v53, %v6964_v15  ;;  %v5550_v51 = vmov 6   ;;  %v5551_v17 = vmov 7   ;;  %v5553_v12 = vmov 8  }
 0x1f9   : > { %v5555_v2 = vmov 9   ;;  %v5557_v8 = vmov 10   ;;  %v5558_v54 = vmov 11   ;;  %v5561_v57 = vmov 12  }
 0x1fa   : > { %v5562_v56 = vmov 13   ;;  %v5564_v41 = vmov 14   ;;  %v5566_v60 = vmov 15   ;;  %v5568_v40 = vmov 16  }
 0x1fb   : > { %v1741_v3 = vld [vmem:[#allocation2 + $0x4] ss:$8 sm:$0x3]  ;;  %1812 = vperm.xlu1 %5148, %v6969_v49   ;;  %v5569_v48 = vmov 17   ;;  %v5572_v52 = vmov 18   ;;  %v5573_v38 = vmov 19  }
 0x1fc   : > { %v1747_v59 = vrot.slane %v1741_v3, %v6961_v25  ;;  %v1751_v6 = vrot.slane %v1741_v3, %v6964_v15  ;;  %v5575_v58 = vmov 20   ;;  %v5577_v39 = vmov 21  }
 0x1fd   : > { %v5579_v0 = vmov 22   ;;  %v5580_v29 = vmov 23   ;;  %v5582_v42 = vmov 24   ;;  %v5583_v46 = vmov 25  }
 0x1fe   : > { %v6973_v23 = vsel %vm1765_vm2, %v1747_v59, %v1758_v50  ;;  %v6977_v37 = vsel %vm1765_vm2, %v1751_v6, %v1762_v30  ;;  %v5585_v31 = vmov 26   ;;  %v5586_v10 = vmov 27  }
 0x1ff   : > { %1768 = vrot.lane.b32.xlu0 %v6973_v23, %s5539_s18  ;;  %1829 = vrot.lane.b32.xlu1 %v6977_v37, %s5540_s8  ;;  %v5589_v63 = vmov 28   ;;  %v8240_v59 = vmov 29  }
 0x200   : > { %5150 = vset.pattern.permute.xlu1 %v5538_v61 }
 0x203   : > { %1770 = vrot.lane.b32.xlu0 %v6977_v37, %s5539_s18  ;;  %1866 = vperm.xlu1 %5150, %v6969_v49   ;;  %s5567_s18 = smov 17  }
 0x207   : > { %1827 = vrot.lane.b32.xlu0 %v6973_v23, %s5540_s8  ;;  %1881 = vrot.lane.b32.xlu1 %v6973_v23, %s5541_s22  ;;  %s5570_s8 = smov 29  }
 0x208   : > { %5151 = vset.pattern.permute.xlu1 %v5542_v26 }
 0x20b   : > { %1850 = vperm.xlu0 %5149, %v6957_v34   ;;  %1904 = vperm.xlu1 %5151, %v6957_v34  }
 0x20f   : > { %1883 = vrot.lane.b32.xlu0 %v6977_v37, %s5541_s22  ;;  %1935 = vrot.lane.b32.xlu1 %v6973_v23, %s5543_s24  ;;  %s5571_s22 = smov 15  }
 0x210   : > { %5152 = vset.pattern.permute.xlu0 %v5542_v26  ;;  %5154 = vset.pattern.permute.xlu1 %v5544_v62  ;;  %v8238_v26 = vmov 30  }
 0x213   : > { %1920 = vperm.xlu0 %5152, %v6969_v49   ;;  %1937 = vrot.lane.b32.xlu1 %v6977_v37, %s5543_s24  ;;  %s5574_s24 = smov 13  }
 0x217   : > { %5153 = vset.pattern.permute.xlu0 %v5544_v62  ;;  %1974 = vperm.xlu1 %5154, %v6969_v49   ;;  %v7159_v62 = vand.u32 127, %v1716_v7 }
 0x218   : > { %1958 = vperm.xlu0 %5153, %v6957_v34  }
 0x219   : > { %vm1774_vm3 = vcmp.lt.s32.totalorder %v7159_v62, 51  ;;  %vm1831_vm4 = vcmp.lt.s32.totalorder %v7159_v62, 50  ;;  %vm1885_vm5 = vcmp.lt.s32.totalorder %v7159_v62, 49  ;;  %vm1939_vm6 = vcmp.lt.s32.totalorder %v7159_v62, 48 }
 0x21a   : > { %vm1993_vm7 = vcmp.lt.s32.totalorder %v7159_v62, 47  ;;  %vm2047_vm8 = vcmp.lt.s32.totalorder %v7159_v62, 46  ;;  %vm2101_vm9 = vcmp.lt.s32.totalorder %v7159_v62, 45  ;;  %vm2155_vm10 = vcmp.lt.s32.totalorder %v7159_v62, 35 }
 0x21b   : > { %1989 = vrot.lane.b32.xlu1 %v6973_v23, %s5545_s16  ;;  %vm2209_vm11 = vcmp.lt.s32.totalorder %v7159_v62, 34  ;;  %vm2263_vm12 = vcmp.lt.s32.totalorder %v7159_v62, 33  ;;  %vm2317_vm13 = vcmp.lt.s32.totalorder %v7159_v62, 32  ;;  %vm2371_vm14 = vcmp.lt.s32.totalorder %v7159_v62, 31 }
 0x21c   : > { %1991 = vrot.lane.b32.xlu0 %v6977_v37, %s5545_s16  ;;  %5155 = vset.pattern.permute.xlu1 %v5546_v13  ;;  %s5576_s16 = smov 18   ;;  %vm2425_vm15 = vcmp.lt.s32.totalorder %v7159_v62, 30  ;;  %vm2479_vm0 = vcmp.lt.s32.totalorder %v7159_v62, 29  ;;  %vm2533_vm1 = vcmp.lt.s32.totalorder %v7159_v62, 19  ;;  %vm2587_vm2 = vcmp.lt.s32.totalorder %v7159_v62, 18 }
 0x21d   : > { %5156 = vset.pattern.permute.xlu0 %v5546_v13 }
 0x21f   : > { %2012 = vperm.xlu1 %5155, %v6957_v34  }
 0x220   : > { %2028 = vperm.xlu0 %5156, %v6969_v49  }
 0x223   : > { %2043 = vrot.lane.b32.xlu1 %v6973_v23, %s5548_s30 }
 0x224   : > { %5157 = vset.pattern.permute.xlu0 %v5547_v16  ;;  %5158 = vset.pattern.permute.xlu1 %v5547_v16  ;;  %v1777_v16 = vld [vmem:[#allocation10] ss:$8 sm:$0x3] }
 0x225   : > { %2066 = vperm.xlu0 %5157, %v6957_v34  }
 0x227   : > { %2045 = vrot.lane.b32.xlu1 %v6977_v37, %s5548_s30  ;;  %s5578_s30 = smov 2  }
 0x229   : > { %2099 = vrot.lane.b32.xlu0 %v6977_v37, %s5549_s27 }
 0x22a   : > { %5160 = vset.pattern.permute.xlu0 %v5550_v51 }
 0x22b   : > { %2082 = vperm.xlu1 %5158, %v6969_v49  }
 0x22d   : > { %2136 = vperm.xlu0 %5160, %v6969_v49  }
 0x22f   : > { %2097 = vrot.lane.b32.xlu1 %v6973_v23, %s5549_s27  ;;  %s5581_s27 = smov 16  }
 0x230   : > { %5159 = vset.pattern.permute.xlu1 %v5550_v51 }
 0x231   : > { %5161 = vset.pattern.permute.xlu0 %v5551_v17 }
 0x232   : > { %2174 = vperm.xlu0 %5161, %v6957_v34  }
 0x233   : > { %2120 = vperm.xlu1 %5159, %v6957_v34  }
 0x236   : > { %2207 = vrot.lane.b32.xlu0 %v6977_v37, %s5552_s23 }
 0x237   : > { %5164 = vset.pattern.permute.xlu0 %v5553_v12  ;;  %2151 = vrot.lane.b32.xlu1 %v6973_v23, %s5554_s19 }
 0x238   : > { %5162 = vset.pattern.permute.xlu1 %v5551_v17  ;;  %v8237_v17 = vmov 31  }
 0x23a   : > { %2244 = vperm.xlu0 %5164, %v6969_v49  }
 0x23b   : > { %2153 = vrot.lane.b32.xlu1 %v6977_v37, %s5554_s19  ;;  %s5587_s19 = smov 14  }
 0x23e   : > { %5165 = vset.pattern.permute.xlu0 %v5555_v2 }
 0x23f   : > { %2282 = vperm.xlu0 %5165, %v6957_v34   ;;  %2190 = vperm.xlu1 %5162, %v6969_v49  }
 0x243   : > { %2315 = vrot.lane.b32.xlu0 %v6977_v37, %s5556_s17  ;;  %2205 = vrot.lane.b32.xlu1 %v6973_v23, %s5552_s23  ;;  %s5584_s23 = smov 126  }
 0x244   : > { %5168 = vset.pattern.permute.xlu0 %v5557_v8  ;;  %5163 = vset.pattern.permute.xlu1 %v5553_v12  ;;  %v1782_v12 = vrot.slane %v1777_v16, %v6961_v25 }
 0x247   : > { %2352 = vperm.xlu0 %5168, %v6969_v49   ;;  %2228 = vperm.xlu1 %5163, %v6957_v34  }
 0x24b   : > { %5169 = vset.pattern.permute.xlu0 %v5558_v54  ;;  %2259 = vrot.lane.b32.xlu1 %v6973_v23, %s5559_s1 }
 0x24c   : > { %2390 = vperm.xlu0 %5169, %v6957_v34   ;;  %5166 = vset.pattern.permute.xlu1 %v5555_v2  ;;  %v1786_v2 = vrot.slane %v1777_v16, %v6964_v15 }
 0x24f   : > { %2261 = vrot.lane.b32.xlu1 %v6977_v37, %s5559_s1  ;;  %s5591_s1 = smov 113  }
 0x250   : > { %2423 = vrot.lane.b32.xlu0 %v6977_v37, %s5560_s4 }
 0x251   : > { %5172 = vset.pattern.permute.xlu0 %v5561_v57 }
 0x253   : > { %2298 = vperm.xlu1 %5166, %v6969_v49  }
 0x254   : > { %2460 = vperm.xlu0 %5172, %v6969_v49  }
 0x257   : > { %2313 = vrot.lane.b32.xlu1 %v6973_v23, %s5556_s17  ;;  %s5588_s17 = smov 115  }
 0x258   : > { %5173 = vset.pattern.permute.xlu0 %v5562_v56  ;;  %5167 = vset.pattern.permute.xlu1 %v5557_v8 }
 0x259   : > { %2498 = vperm.xlu0 %5173, %v6957_v34  }
 0x25b   : > { %2336 = vperm.xlu1 %5167, %v6957_v34  }
 0x25d   : > { %2531 = vrot.lane.b32.xlu0 %v6977_v37, %s5563_s15 }
 0x25e   : > { %5176 = vset.pattern.permute.xlu0 %v5564_v41 }
 0x25f   : > { %2367 = vrot.lane.b32.xlu1 %v6973_v23, %s5565_s11 }
 0x260   : > { %5170 = vset.pattern.permute.xlu1 %v5558_v54 }
 0x261   : > { %2568 = vperm.xlu0 %5176, %v6969_v49  }
 0x263   : > { %2369 = vrot.lane.b32.xlu1 %v6977_v37, %s5565_s11  ;;  %s5598_s11 = smov 1  }
 0x265   : > { %5177 = vset.pattern.permute.xlu0 %v5566_v60 }
 0x266   : > { %2606 = vperm.xlu0 %5177, %v6957_v34  }
 0x267   : > { %2406 = vperm.xlu1 %5170, %v6969_v49  }
 0x26a   : > { %2639 = vrot.lane.b32.xlu0 %v6977_v37, %s5567_s18 }
 0x26b   : > { %5180 = vset.pattern.permute.xlu0 %v5568_v40  ;;  %2421 = vrot.lane.b32.xlu1 %v6973_v23, %s5560_s4  ;;  %s5593_s4 = smov 3  }
 0x26c   : > { %5171 = vset.pattern.permute.xlu1 %v5561_v57  ;;  %v1835_v57 = vld [vmem:[#allocation10 + $0x1] ss:$8 sm:$0x3] }
 0x26e   : > { %2676 = vperm.xlu0 %5180, %v6969_v49  }
 0x26f   : > { %2444 = vperm.xlu1 %5171, %v6957_v34  }
 0x271   : > { %v7102_v24 = vpop.permute.xlu0 %1768 }
 0x272   : > { %5181 = vset.pattern.permute.xlu0 %v5569_v48  ;;  %v7039_v20 = vpop.permute.xlu1 %1795 }
 0x273   : > { %2714 = vperm.xlu0 %5181, %v6957_v34   ;;  %2475 = vrot.lane.b32.xlu1 %v6973_v23, %s5570_s8 }
 0x274   : > { %5174 = vset.pattern.permute.xlu1 %v5562_v56 }
 0x275   : > { %v1771_v45 = vpop.permute.xlu0 %1770 }
 0x276   : > { %v7045_v5 = vpop.permute.xlu1 %1812  ;;  %v1776_v8 = vsel %vm1774_vm3, %v1771_v45, %v7102_v24  ;;  %v1775_v54 = vsel %vm1774_vm3, %v7102_v24, %v1771_v45  ;;  %v1889_v24 = vld [vmem:[#allocation10 + $0x2] ss:$8 sm:$0x3]  ;;  %vm2641_vm3 = vcmp.lt.s32.totalorder %v7159_v62, 17 }
 0x277   : > { %2747 = vrot.lane.b32.xlu0 %v6977_v37, %s5571_s22  ;;  %2477 = vrot.lane.b32.xlu1 %v6977_v37, %s5570_s8  ;;  %v1789_v56 = vmul.f32 %v1782_v12, %v1776_v8  ;;  %s5602_s8 = smov 127  }
 0x278   : > { %5184 = vset.pattern.permute.xlu0 %v5572_v52 }
 0x279   : > { %v7116_v35 = vpop.permute.xlu0 %1827  ;;  %v1801_v45 = vrot.slane %v1789_v56, %v6961_v25  ;;  %v1818_v16 = vrot.slane %v1789_v56, %v6964_v15 }
 0x27a   : > { %v7049_v44 = vpop.permute.xlu1 %1829 }
 0x27b   : > { %2784 = vperm.xlu0 %5184, %v6969_v49   ;;  %2514 = vperm.xlu1 %5174, %v6969_v49  }
 0x27e   : > { %v7054_v33 = vpop.permute.xlu1 %1866 }
 0x27f   : > { %5185 = vset.pattern.permute.xlu0 %v5573_v38  ;;  %2529 = vrot.lane.b32.xlu1 %v6973_v23, %s5563_s15  ;;  %s5595_s15 = smov 111  }
 0x280   : > { %2822 = vperm.xlu0 %5185, %v6957_v34   ;;  %5175 = vset.pattern.permute.xlu1 %v5564_v41 }
 0x282   : > { %v7060_v21 = vpop.permute.xlu1 %1881 }
 0x283   : > { %2552 = vperm.xlu1 %5175, %v6957_v34  }
 0x284   : > { %2855 = vrot.lane.b32.xlu0 %v6977_v37, %s5574_s24 }
 0x285   : > { %5188 = vset.pattern.permute.xlu0 %v5575_v58 }
 0x286   : > { %v7065_v4 = vpop.permute.xlu1 %1904  ;;  %v7124_v32 = vpop.permute.xlu0 %1850 }
 0x287   : > { %2583 = vrot.lane.b32.xlu1 %v6973_v23, %s5576_s16 }
 0x288   : > { %2892 = vperm.xlu0 %5188, %v6969_v49   ;;  %5178 = vset.pattern.permute.xlu1 %v5566_v60 }
 0x28a   : > { %v7069_v55 = vpop.permute.xlu1 %1935  ;;  %v7136_v3 = vpop.permute.xlu0 %1883 }
 0x28b   : > { %2585 = vrot.lane.b32.xlu1 %v6977_v37, %s5576_s16  ;;  %v1886_v56 = vsel %vm1885_vm5, %v7060_v21, %v7136_v3  ;;  %v1887_v22 = vsel %vm1885_vm5, %v7136_v3, %v7060_v21  ;;  %s5608_s16 = smov 125   ;;  %vm2749_vm5 = vcmp.lt.s32.totalorder %v7159_v62, 15 }
 0x28c   : > { %5189 = vset.pattern.permute.xlu0 %v5577_v39 }
 0x28d   : > { %2930 = vperm.xlu0 %5189, %v6957_v34  }
 0x28e   : > { %v7073_v1 = vpop.permute.xlu1 %1937  ;;  %v7145_v50 = vpop.permute.xlu0 %1920 }
 0x28f   : > { %2622 = vperm.xlu1 %5178, %v6969_v49  }
 0x291   : > { %2963 = vrot.lane.b32.xlu0 %v6977_v37, %s5578_s30 }
 0x292   : > { %5192 = vset.pattern.permute.xlu0 %v5579_v0  ;;  %v7079_v28 = vpop.permute.xlu1 %1974 }
 0x293   : > { %2637 = vrot.lane.b32.xlu1 %v6973_v23, %s5567_s18  ;;  %v7152_v30 = vpop.permute.xlu0 %1958  ;;  %s5599_s18 = smov 109  }
 0x294   : > { %5179 = vset.pattern.permute.xlu1 %v5568_v40  ;;  %v1790_v40 = vmul.f32 %v1786_v2, %v1775_v54 }
 0x295   : > { %3000 = vperm.xlu0 %5192, %v6969_v49  }
 0x296   : > { %v7084_v18 = vpop.permute.xlu1 %1989  ;;  %v1805_v8 = vrot.slane %v1790_v40, %v6961_v25 }
 0x297   : > { %2660 = vperm.xlu1 %5179, %v6957_v34   ;;  %v7167_v51 = vpop.permute.xlu0 %1991 }
 0x299   : > { %5193 = vset.pattern.permute.xlu0 %v5580_v29 }
 0x29a   : > { %3038 = vperm.xlu0 %5193, %v6957_v34   ;;  %v7089_v14 = vpop.permute.xlu1 %2012 }
 0x29b   : > { %2691 = vrot.lane.b32.xlu1 %v6973_v23, %s5581_s27  ;;  %v7179_v41 = vpop.permute.xlu0 %2028 }
 0x29c   : > { %5182 = vset.pattern.permute.xlu1 %v5569_v48  ;;  %v1840_v48 = vrot.slane %v1835_v57, %v6961_v25 }
 0x29e   : > { %5196 = vset.pattern.permute.xlu0 %v5582_v42  ;;  %v7094_v11 = vpop.permute.xlu1 %2043 }
 0x29f   : > { %3086 = vperm.xlu0 %5196, %v6969_v49   ;;  %2693 = vrot.lane.b32.xlu1 %v6977_v37, %s5581_s27  ;;  %s5613_s27 = smov 114  }
 0x2a0   : > { %v7198_v12 = vpop.permute.xlu0 %2066 }
 0x2a2   : > { %v7098_v43 = vpop.permute.xlu1 %2045 }
 0x2a3   : > { %5197 = vset.pattern.permute.xlu0 %v5583_v46  ;;  %2730 = vperm.xlu1 %5182, %v6969_v49  }
 0x2a4   : > { %3124 = vperm.xlu0 %5197, %v6957_v34  }
 0x2a6   : > { %v7104_v9 = vpop.permute.xlu1 %2082 }
 0x2a7   : > { %2745 = vrot.lane.b32.xlu1 %v6973_v23, %s5571_s22  ;;  %s5603_s22 = smov 98  }
 0x2a8   : > { %3157 = vrot.lane.b32.xlu0 %v6977_v37, %s5584_s23  ;;  %5183 = vset.pattern.permute.xlu1 %v5572_v52  ;;  %v8236_v52 = vmov 32  }
 0x2a9   : > { %5200 = vset.pattern.permute.xlu0 %v5585_v31 }
 0x2aa   : > { %v7112_v47 = vpop.permute.xlu1 %2097 }
 0x2ab   : > { %2768 = vperm.xlu1 %5183, %v6957_v34  }
 0x2ac   : > { %3194 = vperm.xlu0 %5200, %v6969_v49  }
 0x2ae   : > { %v7118_v19 = vpop.permute.xlu1 %2120 }
 0x2af   : > { %2799 = vrot.lane.b32.xlu1 %v6973_v23, %s5587_s19 }
 0x2b0   : > { %5201 = vset.pattern.permute.xlu0 %v5586_v10  ;;  %5186 = vset.pattern.permute.xlu1 %v5573_v38  ;;  %v1844_v38 = vrot.slane %v1835_v57, %v6964_v15  ;;  %v1898_v57 = vrot.slane %v1889_v24, %v6964_v15 }
 0x2b1   : > { %3232 = vperm.xlu0 %5201, %v6957_v34  }
 0x2b2   : > { %v7126_v27 = vpop.permute.xlu1 %2151 }
 0x2b3   : > { %2801 = vrot.lane.b32.xlu1 %v6977_v37, %s5587_s19  ;;  %s5617_s19 = smov 112  }
 0x2b5   : > { %3265 = vrot.lane.b32.xlu0 %v6977_v37, %s5588_s17 }
 0x2b6   : > { %5204 = vset.pattern.permute.xlu0 %v5589_v63  ;;  %v7132_v36 = vpop.permute.xlu1 %2153 }
 0x2b7   : > { %2838 = vperm.xlu1 %5186, %v6969_v49  }
 0x2b9   : > { %3302 = vperm.xlu0 %5204, %v6969_v49  }
 0x2ba   : > { %v7138_v53 = vpop.permute.xlu1 %2190 }
 0x2bb   : > { %2853 = vrot.lane.b32.xlu1 %v6973_v23, %s5574_s24  ;;  %s5606_s24 = smov 96  }
 0x2bc   : > { %5187 = vset.pattern.permute.xlu1 %v5575_v58  ;;  %v1833_v58 = vsel %vm1831_vm4, %v7049_v44, %v7116_v35 }
 0x2bd   : > { %5205 = vset.pattern.permute.xlu0 %v8240_v59  ;;  %v1847_v54 = vmul.f32 %v1840_v48, %v1833_v58  ;;  %v1807_v48 = vmul.f32 %v1805_v8, %v7039_v20 }
 0x2be   : > { %3340 = vperm.xlu0 %5205, %v6957_v34   ;;  %v7147_v6 = vpop.permute.xlu1 %2205 }
 0x2bf   : > { %2876 = vperm.xlu1 %5187, %v6957_v34   ;;  %v1856_v58 = vrot.slane %v1847_v54, %v6961_v25 }
 0x2c2   : > { %3373 = vrot.lane.b32.xlu0 %v6977_v37, %s5591_s1  ;;  %v7154_v61 = vpop.permute.xlu1 %2228 }
 0x2c3   : > { %5208 = vset.pattern.permute.xlu0 %v8238_v26  ;;  %2907 = vrot.lane.b32.xlu1 %v6973_v23, %s5593_s4 }
 0x2c4   : > { %5190 = vset.pattern.permute.xlu1 %v5577_v39  ;;  %v1832_v39 = vsel %vm1831_vm4, %v7116_v35, %v7049_v44  ;;  %v1894_v35 = vrot.slane %v1889_v24, %v6961_v25  ;;  %v1902_v24 = vmul.f32 %v1898_v57, %v1886_v56  ;;  %vm2695_vm4 = vcmp.lt.s32.totalorder %v7159_v62, 16 }
 0x2c5   : > { %v1848_v44 = vmul.f32 %v1844_v38, %v1832_v39  ;;  %v1943_v39 = vld [vmem:[#allocation10 + $0x3] ss:$8 sm:$0x3] }
 0x2c6   : > { %3410 = vperm.xlu0 %5208, %v6969_v49   ;;  %v7163_v13 = vpop.permute.xlu1 %2259  ;;  %v1901_v3 = vmul.f32 %v1894_v35, %v1887_v22  ;;  %v1948_v8 = vrot.slane %v1943_v39, %v6961_v25  ;;  %v1872_v22 = vrot.slane %v1847_v54, %v6964_v15  ;;  %v1941_v35 = vsel %vm1939_vm6, %v7073_v1, %v7069_v55 }
 0x2c7   : > { %2909 = vrot.lane.b32.xlu1 %v6977_v37, %s5593_s4  ;;  %v1860_v21 = vrot.slane %v1848_v44, %v6961_v25  ;;  %v5600_v54 = vmov 34   ;;  %s5622_s4 = smov 79  }
 0x2ca   : > { %5209 = vset.pattern.permute.xlu0 %v8237_v17  ;;  %v7171_v7 = vpop.permute.xlu1 %2261  ;;  %v1823_v17 = vmul.f32 %v1818_v16, %v7045_v5  ;;  %v1862_v16 = vmul.f32 %v1860_v21, %v7124_v32 }
 0x2cb   : > { %3448 = vperm.xlu0 %5209, %v6957_v34   ;;  %2946 = vperm.xlu1 %5190, %v6969_v49  }
 0x2ce   : > { %v7181_v60 = vpop.permute.xlu1 %2298 }
 0x2cf   : > { %3481 = vrot.lane.b32.xlu0 %v6977_v37, %s5595_s15  ;;  %2961 = vrot.lane.b32.xlu1 %v6973_v23, %s5578_s30  ;;  %s5610_s30 = smov 94  }
 0x2d0   : > { %5212 = vset.pattern.permute.xlu0 %v8236_v52  ;;  %5191 = vset.pattern.permute.xlu1 %v5579_v0  ;;  %v1822_v0 = vrot.slane %v1790_v40, %v6964_v15  ;;  %v1806_v52 = vmul.f32 %v1801_v45, %v7039_v20  ;;  %v8239_v40 = vmov 33   ;;  %v7224_v45 = vpop.permute.xlu0 %2099  ;;  %v1861_v20 = vmul.f32 %v1856_v58, %v7124_v32 }
 0x2d1   : > { %v1910_v32 = vrot.slane %v1901_v3, %v6961_v25 }
 0x2d2   : > { %v7200_v2 = vpop.permute.xlu1 %2313  ;;  %v1824_v38 = vmul.f32 %v1822_v0, %v7045_v5  ;;  %v1825_v5 = vadd.f32 %v1823_v17, %v1806_v52  ;;  %v1952_v0 = vrot.slane %v1943_v39, %v6964_v15  ;;  %v1914_v17 = vrot.slane %v1902_v24, %v6961_v25 }
 0x2d3   : > { %3518 = vperm.xlu0 %5212, %v6969_v49   ;;  %2984 = vperm.xlu1 %5191, %v6957_v34   ;;  %v1940_v52 = vsel %vm1939_vm6, %v7069_v55, %v7073_v1  ;;  %v1877_v39 = vmul.f32 %v1872_v22, %v7054_v33  ;;  %v1915_v1 = vmul.f32 %v1910_v32, %v7065_v4  ;;  %vm2803_vm6 = vcmp.lt.s32.totalorder %v7159_v62, 14 }
 0x2d4   : > { %v1826_v59 = vadd.f32 %v1824_v38, %v1807_v48  ;;  %v1863_v57 = vadd.f32 %v1861_v20, %v1825_v5  ;;  %v7249_v48 = vmul.f32 %v1948_v8, %v1941_v35  ;;  %v1997_v38 = vld [vmem:[#allocation10 + $0x4] ss:$8 sm:$0x3]  ;;  %v7251_v58 = vpop.permute.xlu0 %2136  ;;  %v1956_v21 = vmul.f32 %v1952_v0, %v1940_v52 }
 0x2d5   : > { %v2002_v5 = vrot.slane %v1997_v38, %v6961_v25  ;;  %v1926_v0 = vrot.slane %v1901_v3, %v6964_v15  ;;  %v1930_v22 = vrot.slane %v1902_v24, %v6964_v15  ;;  %v1995_v3 = vsel %vm1993_vm7, %v7167_v51, %v7084_v18 }
 0x2d6   : > { %v7214_v26 = vpop.permute.xlu1 %2336  ;;  %v1864_v56 = vadd.f32 %v1862_v16, %v1826_v59  ;;  %v1916_v59 = vmul.f32 %v1914_v17, %v7065_v4  ;;  %v1879_v20 = vadd.f32 %v1877_v39, %v1863_v57  ;;  %v2006_v16 = vrot.slane %v1997_v38, %v6964_v15  ;;  %v2051_v57 = vld [vmem:[#allocation10 + $0x5] ss:$8 sm:$0x3] }
 0x2d7   : > { %5213 = vset.pattern.permute.xlu0 %v8239_v40  ;;  %3015 = vrot.lane.b32.xlu1 %v6973_v23, %s5598_s11  ;;  %v1964_v35 = vrot.slane %v7249_v48, %v6961_v25  ;;  %v1994_v4 = vsel %vm1993_vm7, %v7084_v18, %v7167_v51  ;;  %v8241_v24 = vmov 35   ;;  %v1932_v38 = vmul.f32 %v1930_v22, %v7145_v50 }
 0x2d8   : > { %3556 = vperm.xlu0 %5213, %v6957_v34   ;;  %5194 = vset.pattern.permute.xlu1 %v5580_v29  ;;  %v1876_v29 = vrot.slane %v1848_v44, %v6964_v15  ;;  %v7268_v52 = vpop.permute.xlu0 %2174  ;;  %v1917_v32 = vadd.f32 %v1915_v1, %v1879_v20  ;;  %v2009_v39 = vmul.f32 %v2002_v5, %v1995_v3  ;;  %v5604_v22 = vmov 36  }
 0x2d9   : > { %v2010_v18 = vmul.f32 %v2006_v16, %v1994_v4  ;;  %v2056_v20 = vrot.slane %v2051_v57, %v6961_v25  ;;  %v1984_v5 = vrot.slane %v1956_v21, %v6964_v15  ;;  %vm2857_vm7 = vcmp.lt.s32.totalorder %v7159_v62, 13 }
 0x2da   : > { %v7231_v40 = vpop.permute.xlu1 %2367  ;;  %v1878_v55 = vmul.f32 %v1876_v29, %v7054_v33  ;;  %v1968_v29 = vrot.slane %v1956_v21, %v6961_v25  ;;  %v2018_v16 = vrot.slane %v2009_v39, %v6961_v25 }
 0x2db   : > { %3017 = vrot.lane.b32.xlu1 %v6977_v37, %s5598_s11  ;;  %s5626_s11 = smov 77  }
 0x2dc   : > { %3589 = vrot.lane.b32.xlu0 %v6977_v37, %s5599_s18  ;;  %v1880_v8 = vadd.f32 %v1878_v55, %v1864_v56  ;;  %v1931_v56 = vmul.f32 %v1926_v0, %v7145_v50  ;;  %v1970_v55 = vmul.f32 %v1968_v29, %v7152_v30  ;;  %v1980_v50 = vrot.slane %v7249_v48, %v6964_v15  ;;  %v2105_v29 = vld [vmem:[#allocation10 + $0x6] ss:$8 sm:$0x3] }
 0x2dd   : > { %5216 = vset.pattern.permute.xlu0 %v5600_v54  ;;  %v2022_v0 = vrot.slane %v2010_v18, %v6961_v25  ;;  %v2048_v48 = vsel %vm2047_vm8, %v7094_v11, %v7098_v43 }
 0x2de   : > { %v7253_v44 = vpop.permute.xlu1 %2369  ;;  %v1918_v17 = vadd.f32 %v1916_v59, %v1880_v8  ;;  %v1933_v1 = vadd.f32 %v1931_v56, %v1917_v32  ;;  %v2060_v8 = vrot.slane %v2051_v57, %v6964_v15  ;;  %v1985_v3 = vmul.f32 %v1980_v50, %v7079_v28 }
 0x2df   : > { %3054 = vperm.xlu1 %5194, %v6969_v49   ;;  %v1986_v32 = vmul.f32 %v1984_v5, %v7079_v28  ;;  %v2110_v57 = vrot.slane %v2105_v29, %v6961_v25  ;;  %v2103_v28 = vsel %vm2101_vm9, %v7224_v45, %v7112_v47  ;;  %v5605_v5 = vmov 37  }
 0x2e0   : > { %3626 = vperm.xlu0 %5216, %v6969_v49   ;;  %v1934_v59 = vadd.f32 %v1932_v38, %v1918_v17  ;;  %v2064_v17 = vmul.f32 %v2060_v8, %v2048_v48  ;;  %v2102_v8 = vsel %vm2101_vm9, %v7112_v47, %v7224_v45  ;;  %vm2965_vm9 = vcmp.lt.s32.totalorder %v7159_v62, 2 }
 0x2e2   : > { %v7270_v33 = vpop.permute.xlu1 %2406  ;;  %v2076_v50 = vrot.slane %v2064_v17, %v6961_v25 }
 0x2e3   : > { %5195 = vset.pattern.permute.xlu1 %v5582_v42  ;;  %v1969_v42 = vmul.f32 %v1964_v35, %v7152_v30  ;;  %v2049_v30 = vsel %vm2047_vm8, %v7098_v43, %v7094_v11  ;;  %v2023_v11 = vmul.f32 %v2018_v16, %v7089_v14  ;;  %v2024_v43 = vmul.f32 %v2022_v0, %v7089_v14 }
 0x2e4   : > { %5217 = vset.pattern.permute.xlu0 %v8241_v24  ;;  %3070 = vperm.xlu1 %5195, %v6957_v34   ;;  %v7294_v24 = vpop.permute.xlu0 %2207  ;;  %v2063_v4 = vmul.f32 %v2056_v20, %v2049_v30  ;;  %v2038_v20 = vrot.slane %v2010_v18, %v6964_v15  ;;  %v7343_v0 = vmul.f32 %v2110_v57, %v2103_v28  ;;  %vm2911_vm8 = vcmp.lt.s32.totalorder %v7159_v62, 3 }
 0x2e5   : > { %3664 = vperm.xlu0 %5217, %v6957_v34   ;;  %v1971_v35 = vadd.f32 %v1969_v42, %v1933_v1  ;;  %v2114_v1 = vrot.slane %v2105_v29, %v6964_v15  ;;  %v2078_v29 = vmul.f32 %v2076_v50, %v7198_v12 }
 0x2e6   : > { %v7288_v51 = vpop.permute.xlu1 %2421  ;;  %v2072_v14 = vrot.slane %v2063_v4, %v6961_v25  ;;  %v2040_v45 = vmul.f32 %v2038_v20, %v7179_v41  ;;  %v2088_v57 = vrot.slane %v2063_v4, %v6964_v15  ;;  %v2157_v4 = vsel %vm2155_vm10, %v7132_v36, %v7126_v27  ;;  %v2213_v20 = vld [vmem:[#allocation10 + $0x10] ss:$8 sm:$0x3] }
 0x2e7   : > { %v1987_v42 = vadd.f32 %v1985_v3, %v1971_v35  ;;  %v7350_v35 = vmul.f32 %v2114_v1, %v2102_v8  ;;  %v5607_v1 = vmov 38  }
 0x2e8   : > { %3101 = vrot.lane.b32.xlu1 %v6973_v23, %s5602_s8  ;;  %v7324_v56 = vpop.permute.xlu0 %2244 }
 0x2e9   : > { %5198 = vset.pattern.permute.xlu1 %v5583_v46  ;;  %3697 = vrot.lane.b32.xlu0 %v6977_v37, %s5603_s22  ;;  %v1972_v46 = vadd.f32 %v1970_v55, %v1934_v59  ;;  %v2034_v59 = vrot.slane %v2009_v39, %v6964_v15  ;;  %v2025_v30 = vadd.f32 %v2023_v11, %v1987_v42  ;;  %v2159_v39 = vld [vmem:[#allocation10 + $0x7] ss:$8 sm:$0x3] }
 0x2ea   : > { %v7313_v21 = vpop.permute.xlu1 %2444  ;;  %5220 = vset.pattern.permute.xlu0 %v5604_v22  ;;  %v2164_v3 = vrot.slane %v2159_v39, %v6961_v25 }
 0x2eb   : > { %v1988_v55 = vadd.f32 %v1986_v32, %v1972_v46  ;;  %v2039_v47 = vmul.f32 %v2034_v59, %v7179_v41  ;;  %v2077_v46 = vmul.f32 %v2072_v14, %v7198_v12  ;;  %v2168_v32 = vrot.slane %v2159_v39, %v6964_v15 }
 0x2ec   : > { %3103 = vrot.lane.b32.xlu1 %v6977_v37, %s5602_s8  ;;  %v7345_v18 = vpop.permute.xlu0 %2282  ;;  %v2126_v41 = vrot.slane %v7343_v0, %v6961_v25  ;;  %v2092_v12 = vrot.slane %v2064_v17, %v6964_v15  ;;  %v2093_v14 = vmul.f32 %v2088_v57, %v7104_v9  ;;  %v2171_v50 = vmul.f32 %v2164_v3, %v2157_v4  ;;  %s5629_s8 = smov 95  }
 0x2ed   : > { %3734 = vperm.xlu0 %5220, %v6969_v49   ;;  %v2026_v16 = vadd.f32 %v2024_v43, %v1988_v55  ;;  %v2041_v11 = vadd.f32 %v2039_v47, %v2025_v30  ;;  %v2130_v55 = vrot.slane %v7350_v35, %v6961_v25  ;;  %v2142_v47 = vrot.slane %v7343_v0, %v6964_v15 }
 0x2ee   : > { %v7326_v38 = vpop.permute.xlu1 %2475  ;;  %v2131_v8 = vmul.f32 %v2126_v41, %v7118_v19  ;;  %v2222_v3 = vrot.slane %v2213_v20, %v6964_v15  ;;  %v2180_v0 = vrot.slane %v2171_v50, %v6961_v25  ;;  %v5609_v41 = vmov 39  }
 0x2ef   : > { %v2042_v43 = vadd.f32 %v2040_v45, %v2026_v16  ;;  %v2079_v28 = vadd.f32 %v2077_v46, %v2041_v11  ;;  %v2218_v45 = vrot.slane %v2213_v20, %v6961_v25  ;;  %v2210_v11 = vsel %vm2209_vm11, %v7147_v6, %v7294_v24 }
 0x2f0   : > { %3140 = vperm.xlu1 %5198, %v6969_v49   ;;  %v7381_v59 = vpop.permute.xlu0 %2315 }
 0x2f1   : > { %5221 = vset.pattern.permute.xlu0 %v5605_v5  ;;  %v2080_v17 = vadd.f32 %v2078_v29, %v2042_v43  ;;  %v2095_v39 = vadd.f32 %v2093_v14, %v2079_v28  ;;  %v2146_v29 = vrot.slane %v7350_v35, %v6964_v15  ;;  %v2267_v35 = vld [vmem:[#allocation10 + $0x11] ss:$8 sm:$0x3]  ;;  %v2185_v28 = vmul.f32 %v2180_v0, %v7268_v52 }
 0x2f2   : > { %v7347_v48 = vpop.permute.xlu1 %2477  ;;  %3772 = vperm.xlu0 %5221, %v6957_v34   ;;  %v2276_v20 = vrot.slane %v2267_v35, %v6964_v15 }
 0x2f4   : > { %3155 = vrot.lane.b32.xlu1 %v6973_v23, %s5584_s23  ;;  %v7410_v43 = vpop.permute.xlu0 %2352  ;;  %s5614_s23 = smov 83  }
 0x2f5   : > { %5199 = vset.pattern.permute.xlu1 %v5585_v31  ;;  %v2156_v31 = vsel %vm2155_vm10, %v7126_v27, %v7132_v36  ;;  %v2094_v27 = vmul.f32 %v2092_v12, %v7104_v9  ;;  %v2132_v36 = vmul.f32 %v2130_v55, %v7118_v19  ;;  %v2211_v9 = vsel %vm2209_vm11, %v7294_v24, %v7147_v6 }
 0x2f6   : > { %v7365_v42 = vpop.permute.xlu1 %2514  ;;  %3805 = vrot.lane.b32.xlu0 %v6977_v37, %s5606_s24  ;;  %v2172_v30 = vmul.f32 %v2168_v32, %v2156_v31  ;;  %v2133_v19 = vadd.f32 %v2131_v8, %v2095_v39  ;;  %v2225_v55 = vmul.f32 %v2218_v45, %v2211_v9  ;;  %v2148_v6 = vmul.f32 %v2146_v29, %v7251_v58 }
 0x2f7   : > { %5224 = vset.pattern.permute.xlu0 %v5607_v1  ;;  %v2096_v46 = vadd.f32 %v2094_v27, %v2080_v17  ;;  %v2226_v24 = vmul.f32 %v2222_v3, %v2210_v11  ;;  %v2272_v31 = vrot.slane %v2267_v35, %v6961_v25  ;;  %v2196_v27 = vrot.slane %v2171_v50, %v6964_v15  ;;  %v2321_v3 = vld [vmem:[#allocation10 + $0x12] ss:$8 sm:$0x3] }
 0x2f8   : > { %3178 = vperm.xlu1 %5199, %v6957_v34   ;;  %v2184_v32 = vrot.slane %v2172_v30, %v6961_v25  ;;  %v2264_v39 = vsel %vm2263_vm12, %v7163_v13, %v7171_v7  ;;  %v5611_v50 = vmov 40   ;;  %v2326_v11 = vrot.slane %v2321_v3, %v6961_v25 }
 0x2f9   : > { %v2134_v12 = vadd.f32 %v2132_v36, %v2096_v46  ;;  %v2234_v36 = vrot.slane %v2225_v55, %v6961_v25  ;;  %v2330_v35 = vrot.slane %v2321_v3, %v6964_v15  ;;  %vm3019_vm10 = vcmp.lt.s32.totalorder %v7159_v62, 1 }
 0x2fa   : > { %v7387_v16 = vpop.permute.xlu1 %2529  ;;  %3842 = vperm.xlu0 %5224, %v6969_v49   ;;  %v2186_v17 = vmul.f32 %v2184_v32, %v7268_v52  ;;  %v2200_v52 = vrot.slane %v2172_v30, %v6964_v15  ;;  %v2280_v30 = vmul.f32 %v2276_v20, %v2264_v39  ;;  %v2375_v20 = vld [vmem:[#allocation10 + $0x13] ss:$8 sm:$0x3]  ;;  %vm3105_vm11 = vcmp.lt.s32.totalorder %v7159_v62, 127 }
 0x2fb   : > { %v2150_v8 = vadd.f32 %v2148_v6, %v2134_v12 }
 0x2fc   : > { %3209 = vrot.lane.b32.xlu1 %v6973_v23, %s5608_s16 }
 0x2fd   : > { %5202 = vset.pattern.permute.xlu1 %v5586_v10  ;;  %v2147_v10 = vmul.f32 %v2142_v47, %v7251_v58  ;;  %v2265_v58 = vsel %vm2263_vm12, %v7171_v7, %v7163_v13  ;;  %v2238_v47 = vrot.slane %v2226_v24, %v6961_v25  ;;  %v2188_v46 = vadd.f32 %v2186_v17, %v2150_v8 }
 0x2fe   : > { %v7412_v57 = vpop.permute.xlu1 %2552  ;;  %5225 = vset.pattern.permute.xlu0 %v5609_v41  ;;  %v2279_v29 = vmul.f32 %v2272_v31, %v2265_v58  ;;  %v2202_v13 = vmul.f32 %v2200_v52, %v7138_v53  ;;  %v2239_v7 = vmul.f32 %v2234_v36, %v7154_v61  ;;  %v2254_v31 = vrot.slane %v2226_v24, %v6964_v15 }
 0x2ff   : > { %3880 = vperm.xlu0 %5225, %v6957_v34   ;;  %v2149_v4 = vadd.f32 %v2147_v10, %v2133_v19  ;;  %v7424_v34 = vpop.permute.xlu0 %2390  ;;  %v2201_v19 = vmul.f32 %v2196_v27, %v7138_v53  ;;  %v2240_v32 = vmul.f32 %v2238_v47, %v7154_v61  ;;  %v2250_v53 = vrot.slane %v2225_v55, %v6964_v15 }
 0x300   : > { %3211 = vrot.lane.b32.xlu1 %v6977_v37, %s5608_s16  ;;  %v2204_v12 = vadd.f32 %v2202_v13, %v2188_v46  ;;  %v2288_v10 = vrot.slane %v2279_v29, %v6961_v25  ;;  %v2318_v61 = vsel %vm2317_vm13, %v7200_v2, %v7381_v59  ;;  %v2380_v46 = vrot.slane %v2375_v20, %v6961_v25  ;;  %s5632_s16 = smov 80  }
 0x301   : > { %v2187_v45 = vadd.f32 %v2185_v28, %v2149_v4  ;;  %v2292_v4 = vrot.slane %v2280_v30, %v6961_v25  ;;  %v2319_v28 = vsel %vm2317_vm13, %v7381_v59, %v7200_v2  ;;  %v2255_v8 = vmul.f32 %v2250_v53, %v7324_v56 }
 0x302   : > { %v7426_v14 = vpop.permute.xlu1 %2583  ;;  %v2242_v55 = vadd.f32 %v2240_v32, %v2204_v12  ;;  %v2293_v24 = vmul.f32 %v2288_v10, %v7345_v18  ;;  %v2333_v27 = vmul.f32 %v2326_v11, %v2319_v28  ;;  %v2334_v58 = vmul.f32 %v2330_v35, %v2318_v61 }
 0x303   : > { %3913 = vrot.lane.b32.xlu0 %v6977_v37, %s5610_s30  ;;  %v7451_v0 = vpop.permute.xlu0 %2423  ;;  %v5612_v2 = vmov 41   ;;  %v2256_v59 = vmul.f32 %v2254_v31, %v7324_v56  ;;  %v2294_v39 = vmul.f32 %v2292_v4, %v7345_v18  ;;  %v2384_v13 = vrot.slane %v2375_v20, %v6964_v15 }
 0x304   : > { %3248 = vperm.xlu1 %5202, %v6969_v49   ;;  %5228 = vset.pattern.permute.xlu0 %v5611_v50  ;;  %v2373_v56 = vsel %vm2371_vm14, %v7253_v44, %v7231_v40  ;;  %v8356_v18 = vmov 29   ;;  %v2346_v32 = vrot.slane %v2334_v58, %v6961_v25  ;;  %v2372_v11 = vsel %vm2371_vm14, %v7231_v40, %v7253_v44 }
 0x305   : > { %v2258_v3 = vadd.f32 %v2256_v59, %v2242_v55  ;;  %v2387_v10 = vmul.f32 %v2380_v46, %v2373_v56  ;;  %v2388_v4 = vmul.f32 %v2384_v13, %v2372_v11  ;;  %v2426_v59 = vsel %vm2425_vm15, %v7288_v51, %v7451_v0 }
 0x306   : > { %v7444_v9 = vpop.permute.xlu1 %2585  ;;  %v2348_v28 = vmul.f32 %v2346_v32, %v7214_v26  ;;  %v8357_v11 = vmov 30   ;;  %vm3159_vm12 = vcmp.lt.s32.totalorder %v7159_v62, 126  ;;  %vm3213_vm13 = vcmp.lt.s32.totalorder %v7159_v62, 125 }
 0x307   : > { %3950 = vperm.xlu0 %5228, %v6969_v49   ;;  %v2203_v49 = vadd.f32 %v2201_v19, %v2187_v45  ;;  %v7475_v52 = vpop.permute.xlu0 %2460  ;;  %v2304_v45 = vrot.slane %v2279_v29, %v6964_v15  ;;  %v2308_v19 = vrot.slane %v2280_v30, %v6964_v15  ;;  %v2342_v29 = vrot.slane %v2333_v27, %v6961_v25  ;;  %v2429_v30 = vld [vmem:[#allocation10 + $0x14] ss:$8 sm:$0x3] }
 0x308   : > { %3263 = vrot.lane.b32.xlu1 %v6973_v23, %s5588_s17  ;;  %v2296_v12 = vadd.f32 %v2294_v39, %v2258_v3  ;;  %v2434_v61 = vrot.slane %v2429_v30, %v6961_v25  ;;  %v2427_v39 = vsel %vm2425_vm15, %v7451_v0, %v7288_v51  ;;  %v2483_v3 = vld [vmem:[#allocation10 + $0x15] ss:$8 sm:$0x3]  ;;  %s5618_s17 = smov 81   ;;  %vm3267_vm14 = vcmp.lt.s32.totalorder %v7159_v62, 115 }
 0x309   : > { %5203 = vset.pattern.permute.xlu1 %v5589_v63  ;;  %v2241_v17 = vadd.f32 %v2239_v7, %v2203_v49  ;;  %v7469_v63 = vld [vmem:[#allocation7] sm:$0xf]  ;;  %v2309_v53 = vmul.f32 %v2304_v45, %v7181_v60  ;;  %v2310_v31 = vmul.f32 %v2308_v19, %v7181_v60  ;;  %v2347_v44 = vmul.f32 %v2342_v29, %v7214_v26  ;;  %v7522_v45 = vld [vmem:[#allocation7 + $0x4] sm:$0xf] }
 0x30a   : > { %v7461_v6 = vpop.permute.xlu1 %2622  ;;  %v2358_v60 = vrot.slane %v2333_v27, %v6964_v15  ;;  %v5615_v26 = vmov 42   ;;  %v2400_v27 = vrot.slane %v2388_v4, %v6961_v25  ;;  %v2441_v13 = vmul.f32 %v2434_v61, %v2427_v39 }
 0x30b   : > { %5229 = vset.pattern.permute.xlu0 %v5612_v2  ;;  %v2257_v47 = vadd.f32 %v2255_v8, %v2241_v17  ;;  %v7499_v35 = vpop.permute.xlu0 %2498  ;;  %v2438_v17 = vrot.slane %v2429_v30, %v6964_v15  ;;  %v2312_v20 = vadd.f32 %v2310_v31, %v2296_v12  ;;  %v2362_v8 = vrot.slane %v2334_v58, %v6964_v15 }
 0x30c   : > { %3286 = vperm.xlu1 %5203, %v7469_v63   ;;  %3988 = vperm.xlu0 %5229, %v7469_v63   ;;  %v2363_v51 = vmul.f32 %v2358_v60, %v7410_v43  ;;  %v2488_v29 = vrot.slane %v2483_v3, %v6961_v25  ;;  %v2492_v32 = vrot.slane %v2483_v3, %v6964_v15  ;;  %v5616_v39 = vmov 43  }
 0x30d   : > { %v2295_v7 = vadd.f32 %v2293_v24, %v2257_v47  ;;  %v2396_v24 = vrot.slane %v2387_v10, %v6961_v25  ;;  %v2350_v46 = vadd.f32 %v2348_v28, %v2312_v20  ;;  %v2442_v56 = vmul.f32 %v2438_v17, %v2426_v59  ;;  %v2537_v20 = vld [vmem:[#allocation10 + $0x16] ss:$8 sm:$0x3] }
 0x30e   : > { %v7477_v36 = vpop.permute.xlu1 %2637  ;;  %v2364_v0 = vmul.f32 %v2362_v8, %v7410_v43  ;;  %v2416_v43 = vrot.slane %v2388_v4, %v6964_v15  ;;  %v2481_v28 = vsel %vm2479_vm0, %v7347_v48, %v7326_v38  ;;  %v2546_v3 = vrot.slane %v2537_v20, %v6964_v15 }
 0x30f   : > { %v2311_v40 = vadd.f32 %v2309_v53, %v2295_v7  ;;  %v2532_v47 = vpop.permute.xlu0 %2531  ;;  %v2402_v7 = vmul.f32 %v2400_v27, %v7424_v34  ;;  %v2412_v53 = vrot.slane %v2387_v10, %v6964_v15  ;;  %v2495_v60 = vmul.f32 %v2488_v29, %v2481_v28 }
 0x310   : > { %3317 = vrot.lane.b32.xlu1 %v6973_v23, %s5613_s27  ;;  %4021 = vrot.lane.b32.xlu0 %v6977_v37, %s5614_s23  ;;  %v2366_v12 = vadd.f32 %v2364_v0, %v2350_v46  ;;  %v2542_v46 = vrot.slane %v2537_v20, %v6961_v25  ;;  %v2466_v0 = vrot.slane %v2441_v13, %v6964_v15  ;;  %vm3321_vm15 = vcmp.lt.s32.totalorder %v7159_v62, 114 }
 0x311   : > { %5206 = vset.pattern.permute.xlu1 %v8356_v18  ;;  %5232 = vset.pattern.permute.xlu0 %v5615_v26  ;;  %v2349_v58 = vadd.f32 %v2347_v44, %v2311_v40  ;;  %v2401_v18 = vmul.f32 %v2396_v24, %v7424_v34  ;;  %v2450_v40 = vrot.slane %v2441_v13, %v6961_v25 }
 0x312   : > { %v7501_v49 = vpop.permute.xlu1 %2660  ;;  %v2454_v34 = vrot.slane %v2442_v56, %v6961_v25  ;;  %v2480_v44 = vsel %vm2479_vm0, %v7326_v38, %v7347_v48  ;;  %v2404_v10 = vadd.f32 %v2402_v7, %v2366_v12  ;;  %v2417_v4 = vmul.f32 %v2412_v53, %v7270_v33  ;;  %v2591_v12 = vld [vmem:[#allocation10 + $0x17] ss:$8 sm:$0x3] }
 0x313   : > { %v2365_v30 = vadd.f32 %v2363_v51, %v2349_v58  ;;  %v7542_v31 = vpop.permute.xlu0 %2568  ;;  %v2496_v8 = vmul.f32 %v2492_v32, %v2480_v44  ;;  %v2418_v38 = vmul.f32 %v2416_v43, %v7270_v33  ;;  %v2455_v48 = vmul.f32 %v2450_v40, %v7313_v21 }
 0x314   : > { %3319 = vrot.lane.b32.xlu1 %v6977_v37, %s5613_s27  ;;  %4058 = vperm.xlu0 %5232, %v7522_v45   ;;  %v2456_v27 = vmul.f32 %v2454_v34, %v7313_v21  ;;  %v2535_v33 = vsel %vm2533_vm1, %v2532_v47, %v7387_v16  ;;  %v8358_v21 = vmov 31   ;;  %v2504_v7 = vrot.slane %v2495_v60, %v6961_v25 }
 0x315   : > { %v2403_v17 = vadd.f32 %v2401_v18, %v2365_v30  ;;  %v2420_v51 = vadd.f32 %v2418_v38, %v2404_v10  ;;  %v2470_v18 = vrot.slane %v2442_v56, %v6964_v15  ;;  %v2508_v29 = vrot.slane %v2496_v8, %v6961_v25 }
 0x316   : > { %v7513_v55 = vpop.permute.xlu1 %2691  ;;  %v2534_v32 = vsel %vm2533_vm1, %v7387_v16, %v2532_v47  ;;  %v2549_v56 = vmul.f32 %v2542_v46, %v2535_v33  ;;  %v2471_v43 = vmul.f32 %v2466_v0, %v7475_v52  ;;  %v2509_v16 = vmul.f32 %v2504_v7, %v7499_v35 }
 0x317   : > { %v7555_v24 = vpop.permute.xlu0 %2606  ;;  %v2419_v58 = vadd.f32 %v2417_v4, %v2403_v17  ;;  %v2458_v13 = vadd.f32 %v2456_v27, %v2420_v51  ;;  %v2472_v40 = vmul.f32 %v2470_v18, %v7475_v52  ;;  %v2550_v34 = vmul.f32 %v2546_v3, %v2534_v32 }
 0x318   : > { %3356 = vperm.xlu1 %5206, %v7522_v45   ;;  %5233 = vset.pattern.permute.xlu0 %v5616_v39  ;;  %v2510_v47 = vmul.f32 %v2508_v29, %v7499_v35  ;;  %v2596_v44 = vrot.slane %v2591_v12, %v6961_v25  ;;  %v2600_v28 = vrot.slane %v2591_v12, %v6964_v15  ;;  %v8359_v32 = vmov 32  }
 0x319   : > { %4096 = vperm.xlu0 %5233, %v7469_v63   ;;  %v2457_v30 = vadd.f32 %v2455_v48, %v2419_v58  ;;  %v2474_v20 = vadd.f32 %v2472_v40, %v2458_v13  ;;  %v2589_v52 = vsel %vm2587_vm2, %v7444_v9, %v7426_v14  ;;  %v2520_v4 = vrot.slane %v2495_v60, %v6964_v15  ;;  %v2645_v60 = vld [vmem:[#allocation10 + $0x20] ss:$8 sm:$0x3] }
 0x31a   : > { %v7528_v19 = vpop.permute.xlu1 %2693  ;;  %v2524_v38 = vrot.slane %v2496_v8, %v6964_v15  ;;  %v2558_v48 = vrot.slane %v2549_v56, %v6961_v25  ;;  %v2588_v35 = vsel %vm2587_vm2, %v7426_v14, %v7444_v9  ;;  %v2562_v27 = vrot.slane %v2550_v34, %v6961_v25 }
 0x31b   : > { %v2640_v53 = vpop.permute.xlu0 %2639  ;;  %v2473_v10 = vadd.f32 %v2471_v43, %v2457_v30  ;;  %v5619_v58 = vmov 44   ;;  %v2512_v3 = vadd.f32 %v2510_v47, %v2474_v20  ;;  %v2603_v51 = vmul.f32 %v2596_v44, %v2589_v52 }
 0x31c   : > { %3371 = vrot.lane.b32.xlu1 %v6973_v23, %s5591_s1  ;;  %v2604_v18 = vmul.f32 %v2600_v28, %v2588_v35  ;;  %v2525_v14 = vmul.f32 %v2520_v4, %v7365_v42  ;;  %v2526_v9 = vmul.f32 %v2524_v38, %v7365_v42  ;;  %v2563_v33 = vmul.f32 %v2558_v48, %v7412_v57  ;;  %s5621_s1 = smov 110  }
 0x31d   : > { %5207 = vset.pattern.permute.xlu1 %v8357_v11  ;;  %4129 = vrot.lane.b32.xlu0 %v6977_v37, %s5618_s17  ;;  %v2511_v46 = vadd.f32 %v2509_v16, %v2473_v10  ;;  %v2650_v7 = vrot.slane %v2645_v60, %v6961_v25  ;;  %v2654_v29 = vrot.slane %v2645_v60, %v6964_v15  ;;  %v5620_v48 = vmov 45  }
 0x31e   : > { %v7544_v61 = vpop.permute.xlu1 %2730  ;;  %5236 = vset.pattern.permute.xlu0 %v5619_v58  ;;  %v2528_v13 = vadd.f32 %v2526_v9, %v2512_v3  ;;  %v2574_v12 = vrot.slane %v2549_v56, %v6964_v15  ;;  %v2612_v42 = vrot.slane %v2603_v51, %v6961_v25  ;;  %v2578_v16 = vrot.slane %v2550_v34, %v6964_v15  ;;  %v2699_v56 = vld [vmem:[#allocation10 + $0x21] ss:$8 sm:$0x3] }
 0x31f   : > { %v7606_v0 = vpop.permute.xlu0 %2676  ;;  %v2527_v30 = vadd.f32 %v2525_v14, %v2511_v46  ;;  %v2642_v47 = vsel %vm2641_vm3, %v7477_v36, %v2640_v53  ;;  %v2643_v44 = vsel %vm2641_vm3, %v2640_v53, %v7477_v36  ;;  %v2704_v46 = vrot.slane %v2699_v56, %v6961_v25 }
 0x320   : > { %3394 = vperm.xlu1 %5207, %v7469_v63   ;;  %v2579_v20 = vmul.f32 %v2574_v12, %v7542_v31  ;;  %v2617_v52 = vmul.f32 %v2612_v42, %v7555_v24  ;;  %v2657_v4 = vmul.f32 %v2650_v7, %v2643_v44  ;;  %v2658_v38 = vmul.f32 %v2654_v29, %v2642_v47  ;;  %v2753_v29 = vld [vmem:[#allocation10 + $0x22] ss:$8 sm:$0x3] }
 0x321   : > { %4166 = vperm.xlu0 %5236, %v7522_v45   ;;  %v2565_v28 = vadd.f32 %v2563_v33, %v2527_v30  ;;  %v2580_v36 = vmul.f32 %v2578_v16, %v7542_v31  ;;  %v2708_v3 = vrot.slane %v2699_v56, %v6964_v15  ;;  %v2632_v9 = vrot.slane %v2604_v18, %v6964_v15 }
 0x322   : > { %v7557_v59 = vpop.permute.xlu1 %2745  ;;  %v2696_v31 = vsel %vm2695_vm4, %v7513_v55, %v7528_v19  ;;  %v2670_v7 = vrot.slane %v2658_v38, %v6961_v25  ;;  %v2762_v47 = vrot.slane %v2753_v29, %v6964_v15  ;;  %v2686_v56 = vrot.slane %v2658_v38, %v6964_v15  ;;  %v2807_v38 = vld [vmem:[#allocation10 + $0x23] ss:$8 sm:$0x3] }
 0x323   : > { %v7623_v43 = vpop.permute.xlu0 %2714  ;;  %v2581_v35 = vadd.f32 %v2579_v20, %v2565_v28  ;;  %v2712_v12 = vmul.f32 %v2708_v3, %v2696_v31  ;;  %v2634_v42 = vmul.f32 %v2632_v9, %v7461_v6  ;;  %vm3375_vm0 = vcmp.lt.s32.totalorder %v7159_v62, 113 }
 0x324   : > { %3425 = vrot.lane.b32.xlu1 %v6973_v23, %s5617_s19  ;;  %vm3429_vm1 = vcmp.lt.s32.totalorder %v7159_v62, 112  ;;  %vm3483_vm2 = vcmp.lt.s32.totalorder %v7159_v62, 111  ;;  %vm3537_vm3 = vcmp.lt.s32.totalorder %v7159_v62, 110 }
 0x325   : > { %5210 = vset.pattern.permute.xlu1 %v8358_v21  ;;  %v2564_v21 = vmul.f32 %v2562_v27, %v7412_v57  ;;  %v2616_v57 = vrot.slane %v2604_v18, %v6961_v25  ;;  %5237 = vset.pattern.permute.xlu0 %v5620_v48  ;;  %v2628_v27 = vrot.slane %v2603_v51, %v6964_v15  ;;  %v8360_v51 = vmov 33  }
 0x326   : > { %v7578_v11 = vpop.permute.xlu1 %2768  ;;  %4204 = vperm.xlu0 %5237, %v7469_v63   ;;  %v2619_v33 = vadd.f32 %v2617_v52, %v2581_v35  ;;  %v2724_v52 = vrot.slane %v2712_v12, %v6961_v25 }
 0x327   : > { %v2566_v10 = vadd.f32 %v2564_v21, %v2528_v13  ;;  %v2618_v53 = vmul.f32 %v2616_v57, %v7555_v24  ;;  %v2748_v60 = vpop.permute.xlu0 %2747  ;;  %v2697_v24 = vsel %vm2695_vm4, %v7528_v19, %v7513_v55  ;;  %v2666_v21 = vrot.slane %v2657_v4, %v6961_v25 }
 0x328   : > { %3427 = vrot.lane.b32.xlu1 %v6977_v37, %s5617_s19  ;;  %v2633_v30 = vmul.f32 %v2628_v27, %v7461_v6  ;;  %v2711_v13 = vmul.f32 %v2704_v46, %v2697_v24  ;;  %v2758_v55 = vrot.slane %v2753_v29, %v6961_v25  ;;  %v2672_v57 = vmul.f32 %v2670_v7, %v7501_v49  ;;  %s8363_s19 = sld [smem:[#allocation44_spill]] }
 0x329   : > { %v2582_v14 = vadd.f32 %v2580_v36, %v2566_v10  ;;  %v2671_v16 = vmul.f32 %v2666_v21, %v7501_v49  ;;  %v2682_v10 = vrot.slane %v2657_v4, %v6964_v15  ;;  %v2750_v36 = vsel %vm2749_vm5, %v7557_v59, %v2748_v60 }
 0x32a   : > { %v7590_v17 = vpop.permute.xlu1 %2799  ;;  %4237 = vrot.lane.b32.xlu0 %v6977_v37, %s5622_s4  ;;  %v2635_v19 = vadd.f32 %v2633_v30, %v2619_v33  ;;  %v2720_v20 = vrot.slane %v2711_v13, %v6961_v25  ;;  %v2751_v49 = vsel %vm2749_vm5, %v2748_v60, %v7557_v59  ;;  %v2688_v60 = vmul.f32 %v2686_v56, %v7606_v0 }
 0x32b   : > { %v2620_v18 = vadd.f32 %v2618_v53, %v2582_v14  ;;  %v7669_v44 = vpop.permute.xlu0 %2784  ;;  %v5623_v53 = vmov 46   ;;  %v2765_v3 = vmul.f32 %v2758_v55, %v2751_v49  ;;  %v2766_v14 = vmul.f32 %v2762_v47, %v2750_v36 }
 0x32c   : > { %3464 = vperm.xlu1 %5210, %v7522_v45   ;;  %5240 = vset.pattern.permute.xlu0 %v5623_v53  ;;  %v2673_v4 = vadd.f32 %v2671_v16, %v2635_v19  ;;  %v2687_v59 = vmul.f32 %v2682_v10, %v7606_v0  ;;  %v2725_v9 = vmul.f32 %v2720_v20, %v7623_v43  ;;  %v2861_v19 = vld [vmem:[#allocation10 + $0x24] ss:$8 sm:$0x3]  ;;  %vm3591_vm4 = vcmp.lt.s32.totalorder %v7159_v62, 109 }
 0x32d   : > { %v2636_v6 = vadd.f32 %v2634_v42, %v2620_v18  ;;  %v2726_v31 = vmul.f32 %v2724_v52, %v7623_v43  ;;  %v2812_v24 = vrot.slane %v2807_v38, %v6961_v25  ;;  %v2736_v7 = vrot.slane %v2711_v13, %v6964_v15 }
 0x32e   : > { %v7608_v8 = vpop.permute.xlu1 %2801  ;;  %4274 = vperm.xlu0 %5240, %v7522_v45   ;;  %v2689_v33 = vadd.f32 %v2687_v59, %v2673_v4  ;;  %v2740_v29 = vrot.slane %v2712_v12, %v6964_v15  ;;  %v5624_v18 = vmov 47   ;;  %v2774_v43 = vrot.slane %v2765_v3, %v6961_v25 }
 0x32f   : > { %v2674_v35 = vadd.f32 %v2672_v57, %v2636_v6  ;;  %v7685_v27 = vpop.permute.xlu0 %2822  ;;  %v2778_v30 = vrot.slane %v2766_v14, %v6961_v25  ;;  %v2805_v13 = vsel %vm2803_vm6, %v7608_v8, %v7590_v17  ;;  %v2741_v16 = vmul.f32 %v2736_v7, %v7544_v61 }
 0x330   : > { %3479 = vrot.lane.b32.xlu1 %v6973_v23, %s5595_s15  ;;  %v2727_v12 = vadd.f32 %v2725_v9, %v2689_v33  ;;  %v2742_v57 = vmul.f32 %v2740_v29, %v7544_v61  ;;  %v2819_v47 = vmul.f32 %v2812_v24, %v2805_v13  ;;  %v2866_v52 = vrot.slane %v2861_v19, %v6961_v25  ;;  %s5625_s15 = smov 99  }
 0x331   : > { %5211 = vset.pattern.permute.xlu1 %v8359_v32  ;;  %v2690_v21 = vadd.f32 %v2688_v60, %v2674_v35  ;;  %v2870_v36 = vrot.slane %v2861_v19, %v6964_v15  ;;  %v2790_v49 = vrot.slane %v2765_v3, %v6964_v15  ;;  %v2794_v61 = vrot.slane %v2766_v14, %v6964_v15 }
 0x332   : > { %v7625_v40 = vpop.permute.xlu1 %2838  ;;  %5241 = vset.pattern.permute.xlu0 %v5624_v18  ;;  %v2743_v56 = vadd.f32 %v2741_v16, %v2727_v12  ;;  %v8361_v35 = vmov 35   ;;  %vm3645_vm5 = vcmp.lt.s32.totalorder %v7159_v62, 99 }
 0x333   : > { %4312 = vperm.xlu0 %5241, %v7469_v63   ;;  %v2728_v42 = vadd.f32 %v2726_v31, %v2690_v21  ;;  %v2856_v55 = vpop.permute.xlu0 %2855  ;;  %v2915_v31 = vld [vmem:[#allocation10 + $0x25] ss:$8 sm:$0x3]  ;;  %v2795_v33 = vmul.f32 %v2790_v49, %v7669_v44 }
 0x334   : > { %3502 = vperm.xlu1 %5211, %v7469_v63   ;;  %v2920_v29 = vrot.slane %v2915_v31, %v6961_v25 }
 0x335   : > { %v2744_v20 = vadd.f32 %v2742_v57, %v2728_v42 }
 0x336   : > { %v7635_v34 = vpop.permute.xlu1 %2853 }
 0x337   : > { %v2858_v4 = vsel %vm2857_vm7, %v7635_v34, %v2856_v55  ;;  %v7738_v60 = vpop.permute.xlu0 %2892  ;;  %4345 = vrot.lane.b32.xlu0 %v6977_v37, %s5626_s11 }
 0x338   : > { %3533 = vrot.lane.b32.xlu1 %v6973_v23, %s5621_s1 }
 0x339   : > { %5214 = vset.pattern.permute.xlu1 %v8360_v51  ;;  %v2816_v51 = vrot.slane %v2807_v38, %v6964_v15  ;;  %v2828_v38 = vrot.slane %v2819_v47, %v6961_v25 }
 0x33a   : > { %v7657_v32 = vpop.permute.xlu1 %2876 }
 0x33b   : > { %v2833_v21 = vmul.f32 %v2828_v38, %v7685_v27 }
 0x33c   : > { %3535 = vrot.lane.b32.xlu1 %v6977_v37, %s5621_s1 }
 0x33e   : > { %v7671_v28 = vpop.permute.xlu1 %2907 }
 0x340   : > { %3572 = vperm.xlu1 %5214, %v7522_v45  }
 0x342   : > { %v7687_v46 = vpop.permute.xlu1 %2909 }
 0x343   : > { %v2912_v19 = vsel %vm2911_vm8, %v7671_v28, %v7687_v46  ;;  %v2913_v16 = vsel %vm2911_vm8, %v7687_v46, %v7671_v28  ;;  %vm3807_vm8 = vcmp.lt.s32.totalorder %v7159_v62, 96 }
 0x344   : > { %3587 = vrot.lane.b32.xlu1 %v6973_v23, %s5599_s18  ;;  %s5628_s18 = smov 97  }
 0x345   : > { %5215 = vset.pattern.permute.xlu1 %v5600_v54  ;;  %v2804_v54 = vsel %vm2803_vm6, %v7590_v17, %v7608_v8  ;;  %v2779_v17 = vmul.f32 %v2774_v43, %v7578_v11  ;;  %v2780_v8 = vmul.f32 %v2778_v30, %v7578_v11  ;;  %v2859_v11 = vsel %vm2857_vm7, %v2856_v55, %v7635_v34  ;;  %v2931_v30 = vpop.permute.xlu0 %2930 }
 0x346   : > { %v7702_v0 = vpop.permute.xlu1 %2946  ;;  %v2820_v6 = vmul.f32 %v2816_v51, %v2804_v54  ;;  %v2873_v24 = vmul.f32 %v2866_v52, %v2859_v11  ;;  %v2874_v51 = vmul.f32 %v2870_v36, %v2858_v4  ;;  %v2796_v34 = vmul.f32 %v2794_v61, %v7669_v44 }
 0x347   : > { %v2781_v3 = vadd.f32 %v2779_v17, %v2743_v56  ;;  %v2782_v14 = vadd.f32 %v2780_v8, %v2744_v20  ;;  %v2924_v43 = vrot.slane %v2915_v31, %v6964_v15  ;;  %v2844_v44 = vrot.slane %v2819_v47, %v6964_v15  ;;  %v2969_v17 = vld [vmem:[#allocation10 + $0x26] ss:$8 sm:$0x3] }
 0x348   : > { %3610 = vperm.xlu1 %5215, %v7469_v63   ;;  %v2832_v59 = vrot.slane %v2820_v6, %v6961_v25  ;;  %v2848_v42 = vrot.slane %v2820_v6, %v6964_v15  ;;  %v2882_v55 = vrot.slane %v2873_v24, %v6961_v25  ;;  %v5627_v8 = vmov 48  }
 0x349   : > { %v2797_v13 = vadd.f32 %v2795_v33, %v2781_v3  ;;  %v2798_v12 = vadd.f32 %v2796_v34, %v2782_v14  ;;  %5244 = vset.pattern.permute.xlu0 %v5627_v8  ;;  %v2927_v56 = vmul.f32 %v2920_v29, %v2913_v16  ;;  %v2928_v20 = vmul.f32 %v2924_v43, %v2912_v19  ;;  %v2964_v49 = vpop.permute.xlu0 %2963 }
 0x34a   : > { %v7720_v10 = vpop.permute.xlu1 %2961  ;;  %v2834_v7 = vmul.f32 %v2832_v59, %v7685_v27  ;;  %v2886_v27 = vrot.slane %v2874_v51, %v6961_v25  ;;  %4382 = vperm.xlu0 %5244, %v7522_v45   ;;  %v2849_v52 = vmul.f32 %v2844_v44, %v7625_v40  ;;  %v2850_v36 = vmul.f32 %v2848_v42, %v7625_v40 }
 0x34b   : > { %v2835_v57 = vadd.f32 %v2833_v21, %v2797_v13  ;;  %v2887_v28 = vmul.f32 %v2882_v55, %v7657_v32  ;;  %v2974_v61 = vrot.slane %v2969_v17, %v6961_v25  ;;  %v2978_v4 = vrot.slane %v2969_v17, %v6964_v15 }
 0x34c   : > { %3641 = vrot.lane.b32.xlu1 %v6973_v23, %s5625_s15  ;;  %v2836_v47 = vadd.f32 %v2834_v7, %v2798_v12  ;;  %v2888_v46 = vmul.f32 %v2886_v27, %v7657_v32  ;;  %v2898_v38 = vrot.slane %v2873_v24, %v6964_v15  ;;  %v2902_v40 = vrot.slane %v2874_v51, %v6964_v15  ;;  %v3023_v51 = vld [vmem:[#allocation10 + $0x27] ss:$8 sm:$0x3] }
 0x34d   : > { %5218 = vset.pattern.permute.xlu1 %v8361_v35  ;;  %v2851_v11 = vadd.f32 %v2849_v52, %v2835_v57  ;;  %v2936_v32 = vrot.slane %v2927_v56, %v6961_v25  ;;  %v2940_v3 = vrot.slane %v2928_v20, %v6961_v25  ;;  %v2966_v14 = vsel %vm2965_vm9, %v7720_v10, %v2964_v49  ;;  %v3001_v12 = vpop.permute.xlu0 %3000 }
 0x34e   : > { %v7740_v9 = vpop.permute.xlu1 %2984  ;;  %v2852_v35 = vadd.f32 %v2850_v36, %v2836_v47  ;;  %v8362_v31 = vmov 0   ;;  %v2903_v34 = vmul.f32 %v2898_v38, %v7738_v60  ;;  %v2904_v21 = vmul.f32 %v2902_v40, %v7738_v60 }
 0x34f   : > { %5246 = vset.pattern.permute.xlu0 %v8362_v31  ;;  %v2889_v33 = vadd.f32 %v2887_v28, %v2851_v11  ;;  %v2982_v29 = vmul.f32 %v2978_v4, %v2966_v14  ;;  %v2941_v43 = vmul.f32 %v2936_v32, %v2931_v30  ;;  %v2942_v13 = vmul.f32 %v2940_v3, %v2931_v30 }
 0x350   : > { %3643 = vrot.lane.b32.xlu1 %v6977_v37, %s5625_s15  ;;  %v2890_v24 = vadd.f32 %v2888_v46, %v2852_v35  ;;  %v3028_v55 = vrot.slane %v3023_v51, %v6961_v25  ;;  %v3032_v27 = vrot.slane %v3023_v51, %v6964_v15  ;;  %v2952_v19 = vrot.slane %v2927_v56, %v6964_v15 }
 0x351   : > { %v2956_v60 = vrot.slane %v2928_v20, %v6964_v15  ;;  %v2994_v47 = vrot.slane %v2982_v29, %v6961_v25  ;;  %v3039_v36 = vpop.permute.xlu0 %3038  ;;  %v3010_v38 = vrot.slane %v2982_v29, %v6964_v15  ;;  %vm3699_vm6 = vcmp.lt.s32.totalorder %v7159_v62, 98 }
 0x352   : > { %v7750_v54 = vpop.permute.xlu1 %3015  ;;  %v2906_v42 = vadd.f32 %v2904_v21, %v2890_v24  ;;  %v2957_v46 = vmul.f32 %v2952_v19, %v7702_v0  ;;  %vm3753_vm7 = vcmp.lt.s32.totalorder %v7159_v62, 97 }
 0x354   : > { %3680 = vperm.xlu1 %5218, %v7522_v45   ;;  %v2944_v52 = vadd.f32 %v2942_v13, %v2906_v42  ;;  %v3080_v13 = vrot.slane %v6977_v37, %v6961_v25 }
 0x355   : > { %v3087_v4 = vpop.permute.xlu0 %3086 }
 0x356   : > { %v3018_v6 = vpop.permute.xlu1 %3017 }
 0x357   : > { %v3020_v30 = vsel %vm3019_vm10, %v7750_v54, %v3018_v6  ;;  %v3021_v16 = vsel %vm3019_vm10, %v3018_v6, %v7750_v54  ;;  %vm3915_vm10 = vcmp.lt.s32.totalorder %v7159_v62, 94 }
 0x358   : > { %3695 = vrot.lane.b32.xlu1 %v6973_v23, %s5603_s22  ;;  %v3035_v28 = vmul.f32 %v3028_v55, %v3021_v16  ;;  %v3036_v20 = vmul.f32 %v3032_v27, %v3020_v30  ;;  %s5630_s22 = smov 93  }
 0x359   : > { %5219 = vset.pattern.permute.xlu1 %v5604_v22  ;;  %v2967_v22 = vsel %vm2965_vm9, %v2964_v49, %v7720_v10  ;;  %v2905_v10 = vadd.f32 %v2903_v34, %v2889_v33  ;;  %v2958_v49 = vmul.f32 %v2956_v60, %v7702_v0  ;;  %v3012_v33 = vmul.f32 %v3010_v38, %v3001_v12  ;;  %v3109_v34 = vld [vmem:[#allocation10 + $0x31] ss:$8 sm:$0x3] }
 0x35a   : > { %v7781_v59 = vpop.permute.xlu1 %3054  ;;  %v2981_v7 = vmul.f32 %v2974_v61, %v2967_v22  ;;  %v3044_v40 = vrot.slane %v3035_v28, %v6961_v25  ;;  %v3048_v32 = vrot.slane %v3036_v20, %v6961_v25  ;;  %v3125_v22 = vpop.permute.xlu0 %3124  ;;  %v3060_v29 = vrot.slane %v3035_v28, %v6964_v15  ;;  %v3163_v28 = vld [vmem:[#allocation10 + $0x32] ss:$8 sm:$0x3] }
 0x35b   : > { %v2943_v17 = vadd.f32 %v2941_v43, %v2905_v10  ;;  %v2960_v61 = vadd.f32 %v2958_v49, %v2944_v52  ;;  %v3064_v43 = vrot.slane %v3036_v20, %v6964_v15  ;;  %v3114_v10 = vrot.slane %v3109_v34, %v6961_v25 }
 0x35c   : > { %3718 = vperm.xlu1 %5219, %v7469_v63   ;;  %v2990_v57 = vrot.slane %v2981_v7, %v6961_v25  ;;  %v3006_v35 = vrot.slane %v2981_v7, %v6964_v15  ;;  %v3049_v24 = vmul.f32 %v3044_v40, %v3039_v36  ;;  %v3050_v51 = vmul.f32 %v3048_v32, %v3039_v36 }
 0x35d   : > { %v2959_v6 = vadd.f32 %v2957_v46, %v2943_v17  ;;  %v3118_v42 = vrot.slane %v3109_v34, %v6964_v15  ;;  %v3065_v16 = vmul.f32 %v3060_v29, %v7781_v59  ;;  %v3092_v17 = vrot.slane %v6973_v23, %v6964_v15 }
 0x35e   : > { %v2995_v54 = vmul.f32 %v2990_v57, %v7740_v9  ;;  %v3158_v30 = vpop.permute.xlu0 %3157  ;;  %v3066_v57 = vmul.f32 %v3064_v43, %v7781_v59  ;;  %v3168_v59 = vrot.slane %v3163_v28, %v6961_v25  ;;  %vm3861_vm9 = vcmp.lt.s32.totalorder %v7159_v62, 95 }
 0x35f   : > { %v7796_v44 = vpop.permute.xlu1 %3070 }
 0x360   : > { %3749 = vrot.lane.b32.xlu1 %v6973_v23, %s5628_s18  ;;  %v2997_v3 = vadd.f32 %v2995_v54, %v2959_v6  ;;  %v3082_v54 = vmul.f32 %v3080_v13, %v7796_v44 }
 0x361   : > { %5222 = vset.pattern.permute.xlu1 %v5605_v5  ;;  %v2996_v5 = vmul.f32 %v2994_v47, %v7740_v9  ;;  %v3011_v9 = vmul.f32 %v3006_v35, %v3001_v12  ;;  %v3076_v12 = vrot.slane %v6973_v23, %v6961_v25  ;;  %v3096_v47 = vrot.slane %v6977_v37, %v6964_v15 }
 0x362   : > { %v3195_v38 = vpop.permute.xlu0 %3194 }
 0x363   : > { %v3102_v56 = vpop.permute.xlu1 %3101  ;;  %v2998_v0 = vadd.f32 %v2996_v5, %v2960_v61  ;;  %v3013_v21 = vadd.f32 %v3011_v9, %v2997_v3  ;;  %v3081_v49 = vmul.f32 %v3076_v12, %v7796_v44  ;;  %v3172_v5 = vrot.slane %v3163_v28, %v6964_v15  ;;  %v3217_v9 = vld [vmem:[#allocation10 + $0x33] ss:$8 sm:$0x3] }
 0x364   : > { %3751 = vrot.lane.b32.xlu1 %v6977_v37, %s5628_s18  ;;  %v3097_v44 = vmul.f32 %v3092_v17, %v3087_v4  ;;  %v3222_v43 = vrot.slane %v3217_v9, %v6961_v25  ;;  %v3226_v13 = vrot.slane %v3217_v9, %v6964_v15 }
 0x365   : > { %v3014_v7 = vadd.f32 %v3012_v33, %v2998_v0  ;;  %v3051_v27 = vadd.f32 %v3049_v24, %v3013_v21  ;;  %v3098_v0 = vmul.f32 %v3096_v47, %v3087_v4 }
 0x366   : > { %v3233_v21 = vpop.permute.xlu0 %3232 }
 0x367   : > { %v3104_v11 = vpop.permute.xlu1 %3103  ;;  %v3052_v19 = vadd.f32 %v3050_v51, %v3014_v7 }
 0x368   : > { %3788 = vperm.xlu1 %5222, %v7522_v45   ;;  %v3107_v60 = vsel %vm3105_vm11, %v3104_v11, %v3102_v56 }
 0x369   : > { %v3122_v36 = vmul.f32 %v3118_v42, %v3107_v60  ;;  %v3068_v46 = vadd.f32 %v3066_v57, %v3052_v19  ;;  %v3271_v60 = vld [vmem:[#allocation10 + $0x34] ss:$8 sm:$0x3] }
 0x36a   : > { %v3266_v17 = vpop.permute.xlu0 %3265  ;;  %v3276_v28 = vrot.slane %v3271_v60, %v6961_v25 }
 0x36b   : > { %v7822_v14 = vpop.permute.xlu1 %3140  ;;  %v3134_v61 = vrot.slane %v3122_v36, %v6961_v25  ;;  %v3084_v3 = vadd.f32 %v3082_v54, %v3068_v46  ;;  %v3150_v12 = vrot.slane %v3122_v36, %v6964_v15 }
 0x36c   : > { %3803 = vrot.lane.b32.xlu1 %v6973_v23, %s5606_s24  ;;  %s5631_s24 = smov 82  }
 0x36d   : > { %5223 = vset.pattern.permute.xlu1 %v5607_v1  ;;  %v3106_v1 = vsel %vm3105_vm11, %v3102_v56, %v3104_v11  ;;  %v3067_v56 = vadd.f32 %v3065_v16, %v3051_v27  ;;  %v3136_v51 = vmul.f32 %v3134_v61, %v3125_v22  ;;  %v3100_v29 = vadd.f32 %v3098_v0, %v3084_v3 }
 0x36e   : > { %v3121_v52 = vmul.f32 %v3114_v10, %v3106_v1  ;;  %v3152_v47 = vmul.f32 %v3150_v12, %v7822_v14  ;;  %vm3969_vm11 = vcmp.lt.s32.totalorder %v7159_v62, 93 }
 0x36f   : > { %v3156_v55 = vpop.permute.xlu1 %3155  ;;  %v3083_v32 = vadd.f32 %v3081_v49, %v3067_v56  ;;  %v3138_v19 = vadd.f32 %v3136_v51, %v3100_v29  ;;  %v3280_v56 = vrot.slane %v3271_v60, %v6964_v15  ;;  %v3325_v51 = vld [vmem:[#allocation10 + $0x35] ss:$8 sm:$0x3]  ;;  %v3303_v29 = vpop.permute.xlu0 %3302 }
 0x370   : > { %3826 = vperm.xlu1 %5223, %v7469_v63   ;;  %v3130_v6 = vrot.slane %v3121_v52, %v6961_v25  ;;  %v3160_v11 = vsel %vm3159_vm12, %v3156_v55, %v3158_v30  ;;  %v3161_v35 = vsel %vm3159_vm12, %v3158_v30, %v3156_v55  ;;  %v3146_v4 = vrot.slane %v3121_v52, %v6964_v15 }
 0x371   : > { %v3176_v33 = vmul.f32 %v3172_v5, %v3161_v35  ;;  %v3099_v7 = vadd.f32 %v3097_v44, %v3083_v32  ;;  %v3154_v49 = vadd.f32 %v3152_v47, %v3138_v19  ;;  %vm4023_vm12 = vcmp.lt.s32.totalorder %v7159_v62, 83 }
 0x372   : > { %v3135_v24 = vmul.f32 %v3130_v6, %v3125_v22  ;;  %v3151_v57 = vmul.f32 %v3146_v4, %v7822_v14 }
 0x373   : > { %v3179_v20 = vpop.permute.xlu1 %3178  ;;  %v3188_v22 = vrot.slane %v3176_v33, %v6961_v25 }
 0x374   : > { %3857 = vrot.lane.b32.xlu1 %v6973_v23, %s5629_s8  ;;  %v3137_v27 = vadd.f32 %v3135_v24, %v3099_v7 }
 0x375   : > { %5226 = vset.pattern.permute.xlu1 %v5609_v41  ;;  %v3175_v41 = vmul.f32 %v3168_v59, %v3160_v11  ;;  %v3190_v36 = vmul.f32 %v3188_v22, %v3179_v20  ;;  %v3204_v59 = vrot.slane %v3176_v33, %v6964_v15  ;;  %v3341_v22 = vpop.permute.xlu0 %3340 }
 0x376   : > { %v3153_v46 = vadd.f32 %v3151_v57, %v3137_v27 }
 0x377   : > { %v3210_v40 = vpop.permute.xlu1 %3209  ;;  %v3184_v55 = vrot.slane %v3175_v41, %v6961_v25  ;;  %v3200_v54 = vrot.slane %v3175_v41, %v6964_v15  ;;  %v3192_v11 = vadd.f32 %v3190_v36, %v3154_v49  ;;  %v3206_v44 = vmul.f32 %v3204_v59, %v3195_v38 }
 0x378   : > { %3859 = vrot.lane.b32.xlu1 %v6977_v37, %s5629_s8 }
 0x379   : > { %v3189_v52 = vmul.f32 %v3184_v55, %v3179_v20  ;;  %v3205_v3 = vmul.f32 %v3200_v54, %v3195_v38  ;;  %v3208_v33 = vadd.f32 %v3206_v44, %v3192_v11 }
 0x37b   : > { %v3212_v34 = vpop.permute.xlu1 %3211  ;;  %v3191_v20 = vadd.f32 %v3189_v52, %v3153_v46  ;;  %v3379_v52 = vld [vmem:[#allocation10 + $0x36] ss:$8 sm:$0x3] }
 0x37c   : > { %3896 = vperm.xlu1 %5226, %v7522_v45   ;;  %v3214_v10 = vsel %vm3213_vm13, %v3210_v40, %v3212_v34  ;;  %v3215_v42 = vsel %vm3213_vm13, %v3212_v34, %v3210_v40  ;;  %v3388_v49 = vrot.slane %v3379_v52, %v6964_v15  ;;  %vm4077_vm13 = vcmp.lt.s32.totalorder %v7159_v62, 82 }
 0x37d   : > { %v3229_v30 = vmul.f32 %v3222_v43, %v3214_v10  ;;  %v3230_v16 = vmul.f32 %v3226_v13, %v3215_v42  ;;  %v3207_v41 = vadd.f32 %v3205_v3, %v3191_v20  ;;  %v3334_v13 = vrot.slane %v3325_v51, %v6964_v15  ;;  %v7897_v3 = vld [vmem:[#allocation7] sm:$0xf] }
 0x37f   : > { %v3249_v1 = vpop.permute.xlu1 %3248  ;;  %v3238_v14 = vrot.slane %v3229_v30, %v6961_v25  ;;  %v3254_v24 = vrot.slane %v3229_v30, %v6964_v15 }
 0x380   : > { %3911 = vrot.lane.b32.xlu1 %v6973_v23, %s5610_s30  ;;  %s5633_s30 = smov 78  }
 0x381   : > { %5227 = vset.pattern.permute.xlu1 %v5611_v50  ;;  %v3242_v50 = vrot.slane %v3230_v16, %v6961_v25  ;;  %v3243_v0 = vmul.f32 %v3238_v14, %v3233_v21  ;;  %v3259_v4 = vmul.f32 %v3254_v24, %v3249_v1 }
 0x383   : > { %v3264_v5 = vpop.permute.xlu1 %3263  ;;  %v3244_v9 = vmul.f32 %v3242_v50, %v3233_v21  ;;  %v3245_v43 = vadd.f32 %v3243_v0, %v3207_v41  ;;  %v3374_v50 = vpop.permute.xlu0 %3373 }
 0x384   : > { %v3268_v6 = vsel %vm3267_vm14, %v3264_v5, %v3266_v17  ;;  %v3269_v61 = vsel %vm3267_vm14, %v3266_v17, %v3264_v5  ;;  %3934 = vperm.xlu1 %5227, %v7469_v63   ;;  %v3258_v63 = vrot.slane %v3230_v16, %v6964_v15  ;;  %vm4131_vm14 = vcmp.lt.s32.totalorder %v7159_v62, 81 }
 0x385   : > { %v3283_v35 = vmul.f32 %v3276_v28, %v3268_v6  ;;  %v3284_v40 = vmul.f32 %v3280_v56, %v3269_v61  ;;  %v3246_v21 = vadd.f32 %v3244_v9, %v3208_v33  ;;  %v3261_v27 = vadd.f32 %v3259_v4, %v3245_v43 }
 0x386   : > { %v3260_v12 = vmul.f32 %v3258_v63, %v3249_v1 }
 0x387   : > { %v3287_v32 = vpop.permute.xlu1 %3286  ;;  %v3292_v34 = vrot.slane %v3283_v35, %v6961_v25  ;;  %v3296_v7 = vrot.slane %v3284_v40, %v6961_v25  ;;  %v3308_v16 = vrot.slane %v3283_v35, %v6964_v15  ;;  %v3312_v57 = vrot.slane %v3284_v40, %v6964_v15 }
 0x388   : > { %3965 = vrot.lane.b32.xlu1 %v6973_v23, %s5630_s22  ;;  %v3262_v19 = vadd.f32 %v3260_v12, %v3246_v21 }
 0x389   : > { %5230 = vset.pattern.permute.xlu1 %v5612_v2  ;;  %v3330_v2 = vrot.slane %v3325_v51, %v6961_v25  ;;  %v3297_v10 = vmul.f32 %v3292_v34, %v3287_v32  ;;  %v3298_v42 = vmul.f32 %v3296_v7, %v3287_v32  ;;  %v3313_v54 = vmul.f32 %v3308_v16, %v3303_v29 }
 0x38a   : > { %v3314_v59 = vmul.f32 %v3312_v57, %v3303_v29  ;;  %v3411_v29 = vpop.permute.xlu0 %3410 }
 0x38b   : > { %v3318_v38 = vpop.permute.xlu1 %3317  ;;  %v3299_v36 = vadd.f32 %v3297_v10, %v3261_v27  ;;  %v3300_v28 = vadd.f32 %v3298_v42, %v3262_v19 }
 0x38c   : > { %3967 = vrot.lane.b32.xlu1 %v6977_v37, %s5630_s22 }
 0x38d   : > { %v3315_v20 = vadd.f32 %v3313_v54, %v3299_v36  ;;  %v3316_v11 = vadd.f32 %v3314_v59, %v3300_v28  ;;  %v3487_v36 = vld [vmem:[#allocation10 + $0x40] ss:$8 sm:$0x3] }
 0x38e   : > { %v3449_v16 = vpop.permute.xlu0 %3448  ;;  %v3496_v54 = vrot.slane %v3487_v36, %v6964_v15 }
 0x38f   : > { %v3320_v55 = vpop.permute.xlu1 %3319 }
 0x390   : > { %v3322_v60 = vsel %vm3321_vm15, %v3318_v38, %v3320_v55  ;;  %v3323_v30 = vsel %vm3321_vm15, %v3320_v55, %v3318_v38  ;;  %4004 = vperm.xlu1 %5230, %v7522_v45   ;;  %v3384_v45 = vrot.slane %v3379_v52, %v6961_v25  ;;  %vm4185_vm15 = vcmp.lt.s32.totalorder %v7159_v62, 80 }
 0x391   : > { %v3337_v47 = vmul.f32 %v3330_v2, %v3322_v60  ;;  %v3338_v17 = vmul.f32 %v3334_v13, %v3323_v30  ;;  %v3433_v13 = vld [vmem:[#allocation10 + $0x37] ss:$8 sm:$0x3] }
 0x392   : > { %v3438_v19 = vrot.slane %v3433_v13, %v6961_v25  ;;  %v3442_v60 = vrot.slane %v3433_v13, %v6964_v15 }
 0x393   : > { %v3357_v1 = vpop.permute.xlu1 %3356  ;;  %v3346_v56 = vrot.slane %v3337_v47, %v6961_v25  ;;  %v3350_v46 = vrot.slane %v3338_v17, %v6961_v25  ;;  %v3362_v6 = vrot.slane %v3337_v47, %v6964_v15  ;;  %v3366_v61 = vrot.slane %v3338_v17, %v6964_v15  ;;  %v7910_v47 = vld [vmem:[#allocation7 + $0x4] sm:$0xf] }
 0x394   : > { %4019 = vrot.lane.b32.xlu1 %v6973_v23, %s5614_s23 }
 0x395   : > { %v3351_v5 = vmul.f32 %v3346_v56, %v3341_v22  ;;  %v3352_v14 = vmul.f32 %v3350_v46, %v3341_v22  ;;  %5231 = vset.pattern.permute.xlu1 %v5615_v26  ;;  %v3367_v33 = vmul.f32 %v3362_v6, %v3357_v1  ;;  %v3368_v26 = vmul.f32 %v3366_v61, %v3357_v1  ;;  %v3482_v6 = vpop.permute.xlu0 %3481 }
 0x397   : > { %v3372_v35 = vpop.permute.xlu1 %3371  ;;  %v3353_v44 = vadd.f32 %v3351_v5, %v3315_v20  ;;  %v3354_v0 = vadd.f32 %v3352_v14, %v3316_v11 }
 0x398   : > { %v3376_v40 = vsel %vm3375_vm0, %v3372_v35, %v3374_v50  ;;  %v3377_v32 = vsel %vm3375_vm0, %v3374_v50, %v3372_v35  ;;  %4042 = vperm.xlu1 %5231, %v7897_v3   ;;  %vm4239_vm0 = vcmp.lt.s32.totalorder %v7159_v62, 79 }
 0x399   : > { %v3391_v9 = vmul.f32 %v3384_v45, %v3376_v40  ;;  %v3392_v41 = vmul.f32 %v3388_v49, %v3377_v32  ;;  %v3369_v38 = vadd.f32 %v3367_v33, %v3353_v44  ;;  %v3370_v43 = vadd.f32 %v3368_v26, %v3354_v0 }
 0x39a   : > { %v3492_v49 = vrot.slane %v3487_v36, %v6961_v25 }
 0x39b   : > { %v3395_v24 = vpop.permute.xlu1 %3394  ;;  %v3400_v63 = vrot.slane %v3391_v9, %v6961_v25  ;;  %v3404_v51 = vrot.slane %v3392_v41, %v6961_v25  ;;  %v3416_v34 = vrot.slane %v3391_v9, %v6964_v15  ;;  %v3420_v7 = vrot.slane %v3392_v41, %v6964_v15 }
 0x39c   : > { %4073 = vrot.lane.b32.xlu1 %v6973_v23, %s5631_s24 }
 0x39d   : > { %v3405_v21 = vmul.f32 %v3400_v63, %v3395_v24  ;;  %v3406_v2 = vmul.f32 %v3404_v51, %v3395_v24  ;;  %5234 = vset.pattern.permute.xlu1 %v5616_v39  ;;  %v3421_v10 = vmul.f32 %v3416_v34, %v3411_v29  ;;  %v3422_v42 = vmul.f32 %v3420_v7, %v3411_v29  ;;  %v3519_v63 = vpop.permute.xlu0 %3518  ;;  %v3541_v7 = vld [vmem:[#allocation10 + $0x41] ss:$8 sm:$0x3] }
 0x39f   : > { %v3407_v4 = vadd.f32 %v3405_v21, %v3369_v38  ;;  %v3408_v12 = vadd.f32 %v3406_v2, %v3370_v43  ;;  %v3426_v55 = vpop.permute.xlu1 %3425 }
 0x3a0   : > { %4075 = vrot.lane.b32.xlu1 %v6977_v37, %s5631_s24 }
 0x3a1   : > { %v3423_v22 = vadd.f32 %v3421_v10, %v3407_v4  ;;  %v3424_v27 = vadd.f32 %v3422_v42, %v3408_v12  ;;  %v3546_v12 = vrot.slane %v3541_v7, %v6961_v25  ;;  %v3550_v10 = vrot.slane %v3541_v7, %v6964_v15 }
 0x3a3   : > { %v3428_v30 = vpop.permute.xlu1 %3427 }
 0x3a4   : > { %v3430_v57 = vsel %vm3429_vm1, %v3426_v55, %v3428_v30  ;;  %v3431_v39 = vsel %vm3429_vm1, %v3428_v30, %v3426_v55  ;;  %4112 = vperm.xlu1 %5234, %v7910_v47   ;;  %v3557_v55 = vpop.permute.xlu0 %3556  ;;  %vm4293_vm1 = vcmp.lt.s32.totalorder %v7159_v62, 78 }
 0x3a5   : > { %v3445_v17 = vmul.f32 %v3438_v19, %v3430_v57  ;;  %v3446_v52 = vmul.f32 %v3442_v60, %v3431_v39  ;;  %v3595_v60 = vld [vmem:[#allocation10 + $0x42] ss:$8 sm:$0x3] }
 0x3a6   : > { %v3604_v36 = vrot.slane %v3595_v60, %v6964_v15 }
 0x3a7   : > { %v3470_v28 = vrot.slane %v3445_v17, %v6964_v15  ;;  %v3474_v1 = vrot.slane %v3446_v52, %v6964_v15  ;;  %v3465_v56 = vpop.permute.xlu1 %3464  ;;  %v3454_v46 = vrot.slane %v3445_v17, %v6961_v25  ;;  %v3458_v45 = vrot.slane %v3446_v52, %v6961_v25 }
 0x3a8   : > { %4127 = vrot.lane.b32.xlu1 %v6973_v23, %s5618_s17  ;;  %v3600_v52 = vrot.slane %v3595_v60, %v6961_v25 }
 0x3a9   : > { %v3475_v59 = vmul.f32 %v3470_v28, %v3465_v56  ;;  %v3476_v5 = vmul.f32 %v3474_v1, %v3465_v56  ;;  %v3459_v14 = vmul.f32 %v3454_v46, %v3449_v16  ;;  %v3460_v50 = vmul.f32 %v3458_v45, %v3449_v16  ;;  %5235 = vset.pattern.permute.xlu1 %v5619_v58  ;;  %v3590_v45 = vpop.permute.xlu0 %3589 }
 0x3ab   : > { %v3461_v61 = vadd.f32 %v3459_v14, %v3423_v22  ;;  %v3462_v20 = vadd.f32 %v3460_v50, %v3424_v27  ;;  %v3480_v11 = vpop.permute.xlu1 %3479 }
 0x3ac   : > { %v3484_v35 = vsel %vm3483_vm2, %v3480_v11, %v3482_v6  ;;  %v3485_v40 = vsel %vm3483_vm2, %v3482_v6, %v3480_v11  ;;  %4150 = vperm.xlu1 %5235, %v7897_v3   ;;  %vm4347_vm2 = vcmp.lt.s32.totalorder %v7159_v62, 77 }
 0x3ad   : > { %v3499_v32 = vmul.f32 %v3492_v49, %v3484_v35  ;;  %v3500_v44 = vmul.f32 %v3496_v54, %v3485_v40  ;;  %v3477_v0 = vadd.f32 %v3475_v59, %v3461_v61  ;;  %v3478_v9 = vadd.f32 %v3476_v5, %v3462_v20 }
 0x3af   : > { %v3503_v41 = vpop.permute.xlu1 %3502  ;;  %v3508_v33 = vrot.slane %v3499_v32, %v6961_v25  ;;  %v3512_v26 = vrot.slane %v3500_v44, %v6961_v25  ;;  %v3524_v24 = vrot.slane %v3499_v32, %v6964_v15  ;;  %v3528_v58 = vrot.slane %v3500_v44, %v6964_v15  ;;  %v3627_v44 = vpop.permute.xlu0 %3626 }
 0x3b0   : > { %4181 = vrot.lane.b32.xlu1 %v6973_v23, %s5632_s16 }
 0x3b1   : > { %v3513_v51 = vmul.f32 %v3508_v33, %v3503_v41  ;;  %v3514_v34 = vmul.f32 %v3512_v26, %v3503_v41  ;;  %5238 = vset.pattern.permute.xlu1 %v5620_v48  ;;  %v3529_v43 = vmul.f32 %v3524_v24, %v3519_v63  ;;  %v3530_v21 = vmul.f32 %v3528_v58, %v3519_v63  ;;  %v3649_v41 = vld [vmem:[#allocation10 + $0x43] ss:$8 sm:$0x3] }
 0x3b2   : > { %v3654_v7 = vrot.slane %v3649_v41, %v6961_v25 }
 0x3b3   : > { %v3515_v29 = vadd.f32 %v3513_v51, %v3477_v0  ;;  %v3516_v38 = vadd.f32 %v3514_v34, %v3478_v9  ;;  %v3534_v2 = vpop.permute.xlu1 %3533 }
 0x3b4   : > { %4183 = vrot.lane.b32.xlu1 %v6977_v37, %s5632_s16 }
 0x3b5   : > { %v3531_v13 = vadd.f32 %v3529_v43, %v3515_v29  ;;  %v3532_v4 = vadd.f32 %v3530_v21, %v3516_v38  ;;  %v3658_v29 = vrot.slane %v3649_v41, %v6964_v15  ;;  %v3665_v43 = vpop.permute.xlu0 %3664 }
 0x3b7   : > { %v3536_v42 = vpop.permute.xlu1 %3535 }
 0x3b8   : > { %v3538_v22 = vsel %vm3537_vm3, %v3534_v2, %v3536_v42  ;;  %v3539_v48 = vsel %vm3537_vm3, %v3536_v42, %v3534_v2  ;;  %4220 = vperm.xlu1 %5238, %v7910_v47   ;;  %vm4424_vm3 = vcmask 1043456  }
 0x3b9   : > { %v3553_v27 = vmul.f32 %v3546_v12, %v3538_v22  ;;  %v3554_v19 = vmul.f32 %v3550_v10, %v3539_v48 }
 0x3bb   : > { %v3578_v30 = vrot.slane %v3553_v27, %v6964_v15  ;;  %v3582_v16 = vrot.slane %v3554_v19, %v6964_v15  ;;  %v3573_v57 = vpop.permute.xlu1 %3572  ;;  %v3562_v39 = vrot.slane %v3553_v27, %v6961_v25  ;;  %v3566_v17 = vrot.slane %v3554_v19, %v6961_v25 }
 0x3bc   : > { %4235 = vrot.lane.b32.xlu1 %v6973_v23, %s5622_s4  ;;  %s8364_s4 = sld [smem:[#allocation45_spill]] }
 0x3bd   : > { %v3583_v28 = vmul.f32 %v3578_v30, %v3573_v57  ;;  %v3584_v1 = vmul.f32 %v3582_v16, %v3573_v57  ;;  %v3567_v56 = vmul.f32 %v3562_v39, %v3557_v55  ;;  %v3568_v46 = vmul.f32 %v3566_v17, %v3557_v55  ;;  %5239 = vset.pattern.permute.xlu1 %v5623_v53  ;;  %v3698_v30 = vpop.permute.xlu0 %3697 }
 0x3bf   : > { %v3569_v49 = vadd.f32 %v3567_v56, %v3531_v13  ;;  %v3570_v54 = vadd.f32 %v3568_v46, %v3532_v4  ;;  %v3588_v59 = vpop.permute.xlu1 %3587  ;;  %v3703_v4 = vld [vmem:[#allocation10 + $0x44] ss:$8 sm:$0x3]  ;;  %v4397_v56 = vld [vmem:[%s8363_s19] sm:$0xf] }
 0x3c0   : > { %v3592_v5 = vsel %vm3591_vm4, %v3588_v59, %v3590_v45  ;;  %v3593_v14 = vsel %vm3591_vm4, %v3590_v45, %v3588_v59  ;;  %4258 = vperm.xlu1 %5239, %v7897_v3   ;;  %v3708_v22 = vrot.slane %v3703_v4, %v6961_v25  ;;  %vm4433_vm4 = vcmask 3072  }
 0x3c1   : > { %v3607_v50 = vmul.f32 %v3600_v52, %v3592_v5  ;;  %v3608_v6 = vmul.f32 %v3604_v36, %v3593_v14  ;;  %v3585_v61 = vadd.f32 %v3583_v28, %v3569_v49  ;;  %v3586_v20 = vadd.f32 %v3584_v1, %v3570_v54  ;;  %v3735_v59 = vpop.permute.xlu0 %3734  ;;  %v3757_v14 = vld [vmem:[#allocation10 + $0x45] ss:$8 sm:$0x3] }
 0x3c3   : > { %v3611_v11 = vpop.permute.xlu1 %3610  ;;  %v3616_v35 = vrot.slane %v3607_v50, %v6961_v25  ;;  %v3620_v40 = vrot.slane %v3608_v6, %v6961_v25  ;;  %v3632_v32 = vrot.slane %v3607_v50, %v6964_v15  ;;  %v3636_v53 = vrot.slane %v3608_v6, %v6964_v15 }
 0x3c4   : > { %4289 = vrot.lane.b32.xlu1 %v6973_v23, %s5633_s30 }
 0x3c5   : > { %v3621_v0 = vmul.f32 %v3616_v35, %v3611_v11  ;;  %v3622_v9 = vmul.f32 %v3620_v40, %v3611_v11  ;;  %5242 = vset.pattern.permute.xlu1 %v5624_v18  ;;  %v3637_v24 = vmul.f32 %v3632_v32, %v3627_v44  ;;  %v3638_v58 = vmul.f32 %v3636_v53, %v3627_v44 }
 0x3c6   : > { %v3762_v32 = vrot.slane %v3757_v14, %v6961_v25  ;;  %v3766_v53 = vrot.slane %v3757_v14, %v6964_v15 }
 0x3c7   : > { %v3623_v33 = vadd.f32 %v3621_v0, %v3585_v61  ;;  %v3624_v26 = vadd.f32 %v3622_v9, %v3586_v20  ;;  %v3642_v63 = vpop.permute.xlu1 %3641 }
 0x3c8   : > { %4291 = vrot.lane.b32.xlu1 %v6977_v37, %s5633_s30 }
 0x3c9   : > { %v3639_v51 = vadd.f32 %v3637_v24, %v3623_v33  ;;  %v3640_v34 = vadd.f32 %v3638_v58, %v3624_v26  ;;  %v3773_v33 = vpop.permute.xlu0 %3772 }
 0x3cb   : > { %v3644_v38 = vpop.permute.xlu1 %3643 }
 0x3cc   : > { %v3646_v21 = vsel %vm3645_vm5, %v3642_v63, %v3644_v38  ;;  %v3647_v18 = vsel %vm3645_vm5, %v3644_v38, %v3642_v63  ;;  %4328 = vperm.xlu1 %5242, %v7910_v47   ;;  %v3712_v47 = vrot.slane %v3703_v4, %v6964_v15 }
 0x3cd   : > { %v3661_v2 = vmul.f32 %v3654_v7, %v3646_v21  ;;  %v3662_v13 = vmul.f32 %v3658_v29, %v3647_v18 }
 0x3cf   : > { %v3686_v12 = vrot.slane %v3661_v2, %v6964_v15  ;;  %v3690_v37 = vrot.slane %v3662_v13, %v6964_v15  ;;  %v3681_v10 = vpop.permute.xlu1 %3680  ;;  %v3670_v42 = vrot.slane %v3661_v2, %v6961_v25  ;;  %v3674_v55 = vrot.slane %v3662_v13, %v6961_v25 }
 0x3d0   : > { %4343 = vrot.lane.b32.xlu1 %v6973_v23, %s5626_s11 }
 0x3d1   : > { %v3691_v48 = vmul.f32 %v3686_v12, %v3681_v10  ;;  %v3692_v27 = vmul.f32 %v3690_v37, %v3681_v10  ;;  %v3675_v19 = vmul.f32 %v3670_v42, %v3665_v43  ;;  %v3676_v60 = vmul.f32 %v3674_v55, %v3665_v43  ;;  %5243 = vset.pattern.permute.xlu1 %v5627_v8  ;;  %v3806_v10 = vpop.permute.xlu0 %3805 }
 0x3d3   : > { %v3677_v16 = vadd.f32 %v3675_v19, %v3639_v51  ;;  %v3678_v57 = vadd.f32 %v3676_v60, %v3640_v34  ;;  %v3696_v39 = vpop.permute.xlu1 %3695 }
 0x3d4   : > { %v3700_v17 = vsel %vm3699_vm6, %v3696_v39, %v3698_v30  ;;  %v3701_v52 = vsel %vm3699_vm6, %v3698_v30, %v3696_v39  ;;  %4366 = vperm.xlu1 %5243, %v7897_v3   ;;  %v3865_v39 = vld [vmem:[#allocation10 + $0x47] ss:$8 sm:$0x3] }
 0x3d5   : > { %v3715_v23 = vmul.f32 %v3708_v22, %v3700_v17  ;;  %v3716_v36 = vmul.f32 %v3712_v47, %v3701_v52  ;;  %v3693_v28 = vadd.f32 %v3691_v48, %v3677_v16  ;;  %v3694_v1 = vadd.f32 %v3692_v27, %v3678_v57  ;;  %v3843_v22 = vpop.permute.xlu0 %3842  ;;  %v3811_v47 = vld [vmem:[#allocation10 + $0x46] ss:$8 sm:$0x3] }
 0x3d6   : > { %v3816_v19 = vrot.slane %v3811_v47, %v6961_v25  ;;  %v3820_v60 = vrot.slane %v3811_v47, %v6964_v15  ;;  %v4027_v47 = vld [vmem:[#allocation10 + $0x52] ss:$8 sm:$0x3] }
 0x3d7   : > { %v3719_v46 = vpop.permute.xlu1 %3718  ;;  %v3724_v45 = vrot.slane %v3715_v23, %v6961_v25  ;;  %v3728_v8 = vrot.slane %v3716_v36, %v6961_v25  ;;  %v3740_v49 = vrot.slane %v3715_v23, %v6964_v15  ;;  %v3744_v54 = vrot.slane %v3716_v36, %v6964_v15 }
 0x3d8   : > { %5245 = vset.pattern.permute.xlu1 %v8362_v31 }
 0x3d9   : > { %v3729_v3 = vmul.f32 %v3724_v45, %v3719_v46  ;;  %v3730_v5 = vmul.f32 %v3728_v8, %v3719_v46  ;;  %4400 = vperm.xlu1 %5245, %v4397_v56   ;;  %v3745_v61 = vmul.f32 %v3740_v49, %v3735_v59  ;;  %v3746_v20 = vmul.f32 %v3744_v54, %v3735_v59  ;;  %v3881_v27 = vpop.permute.xlu0 %3880 }
 0x3db   : > { %v3731_v50 = vadd.f32 %v3729_v3, %v3693_v28  ;;  %v3732_v6 = vadd.f32 %v3730_v5, %v3694_v1  ;;  %v3750_v11 = vpop.permute.xlu1 %3749  ;;  %v3870_v28 = vrot.slane %v3865_v39, %v6961_v25  ;;  %v3874_v1 = vrot.slane %v3865_v39, %v6964_v15  ;;  %v3919_v3 = vld [vmem:[#allocation10 + $0x50] ss:$8 sm:$0x3] }
 0x3dd   : > { %v3747_v35 = vadd.f32 %v3745_v61, %v3731_v50  ;;  %v3748_v40 = vadd.f32 %v3746_v20, %v3732_v6  ;;  %v3914_v23 = vpop.permute.xlu0 %3913  ;;  %v3924_v20 = vrot.slane %v3919_v3, %v6961_v25 }
 0x3df   : > { %v3752_v44 = vpop.permute.xlu1 %3751 }
 0x3e0   : > { %v3754_v0 = vsel %vm3753_vm7, %v3750_v11, %v3752_v44  ;;  %v3755_v31 = vsel %vm3753_vm7, %v3752_v44, %v3750_v11  ;;  %v3928_v11 = vrot.slane %v3919_v3, %v6964_v15 }
 0x3e1   : > { %v3769_v9 = vmul.f32 %v3762_v32, %v3754_v0  ;;  %v3770_v41 = vmul.f32 %v3766_v53, %v3755_v31  ;;  %v7998_v5 = vpop.permute.xlu0 %3950 }
 0x3e3   : > { %v3794_v26 = vrot.slane %v3769_v9, %v6964_v15  ;;  %v3798_v24 = vrot.slane %v3770_v41, %v6964_v15  ;;  %v3789_v58 = vpop.permute.xlu1 %3788  ;;  %v3778_v63 = vrot.slane %v3769_v9, %v6961_v25  ;;  %v3782_v51 = vrot.slane %v3770_v41, %v6961_v25  ;;  %v3973_v41 = vld [vmem:[#allocation10 + $0x51] ss:$8 sm:$0x3] }
 0x3e5   : > { %v3799_v34 = vmul.f32 %v3794_v26, %v3789_v58  ;;  %v3800_v7 = vmul.f32 %v3798_v24, %v3789_v58  ;;  %v3783_v29 = vmul.f32 %v3778_v63, %v3773_v33  ;;  %v3784_v38 = vmul.f32 %v3782_v51, %v3773_v33  ;;  %v3989_v0 = vpop.permute.xlu0 %3988 }
 0x3e7   : > { %v3785_v43 = vadd.f32 %v3783_v29, %v3747_v35  ;;  %v3786_v21 = vadd.f32 %v3784_v38, %v3748_v40  ;;  %v3804_v18 = vpop.permute.xlu1 %3803  ;;  %v3982_v29 = vrot.slane %v3973_v41, %v6964_v15 }
 0x3e8   : > { %v3808_v30 = vsel %vm3807_vm8, %v3804_v18, %v3806_v10  ;;  %v3809_v16 = vsel %vm3807_vm8, %v3806_v10, %v3804_v18 }
 0x3e9   : > { %v3801_v2 = vadd.f32 %v3799_v34, %v3785_v43  ;;  %v3802_v13 = vadd.f32 %v3800_v7, %v3786_v21  ;;  %v3823_v17 = vmul.f32 %v3816_v19, %v3808_v30  ;;  %v3824_v52 = vmul.f32 %v3820_v60, %v3809_v16 }
 0x3ea   : > { %v3978_v7 = vrot.slane %v3973_v41, %v6961_v25 }
 0x3eb   : > { %v3827_v4 = vpop.permute.xlu1 %3826  ;;  %v3832_v45 = vrot.slane %v3823_v17, %v6961_v25  ;;  %v3836_v8 = vrot.slane %v3824_v52, %v6961_v25  ;;  %v3848_v6 = vrot.slane %v3823_v17, %v6964_v15  ;;  %v3852_v61 = vrot.slane %v3824_v52, %v6964_v15 }
 0x3ed   : > { %v3837_v14 = vmul.f32 %v3832_v45, %v3827_v4  ;;  %v3838_v50 = vmul.f32 %v3836_v8, %v3827_v4  ;;  %v3853_v58 = vmul.f32 %v3848_v6, %v3843_v22  ;;  %v3854_v63 = vmul.f32 %v3852_v61, %v3843_v22 }
 0x3ef   : > { %v3858_v12 = vpop.permute.xlu1 %3857  ;;  %v3839_v31 = vadd.f32 %v3837_v14, %v3801_v2  ;;  %v3840_v9 = vadd.f32 %v3838_v50, %v3802_v13 }
 0x3f1   : > { %v3855_v38 = vadd.f32 %v3853_v58, %v3839_v31  ;;  %v3856_v43 = vadd.f32 %v3854_v63, %v3840_v9 }
 0x3f3   : > { %v3860_v37 = vpop.permute.xlu1 %3859 }
 0x3f4   : > { %v3862_v56 = vsel %vm3861_vm9, %v3858_v12, %v3860_v37  ;;  %v3863_v46 = vsel %vm3861_vm9, %v3860_v37, %v3858_v12  ;;  %v4022_v37 = vpop.permute.xlu0 %4021 }
 0x3f5   : > { %v3877_v54 = vmul.f32 %v3870_v28, %v3862_v56  ;;  %v3878_v59 = vmul.f32 %v3874_v1, %v3863_v46 }
 0x3f7   : > { %v7983_v42 = vpop.permute.xlu1 %3896  ;;  %v3886_v40 = vrot.slane %v3877_v54, %v6961_v25  ;;  %v3890_v32 = vrot.slane %v3878_v59, %v6961_v25  ;;  %v3902_v21 = vrot.slane %v3877_v54, %v6964_v15  ;;  %v3906_v18 = vrot.slane %v3878_v59, %v6964_v15  ;;  %v4081_v59 = vld [vmem:[#allocation10 + $0x53] ss:$8 sm:$0x3] }
 0x3f8   : > { %v4059_v46 = vpop.permute.xlu0 %4058 }
 0x3f9   : > { %v3891_v51 = vmul.f32 %v3886_v40, %v3881_v27  ;;  %v3892_v34 = vmul.f32 %v3890_v32, %v3881_v27  ;;  %v3907_v27 = vmul.f32 %v3902_v21, %v7983_v42  ;;  %v3908_v19 = vmul.f32 %v3906_v18, %v7983_v42 }
 0x3fa   : > { %v4086_v40 = vrot.slane %v4081_v59, %v6961_v25  ;;  %v4090_v32 = vrot.slane %v4081_v59, %v6964_v15 }
 0x3fb   : > { %v3912_v55 = vpop.permute.xlu1 %3911  ;;  %v3894_v22 = vadd.f32 %v3892_v34, %v3856_v43 }
 0x3fc   : > { %v3916_v53 = vsel %vm3915_vm10, %v3912_v55, %v3914_v23  ;;  %v3917_v44 = vsel %vm3915_vm10, %v3914_v23, %v3912_v55  ;;  %v3893_v55 = vadd.f32 %v3891_v51, %v3855_v38  ;;  %v4032_v23 = vrot.slane %v4027_v47, %v6961_v25 }
 0x3fd   : > { %v3931_v33 = vmul.f32 %v3924_v20, %v3916_v53  ;;  %v3932_v26 = vmul.f32 %v3928_v11, %v3917_v44  ;;  %v4097_v20 = vpop.permute.xlu0 %4096 }
 0x3fe   : > { %v3909_v52 = vadd.f32 %v3907_v27, %v3893_v55 }
 0x3ff   : > { %v7985_v48 = vpop.permute.xlu1 %3934  ;;  %v3940_v2 = vrot.slane %v3931_v33, %v6961_v25  ;;  %v3944_v13 = vrot.slane %v3932_v26, %v6961_v25  ;;  %v3956_v28 = vrot.slane %v3931_v33, %v6964_v15  ;;  %v3960_v1 = vrot.slane %v3932_v26, %v6964_v15 }
 0x401   : > { %v3945_v16 = vmul.f32 %v3940_v2, %v7985_v48  ;;  %v3946_v39 = vmul.f32 %v3944_v13, %v7985_v48  ;;  %v3961_v6 = vmul.f32 %v3956_v28, %v7998_v5  ;;  %v3962_v61 = vmul.f32 %v3960_v1, %v7998_v5 }
 0x403   : > { %v3966_v57 = vpop.permute.xlu1 %3965  ;;  %v3947_v8 = vadd.f32 %v3945_v16, %v3909_v52  ;;  %v4189_v16 = vld [vmem:[#allocation10 + $0x55] ss:$8 sm:$0x3] }
 0x405   : > { %v3963_v53 = vadd.f32 %v3961_v6, %v3947_v8 }
 0x407   : > { %v3968_v36 = vpop.permute.xlu1 %3967 }
 0x408   : > { %v3970_v4 = vsel %vm3969_vm11, %v3966_v57, %v3968_v36  ;;  %v3971_v12 = vsel %vm3969_vm11, %v3968_v36, %v3966_v57  ;;  %v3910_v57 = vadd.f32 %v3908_v19, %v3894_v22  ;;  %v4036_v36 = vrot.slane %v4027_v47, %v6964_v15 }
 0x409   : > { %v3985_v60 = vmul.f32 %v3978_v7, %v3970_v4  ;;  %v3986_v30 = vmul.f32 %v3982_v29, %v3971_v12  ;;  %v4130_v29 = vpop.permute.xlu0 %4129 }
 0x40a   : > { %v3948_v54 = vadd.f32 %v3946_v39, %v3910_v57 }
 0x40b   : > { %v7995_v49 = vpop.permute.xlu1 %4004  ;;  %v3994_v48 = vrot.slane %v3985_v60, %v6961_v25  ;;  %v3998_v45 = vrot.slane %v3986_v30, %v6961_v25  ;;  %v4010_v31 = vrot.slane %v3985_v60, %v6964_v15  ;;  %v4014_v9 = vrot.slane %v3986_v30, %v6964_v15 }
 0x40c   : > { %v3964_v44 = vadd.f32 %v3962_v61, %v3948_v54 }
 0x40d   : > { %v3999_v11 = vmul.f32 %v3994_v48, %v3989_v0  ;;  %v4015_v43 = vmul.f32 %v4010_v31, %v7995_v49  ;;  %v4016_v21 = vmul.f32 %v4014_v9, %v7995_v49  ;;  %v4167_v30 = vpop.permute.xlu0 %4166  ;;  %v4198_v48 = vrot.slane %v4189_v16, %v6964_v15 }
 0x40f   : > { %v4020_v35 = vpop.permute.xlu1 %4019  ;;  %v4001_v63 = vadd.f32 %v3999_v11, %v3963_v53  ;;  %v4243_v11 = vld [vmem:[#allocation10 + $0x56] ss:$8 sm:$0x3] }
 0x410   : > { %v4024_v42 = vsel %vm4023_vm12, %v4020_v35, %v4022_v37  ;;  %v4025_v56 = vsel %vm4023_vm12, %v4022_v37, %v4020_v35  ;;  %v4000_v35 = vmul.f32 %v3998_v45, %v3989_v0  ;;  %v4135_v0 = vld [vmem:[#allocation10 + $0x54] ss:$8 sm:$0x3]  ;;  %v4248_v9 = vrot.slane %v4243_v11, %v6961_v25 }
 0x411   : > { %v4039_v14 = vmul.f32 %v4032_v23, %v4024_v42  ;;  %v4040_v50 = vmul.f32 %v4036_v36, %v4025_v56  ;;  %v4140_v13 = vrot.slane %v4135_v0, %v6961_v25  ;;  %v4144_v4 = vrot.slane %v4135_v0, %v6964_v15  ;;  %v4205_v59 = vpop.permute.xlu0 %4204 }
 0x412   : > { %v4002_v51 = vadd.f32 %v4000_v35, %v3964_v44  ;;  %v4017_v12 = vadd.f32 %v4015_v43, %v4001_v63  ;;  %v4194_v56 = vrot.slane %v4189_v16, %v6961_v25 }
 0x413   : > { %v8007_v24 = vpop.permute.xlu1 %4042  ;;  %v4048_v33 = vrot.slane %v4039_v14, %v6961_v25  ;;  %v4052_v5 = vrot.slane %v4040_v50, %v6961_v25  ;;  %v4068_v55 = vrot.slane %v4040_v50, %v6964_v15 }
 0x414   : > { %v4018_v37 = vadd.f32 %v4016_v21, %v4002_v51 }
 0x415   : > { %v4053_v18 = vmul.f32 %v4048_v33, %v8007_v24  ;;  %v4054_v2 = vmul.f32 %v4052_v5, %v8007_v24  ;;  %v4238_v63 = vpop.permute.xlu0 %4237 }
 0x417   : > { %v4074_v10 = vpop.permute.xlu1 %4073  ;;  %v4055_v19 = vadd.f32 %v4053_v18, %v4017_v12  ;;  %v4056_v60 = vadd.f32 %v4054_v2, %v4018_v37 }
 0x41b   : > { %v4076_v17 = vpop.permute.xlu1 %4075 }
 0x41c   : > { %v4078_v26 = vsel %vm4077_vm13, %v4074_v10, %v4076_v17  ;;  %v4079_v58 = vsel %vm4077_vm13, %v4076_v17, %v4074_v10  ;;  %v4064_v10 = vrot.slane %v4039_v14, %v6964_v15  ;;  %v4070_v17 = vmul.f32 %v4068_v55, %v4059_v46 }
 0x41d   : > { %v4093_v34 = vmul.f32 %v4086_v40, %v4078_v26  ;;  %v4094_v7 = vmul.f32 %v4090_v32, %v4079_v58 }
 0x41e   : > { %v4069_v39 = vmul.f32 %v4064_v10, %v4059_v46  ;;  %v4072_v42 = vadd.f32 %v4070_v17, %v4056_v60 }
 0x41f   : > { %v8030_v3 = vpop.permute.xlu1 %4112  ;;  %v4102_v22 = vrot.slane %v4093_v34, %v6961_v25  ;;  %v4106_v47 = vrot.slane %v4094_v7, %v6961_v25  ;;  %v4118_v45 = vrot.slane %v4093_v34, %v6964_v15  ;;  %v4122_v8 = vrot.slane %v4094_v7, %v6964_v15 }
 0x420   : > { %v4071_v1 = vadd.f32 %v4069_v39, %v4055_v19 }
 0x421   : > { %v4107_v23 = vmul.f32 %v4102_v22, %v4097_v20  ;;  %v4108_v36 = vmul.f32 %v4106_v47, %v4097_v20  ;;  %v4123_v32 = vmul.f32 %v4118_v45, %v8030_v3  ;;  %v4124_v53 = vmul.f32 %v4122_v8, %v8030_v3  ;;  %v4297_v47 = vld [vmem:[#allocation10 + $0x57] ss:$8 sm:$0x3] }
 0x422   : > { %v4306_v39 = vrot.slane %v4297_v47, %v6964_v15 }
 0x423   : > { %v4128_v41 = vpop.permute.xlu1 %4127  ;;  %v4109_v6 = vadd.f32 %v4107_v23, %v4071_v1  ;;  %v4110_v61 = vadd.f32 %v4108_v36, %v4072_v42 }
 0x424   : > { %v4132_v49 = vsel %vm4131_vm14, %v4128_v41, %v4130_v29  ;;  %v4133_v24 = vsel %vm4131_vm14, %v4130_v29, %v4128_v41  ;;  %v4252_v41 = vrot.slane %v4243_v11, %v6964_v15 }
 0x425   : > { %v4147_v52 = vmul.f32 %v4140_v13, %v4132_v49  ;;  %v4148_v57 = vmul.f32 %v4144_v4, %v4133_v24  ;;  %v4125_v33 = vadd.f32 %v4123_v32, %v4109_v6  ;;  %v4126_v5 = vadd.f32 %v4124_v53, %v4110_v61 }
 0x427   : > { %v4151_v38 = vpop.permute.xlu1 %4150  ;;  %v4156_v14 = vrot.slane %v4147_v52, %v6961_v25  ;;  %v4160_v50 = vrot.slane %v4148_v57, %v6961_v25  ;;  %v4172_v26 = vrot.slane %v4147_v52, %v6964_v15  ;;  %v4176_v58 = vrot.slane %v4148_v57, %v6964_v15 }
 0x429   : > { %v4161_v44 = vmul.f32 %v4156_v14, %v4151_v38  ;;  %v4162_v31 = vmul.f32 %v4160_v50, %v4151_v38  ;;  %v4177_v2 = vmul.f32 %v4172_v26, %v4167_v30  ;;  %v4178_v13 = vmul.f32 %v4176_v58, %v4167_v30 }
 0x42a   : > { %v4302_v30 = vrot.slane %v4297_v47, %v6961_v25 }
 0x42b   : > { %v4182_v27 = vpop.permute.xlu1 %4181  ;;  %v4163_v29 = vadd.f32 %v4161_v44, %v4125_v33  ;;  %v4164_v38 = vadd.f32 %v4162_v31, %v4126_v5 }
 0x42d   : > { %v4179_v37 = vadd.f32 %v4177_v2, %v4163_v29  ;;  %v4180_v10 = vadd.f32 %v4178_v13, %v4164_v38 }
 0x42f   : > { %v4184_v28 = vpop.permute.xlu1 %4183 }
 0x430   : > { %v4186_v54 = vsel %vm4185_vm15, %v4182_v27, %v4184_v28  ;;  %v4187_v46 = vsel %vm4185_vm15, %v4184_v28, %v4182_v27  ;;  %v4275_v27 = vpop.permute.xlu0 %4274 }
 0x431   : > { %v4201_v35 = vmul.f32 %v4194_v56, %v4186_v54  ;;  %v4202_v40 = vmul.f32 %v4198_v48, %v4187_v46 }
 0x433   : > { %v4221_v20 = vpop.permute.xlu1 %4220  ;;  %v4210_v0 = vrot.slane %v4201_v35, %v6961_v25  ;;  %v4214_v3 = vrot.slane %v4202_v40, %v6961_v25  ;;  %v4226_v55 = vrot.slane %v4201_v35, %v6964_v15  ;;  %v4230_v22 = vrot.slane %v4202_v40, %v6964_v15 }
 0x434   : > { %v4313_v8 = vpop.permute.xlu0 %4312 }
 0x435   : > { %v4215_v4 = vmul.f32 %v4210_v0, %v4205_v59  ;;  %v4216_v12 = vmul.f32 %v4214_v3, %v4205_v59  ;;  %v4231_v17 = vmul.f32 %v4226_v55, %v4221_v20  ;;  %v4232_v52 = vmul.f32 %v4230_v22, %v4221_v20  ;;  %v4351_v59 = vld [vmem:[#allocation10 + $0x60] ss:$8 sm:$0x3] }
 0x436   : > { %v4356_v11 = vrot.slane %v4351_v59, %v6961_v25  ;;  %v4360_v35 = vrot.slane %v4351_v59, %v6964_v15 }
 0x437   : > { %v4236_v51 = vpop.permute.xlu1 %4235  ;;  %v4217_v60 = vadd.f32 %v4215_v4, %v4179_v37  ;;  %v4218_v16 = vadd.f32 %v4216_v12, %v4180_v10 }
 0x438   : > { %v4240_v34 = vsel %vm4239_vm0, %v4236_v51, %v4238_v63  ;;  %v4241_v7 = vsel %vm4239_vm0, %v4238_v63, %v4236_v51  ;;  %v4346_v5 = vpop.permute.xlu0 %4345 }
 0x439   : > { %v4255_v43 = vmul.f32 %v4248_v9, %v4240_v34  ;;  %v4256_v21 = vmul.f32 %v4252_v41, %v4241_v7  ;;  %v4233_v28 = vadd.f32 %v4231_v17, %v4217_v60  ;;  %v4234_v1 = vadd.f32 %v4232_v52, %v4218_v16  ;;  %v1738_v52 = vld [vmem:[#allocation2] sm:$0xf] }
 0x43b   : > { %v4259_v18 = vpop.permute.xlu1 %4258  ;;  %v4264_v49 = vrot.slane %v4255_v43, %v6961_v25  ;;  %v4268_v24 = vrot.slane %v4256_v21, %v6961_v25  ;;  %v4280_v48 = vrot.slane %v4255_v43, %v6964_v15  ;;  %v4284_v45 = vrot.slane %v4256_v21, %v6964_v15 }
 0x43c   : > { %v4383_v2 = vpop.permute.xlu0 %4382 }
 0x43d   : > { %v4269_v57 = vmul.f32 %v4264_v49, %v4259_v18  ;;  %v4270_v23 = vmul.f32 %v4268_v24, %v4259_v18  ;;  %v4285_v40 = vmul.f32 %v4280_v48, %v4275_v27  ;;  %v4286_v32 = vmul.f32 %v4284_v45, %v4275_v27 }
 0x43f   : > { %v4290_v19 = vpop.permute.xlu1 %4289  ;;  %v4271_v14 = vadd.f32 %v4269_v57, %v4233_v28  ;;  %v4272_v50 = vadd.f32 %v4270_v23, %v4234_v1  ;;  %v1739_v57 = vld [vmem:[#allocation2 + $0x8] sm:$0xf] }
 0x441   : > { %v4287_v41 = vadd.f32 %v4285_v40, %v4271_v14  ;;  %v4288_v33 = vadd.f32 %v4286_v32, %v4272_v50 }
 0x443   : > { %v4292_v36 = vpop.permute.xlu1 %4291 }
 0x444   : > { %v4294_v42 = vsel %vm4293_vm1, %v4290_v19, %v4292_v36  ;;  %v4295_v56 = vsel %vm4293_vm1, %v4292_v36, %v4290_v19 }
 0x445   : > { %v4309_v54 = vmul.f32 %v4302_v30, %v4294_v42  ;;  %v4310_v46 = vmul.f32 %v4306_v39, %v4295_v56 }
 0x447   : > { %v4318_v6 = vrot.slane %v4309_v54, %v6961_v25  ;;  %v4322_v61 = vrot.slane %v4310_v46, %v6961_v25  ;;  %v4329_v20 = vpop.permute.xlu1 %4328  ;;  %v4334_v31 = vrot.slane %v4309_v54, %v6964_v15  ;;  %v4338_v9 = vrot.slane %v4310_v46, %v6964_v15 }
 0x449   : > { %v4323_v53 = vmul.f32 %v4318_v6, %v4313_v8  ;;  %v4324_v44 = vmul.f32 %v4322_v61, %v4313_v8  ;;  %v4339_v34 = vmul.f32 %v4334_v31, %v4329_v20  ;;  %v4340_v7 = vmul.f32 %v4338_v9, %v4329_v20  ;;  %v4431_v8 = vld [vmem:[%s8364_s4] sm:$0xf] }
 0x44b   : > { %v4344_v26 = vpop.permute.xlu1 %4343  ;;  %v4325_v51 = vadd.f32 %v4323_v53, %v4287_v41  ;;  %v4326_v62 = vadd.f32 %v4324_v44, %v4288_v33 }
 0x44c   : > { %v4348_v58 = vsel %vm4347_vm2, %v4344_v26, %v4346_v5  ;;  %v4349_v63 = vsel %vm4347_vm2, %v4346_v5, %v4344_v26 }
 0x44d   : > { %v4363_v0 = vmul.f32 %v4356_v11, %v4348_v58  ;;  %v4364_v3 = vmul.f32 %v4360_v35, %v4349_v63  ;;  %v4341_v13 = vadd.f32 %v4339_v34, %v4325_v51  ;;  %v4342_v4 = vadd.f32 %v4340_v7, %v4326_v62 }
 0x44f   : > { %v4367_v29 = vpop.permute.xlu1 %4366  ;;  %v4372_v38 = vrot.slane %v4363_v0, %v6961_v25  ;;  %v4376_v43 = vrot.slane %v4364_v3, %v6961_v25  ;;  %v4388_v21 = vrot.slane %v4363_v0, %v6964_v15  ;;  %v4392_v18 = vrot.slane %v4364_v3, %v6964_v15 }
 0x451   : > { %v4377_v12 = vmul.f32 %v4372_v38, %v4367_v29  ;;  %v4378_v37 = vmul.f32 %v4376_v43, %v4367_v29  ;;  %v4393_v22 = vmul.f32 %v4388_v21, %v4383_v2  ;;  %v4394_v47 = vmul.f32 %v4392_v18, %v4383_v2 }
 0x453   : > { %v4379_v10 = vadd.f32 %v4377_v12, %v4341_v13  ;;  %v4380_v55 = vadd.f32 %v4378_v37, %v4342_v4 }
 0x454   : > { %v4401_v49 = vpop.permute.xlu1 %4400 }
 0x455   : > { %v4395_v24 = vadd.f32 %v4393_v22, %v4379_v10  ;;  %v4396_v27 = vadd.f32 %v4394_v47, %v4380_v55 }
 0x457   : > { %v4403_v19 = vadd.f32 %v4401_v49, %v4395_v24  ;;  %v4404_v60 = vadd.f32 %v4401_v49, %v4396_v27 }
 0x459   : > { %v4755_v16 = vmul.f32 -1.442695, %v4403_v19  ;;  %v4756_v25 = vmul.f32 -1.442695, %v4404_v60 }
 0x45b   : > { %5247 = vpow2.f32 %v4755_v16 }
 0x45c   : > { %5249 = vpow2.f32 %v4756_v25 }
 0x468   : > { %v5248_v15 = vpop.eup %5247 }
 0x469   : > { %v5250_v30 = vpop.eup %5249  ;;  %v4411_v39 = vadd.f32 1.0, %v5248_v15 }
 0x46a   : > { %v4412_v17 = vadd.f32 1.0, %v5250_v30 }
 0x46b   : > { %5251 = vrcp.f32 %v4411_v39 }
 0x46c   : > { %5253 = vrcp.f32 %v4412_v17 }
 0x478   : > { %v5252_v23 = vpop.eup %5251 }
 0x479   : > { %v5254_v36 = vpop.eup %5253  ;;  %v4422_v28 = vmul.f32 %v5252_v23, %v1738_v52 }
 0x47a   : > { %v4419_v1 = vcombine.low %v5252_v23, %v5254_v36  ;;  %v4423_v42 = vmul.f32 %v5254_v36, %v1739_v57 }
 0x47b   : > { %v4425_v56 = vsel %vm4424_vm3, %v4422_v28, 0.0 }
 0x47c   : > { %4421 = vst [vmem:[%s382_s25] sm:$0xff] %v4419_v1  ;;  %v4426_v48 = vsel %vm4424_vm3, %v4423_v42, 0.0 }
 0x47d   : > { %v4427_v45 = vadd.f32 %v4426_v48, %v4425_v56 }
 0x47f   : > { %4428 = vadd.xlane.f32.xlu1 %v4427_v45 }
 0x508   : > { %v4429_v54 = vpop.xlane.xlu1 %4428 }
 0x509   : > { %v4430_v46 = vmul.f32 0.00390625, %v4429_v54 }
 0x50b   : > { %v4432_v59 = vadd.f32 %v4431_v8, %v4430_v46 }
 0x50d   : > { %4434 = vst.msk [vmem:[%s5923_s20] sm:$0xf] %vm4433_vm4, %v4432_v59 }
 0x50e PF: > { %s8365_s15 = sld [smem:[#allocation21_spill]]  ;;  %s4457_s27 = sshll.u32 %s382_s25, 4  ;;  %s4458_s27 = int_to_ptr.vmem [resolvable:$true] %s4457_s27 }
 0x50f   : > { %s8367_s18 = sld [smem:[#allocation24_spill]]  ;;  %s4440_s23 = scalar_lea.sflag [#allocation6], %s380_s21 }
 0x510   : > { %s8368_s16 = sld [smem:[#allocation47_spill]]  ;;  %s5367_s19 = scalar_lea.vmem %s4458_s27, 128 }
 0x511   : > { %p5368_p11 = scmp.ne.s32.totalorder %s4458_s27, %s5367_s19  ;;  %s5634_s20 = smov [#allocation11]  }
 0x512   : > { %s5371_s17 = sshll.u32 %s5634_s20, 4  ;;  %s5372_s17 = int_to_ptr.vmem [resolvable:$false] %s5371_s17 }
 0x513   : > { %s5373_s1 = scalar_lea.vmem %s5372_s17, 256  ;;  %p5374_p5 = scmp.lt.s32.totalorder %s4458_s27, %s5372_s17 }
 0x514   : > { %s4764_s8 = sshll.u32 %s8365_s15, 7  ;;  %p5375_p4 = scmp.lt.s32.totalorder %s5373_s1, %s5367_s19 }
 0x515   : > { %p8369_p10 = scmp.ne.s32.totalorder %s8367_s18, 0 }
 0x516   : > { %s4455_s30 = scalar_lea.hbm %s8368_s16, %s4764_s8  ;;  %p5376_p7 = por %p5375_p4, %p5374_p5 }
 0x517   : > { %p5369_p1 = pnand %p5368_p11, %p8369_p10 }
 0x519   : > { %p5370_p0 = pneg %p5369_p1 }
 0x51b   : > { %p5377_p9 = pnand %p5376_p7, %p5370_p0 }
 0x51d   : > { %5380 = shalt.err (!%p5377_p9)
}
 0x51e   : > { %s5381_s4 = scalar_lea.hbm %s4455_s30, 128  ;;  %s5385_s25 = scalar_lea.hbm %s8368_s16, 256 }
 0x51f   : > { %p5382_p13 = scmp.ne.s32.totalorder %s4455_s30, %s5381_s4  ;;  %p5386_p6 = scmp.lt.s32.totalorder %s4455_s30, %s8368_s16 }
 0x520   : > { %p5387_p2 = scmp.lt.s32.totalorder %s5385_s25, %s5381_s4 }
 0x521   : > { %p5383_p8 = pnand %p5382_p13, %p8369_p10 }
 0x522   : > { %p5388_p12 = por %p5387_p2, %p5386_p6 }
 0x523   : > { %p5384_p3 = pneg %p5383_p8 }
 0x525   : > { %p5389_p11 = pnand %p5388_p12, %p5384_p3 }
 0x527   : > { %5392 = shalt.err (!%p5389_p11)
}
 0x528   : > { %4777 = dma.vmem_to_hbm [thread:$0]  (%p8369_p10), %s4458_s27, 128, %s4455_s30, %s4440_s23  }
 0x529 PF: > { %s8370_s8 = sld [smem:[#allocation17_spill]]  ;;  %p4802_p1 = scmp.ge.s32.totalorder %s5523_s14, 2 }
 0x52a   : > { %s8371_s22 = sld [smem:[#allocation25_spill]] }
 0x52f   : > { %s4476_s24 = sand.u32 1, %s8370_s8  }
 0x530   : > { %p8372_p0 = scmp.ne.s32.totalorder %s8371_s22, 0  ;;  %s4477_s19 = scalar_lea.sflag [#allocation6], %s4476_s24 }
 0x532   : > { %p4794_p5 = pnand %p4802_p1, %p8372_p0 }
 0x534   : > { %p4795_p4 = pneg %p4794_p5 }
 0x536   : > { %5466 = dma.done.wait (%p4795_p4), %s4477_s19, 128  }
 0x537   : > { %5468 = vsyncadd (%p4795_p4), %s4477_s19, 4294967168  ;;  %s25_s14 = sadd.s32 1, %s5523_s14   ;;  %s8374_s24 = sld [smem:[#allocation18_spill]] }
 0x538   : > { %p8127_p7 = scmp.ge.s32.totalorder %s25_s14, 6   ;;  %s8375_s30 = sld [smem:[#allocation19_spill]] }
 0x539   : > { %s8376_s18 = sld [smem:[#allocation26_spill]]  ;;  %s8378_s25 = smov %s5479_s26 }
 0x53a   : > { %s8377_s23 = sld [smem:[#allocation27_spill]]  ;;  %s8379_s26 = smov %s5829_s2 }
 0x53b   : > { %s8380_s27 = smov %s5487_s28  ;;  %s8381_s28 = smov %s5491_s29 }
 0x53c   : > { %s8382_s29 = smov %s5869_s6  ;;  %s8383_s8 = smov %s5503_s9 }
 0x53d   : > { %s8384_s9 = smov %s5832_s10  ;;  %s8385_s10 = smov %s5515_s12 }
 0x53e   : > { %s8386_s11 = smov %s5519_s13  ;;  %24 = sbr.rel (!%p8127_p7) target bundleno = 17 (0x11), region = 176 }
 0x53f   : > { %s8387_s12 = smov %s8376_s18 }
 0x540   : > { %s8388_s13 = smov %s8377_s23 }
 0x543   :  { %4482 = vsyncpa [#allocation5], 1 }
 0x544   :  { %4484 = vsyncpa [#allocation5 + $0x1], 1 }
 0x545   :  { %4485 = vsyncpa [#allocation8], 1 }
 0x546   :  { %4486 = vsyncpa [#allocation6], 1 }
 0x547   :  { %4488 = vsyncpa [#allocation6 + $0x1], 1 }

</bundles_post_ra>
